<compile_context>
chip_gen: v7x
topology: tpu7x:2x2x1
jax: 0.10.0
libtpu: 0.0.40
codegen_flags: <defaults>
</compile_context>

<pallas_src>
import functools

import jax
import jax.numpy as jnp
from jax import lax
from jax.experimental import pallas as pl
from jax.experimental.pallas import tpu as pltpu


def _resblock_kernel(x_ref, w1_ref, b1_ref, w2_ref, b2_ref, o_ref,
                     xpad_ref, hpad_ref, patch_ref, *, H, W, res_scale):
    """One batch element per grid step, channel-major layout.

    x_ref    : (1, C, H*W)        f32   flattened NCHW input block
    w1_ref   : (C, 9*C)           bf16  conv1 weights, K ordered (ky, kx, cin)
    b1_ref   : (C, 1)             f32
    w2_ref   : (C, 9*C)           bf16  conv2 weights
    b2_ref   : (C, 1)             f32
    o_ref    : (1, C, H*W)        f32   output block (lane-dense)
    xpad_ref : (C, (H+3)*(W+2))   f32   flattened zero-padded input image
    hpad_ref : (C, (H+3)*(W+2))   f32   flattened zero-padded ReLU(conv1(x))
    patch_ref: (9*C, H*(W+2))     bf16  im2col patches (MXU RHS)
    """
    C = x_ref.shape[1]
    P = W + 2              # padded row width
    HP = H * P             # output positions on the padded-width ("q") grid

    # Zero the padded scratches every step: only the border actually needs it
    # (the interior is rewritten below), but a full zero is a handful of vector
    # stores and stays correct under megacore "parallel" batch partitioning.
    xpad_ref[...] = jnp.zeros_like(xpad_ref)
    hpad_ref[...] = jnp.zeros_like(hpad_ref)

    # Scatter the compact (C, H*W) input into the padded flat image:
    #   xpad[c, (y+1)*P + 1 + x] = x[c, y*W + x]
    for y in range(H):
        xpad_ref[:, (y + 1) * P + 1:(y + 1) * P + 1 + W] = (
            x_ref[0, :, y * W:(y + 1) * W])

    def im2col(src_ref):
        # patch[(3*ky + kx)*C + ci, q] = src[ci, q + ky*P + kx],  q = y*P + x.
        # Every tap is a contiguous *lane* slice of the flattened padded image.
        for ky in range(3):
            for kx in range(3):
                t = 3 * ky + kx
                d = ky * P + kx
                patch_ref[t * C:(t + 1) * C, :] = (
                    src_ref[:, d:d + HP].astype(jnp.bfloat16))
        return patch_ref[...]

    # ---- conv1: one (C, 9C) @ (9C, H*P) MXU matmul, bias, ReLU --------------
    h = jnp.dot(w1_ref[...], im2col(xpad_ref),
                preferred_element_type=jnp.float32)          # (C, H*P) f32
    h = jnp.maximum(h + b1_ref[...], 0.0)

    # Each padded-width row carries 2 junk columns (x in {W, W+1}); zero them
    # so the bulk store below lands zeros exactly on hpad's border positions.
    col = lax.broadcasted_iota(jnp.int32, h.shape, 1) % P
    h = jnp.where(col < W, h, 0.0)
    # hpad[c, r*P + s] = h[c, (r-1)*P + (s-1)] for the valid interior.
    hpad_ref[:, P + 1:P + 1 + HP] = h

    # ---- conv2: same single-matmul scheme, bias -----------------------------
    out = jnp.dot(w2_ref[...], im2col(hpad_ref),
                  preferred_element_type=jnp.float32)        # (C, H*P) f32
    out = out + b2_ref[...]

    # ---- residual add; gather valid columns back onto the compact grid ------
    for y in range(H):
        res = (x_ref[0, :, y * W:(y + 1) * W]
               + out[:, y * P:y * P + W] * res_scale)
        o_ref[0, :, y * W:(y + 1) * W] = res.astype(o_ref.dtype)


def residual_block_no_bn(x_nchw, w1, b1, w2, b2, *, res_scale: float = 1.0):
    """Pallas TPU implementation of ResidualBlockNoBN.forward.

    Args:
      x_nchw: (N, C, H, W) float32 input (PyTorch convention).
      w1, w2: (C, C, 3, 3) conv weights (PyTorch OIHW convention).
      b1, b2: (C,) biases.
    Returns:
      (N, C, H, W) float32 output.
    """
    N, C, H, W = x_nchw.shape
    P = W + 2

    # Free, contiguous reshape: stays channel-major, no transpose anywhere.
    x_flat = x_nchw.reshape(N, C, H * W)

    # OIHW -> (O, ky, kx, I) -> (O, 9*I); bf16 MXU operands (f32 accumulate).
    w1_mat = jnp.transpose(w1, (0, 2, 3, 1)).reshape(C, 9 * C).astype(jnp.bfloat16)
    w2_mat = jnp.transpose(w2, (0, 2, 3, 1)).reshape(C, 9 * C).astype(jnp.bfloat16)
    b1_col = b1.reshape(C, 1).astype(jnp.float32)
    b2_col = b2.reshape(C, 1).astype(jnp.float32)

    kernel = functools.partial(_resblock_kernel, H=H, W=W, res_scale=res_scale)

    out_flat = pl.pallas_call(
        kernel,
        out_shape=jax.ShapeDtypeStruct((N, C, H * W), x_nchw.dtype),
        grid_spec=pltpu.PrefetchScalarGridSpec(
            num_scalar_prefetch=0,
            grid=(N,),
            in_specs=[
                pl.BlockSpec((1, C, H * W), lambda n: (n, 0, 0)),   # x
                pl.BlockSpec((C, 9 * C), lambda n: (0, 0)),         # w1
                pl.BlockSpec((C, 1), lambda n: (0, 0)),             # b1
                pl.BlockSpec((C, 9 * C), lambda n: (0, 0)),         # w2
                pl.BlockSpec((C, 1), lambda n: (0, 0)),             # b2
            ],
            out_specs=pl.BlockSpec((1, C, H * W), lambda n: (n, 0, 0)),
            scratch_shapes=[
                pltpu.VMEM((C, (H + 3) * P), jnp.float32),    # padded input
                pltpu.VMEM((C, (H + 3) * P), jnp.float32),    # padded ReLU(conv1)
                pltpu.VMEM((9 * C, H * P), jnp.bfloat16),     # im2col patches
            ],
        ),
        compiler_params=pltpu.CompilerParams(
            dimension_semantics=("parallel",)),
    )(x_flat, w1_mat, b1_col, w2_mat, b2_col)

    return out_flat.reshape(N, C, H, W)


def _reference(x_nchw, w1, b1, w2, b2, res_scale):
    """Pure-JAX reference (lax.conv, f32 throughout) for correctness checking."""
    dn = lax.conv_dimension_numbers(x_nchw.shape, w1.shape,
                                    ("NCHW", "OIHW", "NCHW"))
    h = lax.conv_general_dilated(x_nchw, w1, (1, 1), ((1, 1), (1, 1)),
                                 dimension_numbers=dn)
    h = h + b1.reshape(1, -1, 1, 1)
    h = jnp.maximum(h, 0.0)
    o = lax.conv_general_dilated(h, w2, (1, 1), ((1, 1), (1, 1)),
                                 dimension_numbers=dn)
    o = o + b2.reshape(1, -1, 1, 1)
    return x_nchw + o * res_scale


if __name__ == "__main__":
    N, C, H, W = 2, 32, 16, 16          # mid_channels = 32
    res_scale = 1.0

    key = jax.random.PRNGKey(0)
    kx, kw1, kw2 = jax.random.split(key, 3)

    x = jax.random.normal(kx, (N, C, H, W), dtype=jnp.float32)

    # Deterministic "init_weights": kaiming_normal fan_in (gain sqrt(2)),
    # then scaled by 0.1; biases zero (matches default_init_weights(m, 0.1)).
    fan_in = C * 3 * 3
    std = (2.0 / fan_in) ** 0.5
    w1 = jax.random.normal(kw1, (C, C, 3, 3), dtype=jnp.float32) * std * 0.1
    w2 = jax.random.normal(kw2, (C, C, 3, 3), dtype=jnp.float32) * std * 0.1
    b1 = jnp.zeros((C,), dtype=jnp.float32)
    b2 = jnp.zeros((C,), dtype=jnp.float32)

    out = residual_block_no_bn(x, w1, b1, w2, b2, res_scale=res_scale)
    out = jax.block_until_ready(out)

    ref = jax.block_until_ready(_reference(x, w1, b1, w2, b2, res_scale))
    assert out.shape == (N, C, H, W)
    # bf16 MXU operands with f32 accumulation: expect ~1e-3 max abs error.
    err = float(jnp.max(jnp.abs(out - ref)))
    assert err < 2e-2, f"mismatch vs reference conv: max abs err {err}"

    print("KERNEL_OK")
</pallas_src>

<mosaic_0001>
module attributes {stable_mosaic.version = 11 : i64} {
  func.func @_resblock_kernel(%arg0: i32, %arg1: memref<1x32x256xf32, #tpu.memory_space<vmem>>, %arg2: memref<32x288xbf16, #tpu.memory_space<vmem>>, %arg3: memref<32x1xf32, #tpu.memory_space<vmem>>, %arg4: memref<32x288xbf16, #tpu.memory_space<vmem>>, %arg5: memref<32x1xf32, #tpu.memory_space<vmem>>, %arg6: memref<1x32x256xf32, #tpu.memory_space<vmem>>, %arg7: memref<32x342xf32, #tpu.memory_space<vmem>>, %arg8: memref<32x342xf32, #tpu.memory_space<vmem>>, %arg9: memref<288x288xbf16, #tpu.memory_space<vmem>>) attributes {dimension_semantics = [#tpu.dimension_semantics<parallel>], iteration_bounds = array<i64: 2>, scalar_prefetch = 0 : i64, scratch_operands = 3 : i64, tpu.core_type = #tpu.core_type<tc>, window_params = [{transform_indices = @transform_0, window_bounds = array<i64: 1, 32, 256>}, {pipeline_mode = #tpu.pipeline_mode<synchronous>, transform_indices = @transform_1, window_bounds = array<i64: 32, 288>}, {pipeline_mode = #tpu.pipeline_mode<synchronous>, transform_indices = @transform_2, window_bounds = array<i64: 32, 1>}, {pipeline_mode = #tpu.pipeline_mode<synchronous>, transform_indices = @transform_3, window_bounds = array<i64: 32, 288>}, {pipeline_mode = #tpu.pipeline_mode<synchronous>, transform_indices = @transform_4, window_bounds = array<i64: 32, 1>}, {transform_indices = @transform_5, window_bounds = array<i64: 1, 32, 256>}]} {
    %cst = arith.constant 0.000000e+00 : f32
    %0 = vector.broadcast %cst : f32 to vector<32x342xf32>
    %c0 = arith.constant 0 : index
    %c0_0 = arith.constant 0 : index
    %1 = vector.load %arg7[%c0, %c0_0] : memref<32x342xf32, #tpu.memory_space<vmem>>, vector<32x342xf32>
    tpu.vector_store %arg7[%c0, %c0_0], %0 {strides = array<i32>} : memref<32x342xf32, #tpu.memory_space<vmem>>, vector<32x342xf32>,
    %cst_1 = arith.constant 0.000000e+00 : f32
    %2 = vector.broadcast %cst_1 : f32 to vector<32x342xf32>
    %c0_2 = arith.constant 0 : index
    %c0_3 = arith.constant 0 : index
    %3 = vector.load %arg8[%c0_2, %c0_3] : memref<32x342xf32, #tpu.memory_space<vmem>>, vector<32x342xf32>
    tpu.vector_store %arg8[%c0_2, %c0_3], %2 {strides = array<i32>} : memref<32x342xf32, #tpu.memory_space<vmem>>, vector<32x342xf32>,
    %c0_4 = arith.constant 0 : index
    %c0_5 = arith.constant 0 : index
    %c0_6 = arith.constant 0 : index
    %4 = vector.load %arg1[%c0_4, %c0_5, %c0_6] : memref<1x32x256xf32, #tpu.memory_space<vmem>>, vector<1x32x16xf32>
    %5 = vector.shape_cast %4 : vector<1x32x16xf32> to vector<32x16xf32>
    %c0_7 = arith.constant 0 : index
    %c19 = arith.constant 19 : index
    %6 = vector.load %arg7[%c0_7, %c19] : memref<32x342xf32, #tpu.memory_space<vmem>>, vector<32x16xf32>
    tpu.vector_store %arg7[%c0_7, %c19], %5 {strides = array<i32>} : memref<32x342xf32, #tpu.memory_space<vmem>>, vector<32x16xf32>,
    %c0_8 = arith.constant 0 : index
    %c0_9 = arith.constant 0 : index
    %c16 = arith.constant 16 : index
    %7 = vector.load %arg1[%c0_8, %c0_9, %c16] : memref<1x32x256xf32, #tpu.memory_space<vmem>>, vector<1x32x16xf32>
    %8 = vector.shape_cast %7 : vector<1x32x16xf32> to vector<32x16xf32>
    %c0_10 = arith.constant 0 : index
    %c37 = arith.constant 37 : index
    %9 = vector.load %arg7[%c0_10, %c37] : memref<32x342xf32, #tpu.memory_space<vmem>>, vector<32x16xf32>
    tpu.vector_store %arg7[%c0_10, %c37], %8 {strides = array<i32>} : memref<32x342xf32, #tpu.memory_space<vmem>>, vector<32x16xf32>,
    %c0_11 = arith.constant 0 : index
    %c0_12 = arith.constant 0 : index
    %c32 = arith.constant 32 : index
    %10 = vector.load %arg1[%c0_11, %c0_12, %c32] : memref<1x32x256xf32, #tpu.memory_space<vmem>>, vector<1x32x16xf32>
    %11 = vector.shape_cast %10 : vector<1x32x16xf32> to vector<32x16xf32>
    %c0_13 = arith.constant 0 : index
    %c55 = arith.constant 55 : index
    %12 = vector.load %arg7[%c0_13, %c55] : memref<32x342xf32, #tpu.memory_space<vmem>>, vector<32x16xf32>
    tpu.vector_store %arg7[%c0_13, %c55], %11 {strides = array<i32>} : memref<32x342xf32, #tpu.memory_space<vmem>>, vector<32x16xf32>,
    %c0_14 = arith.constant 0 : index
    %c0_15 = arith.constant 0 : index
    %c48 = arith.constant 48 : index
    %13 = vector.load %arg1[%c0_14, %c0_15, %c48] : memref<1x32x256xf32, #tpu.memory_space<vmem>>, vector<1x32x16xf32>
    %14 = vector.shape_cast %13 : vector<1x32x16xf32> to vector<32x16xf32>
    %c0_16 = arith.constant 0 : index
    %c73 = arith.constant 73 : index
    %15 = vector.load %arg7[%c0_16, %c73] : memref<32x342xf32, #tpu.memory_space<vmem>>, vector<32x16xf32>
    tpu.vector_store %arg7[%c0_16, %c73], %14 {strides = array<i32>} : memref<32x342xf32, #tpu.memory_space<vmem>>, vector<32x16xf32>,
    %c0_17 = arith.constant 0 : index
    %c0_18 = arith.constant 0 : index
    %c64 = arith.constant 64 : index
    %16 = vector.load %arg1[%c0_17, %c0_18, %c64] : memref<1x32x256xf32, #tpu.memory_space<vmem>>, vector<1x32x16xf32>
    %17 = vector.shape_cast %16 : vector<1x32x16xf32> to vector<32x16xf32>
    %c0_19 = arith.constant 0 : index
    %c91 = arith.constant 91 : index
    %18 = vector.load %arg7[%c0_19, %c91] : memref<32x342xf32, #tpu.memory_space<vmem>>, vector<32x16xf32>
    tpu.vector_store %arg7[%c0_19, %c91], %17 {strides = array<i32>} : memref<32x342xf32, #tpu.memory_space<vmem>>, vector<32x16xf32>,
    %c0_20 = arith.constant 0 : index
    %c0_21 = arith.constant 0 : index
    %c80 = arith.constant 80 : index
    %19 = vector.load %arg1[%c0_20, %c0_21, %c80] : memref<1x32x256xf32, #tpu.memory_space<vmem>>, vector<1x32x16xf32>
    %20 = vector.shape_cast %19 : vector<1x32x16xf32> to vector<32x16xf32>
    %c0_22 = arith.constant 0 : index
    %c109 = arith.constant 109 : index
    %21 = vector.load %arg7[%c0_22, %c109] : memref<32x342xf32, #tpu.memory_space<vmem>>, vector<32x16xf32>
    tpu.vector_store %arg7[%c0_22, %c109], %20 {strides = array<i32>} : memref<32x342xf32, #tpu.memory_space<vmem>>, vector<32x16xf32>,
    %c0_23 = arith.constant 0 : index
    %c0_24 = arith.constant 0 : index
    %c96 = arith.constant 96 : index
    %22 = vector.load %arg1[%c0_23, %c0_24, %c96] : memref<1x32x256xf32, #tpu.memory_space<vmem>>, vector<1x32x16xf32>
    %23 = vector.shape_cast %22 : vector<1x32x16xf32> to vector<32x16xf32>
    %c0_25 = arith.constant 0 : index
    %c127 = arith.constant 127 : index
    %24 = vector.load %arg7[%c0_25, %c127] : memref<32x342xf32, #tpu.memory_space<vmem>>, vector<32x16xf32>
    tpu.vector_store %arg7[%c0_25, %c127], %23 {strides = array<i32>} : memref<32x342xf32, #tpu.memory_space<vmem>>, vector<32x16xf32>,
    %c0_26 = arith.constant 0 : index
    %c0_27 = arith.constant 0 : index
    %c112 = arith.constant 112 : index
    %25 = vector.load %arg1[%c0_26, %c0_27, %c112] : memref<1x32x256xf32, #tpu.memory_space<vmem>>, vector<1x32x16xf32>
    %26 = vector.shape_cast %25 : vector<1x32x16xf32> to vector<32x16xf32>
    %c0_28 = arith.constant 0 : index
    %c145 = arith.constant 145 : index
    %27 = vector.load %arg7[%c0_28, %c145] : memref<32x342xf32, #tpu.memory_space<vmem>>, vector<32x16xf32>
    tpu.vector_store %arg7[%c0_28, %c145], %26 {strides = array<i32>} : memref<32x342xf32, #tpu.memory_space<vmem>>, vector<32x16xf32>,
    %c0_29 = arith.constant 0 : index
    %c0_30 = arith.constant 0 : index
    %c128 = arith.constant 128 : index
    %28 = vector.load %arg1[%c0_29, %c0_30, %c128] : memref<1x32x256xf32, #tpu.memory_space<vmem>>, vector<1x32x16xf32>
    %29 = vector.shape_cast %28 : vector<1x32x16xf32> to vector<32x16xf32>
    %c0_31 = arith.constant 0 : index
    %c163 = arith.constant 163 : index
    %30 = vector.load %arg7[%c0_31, %c163] : memref<32x342xf32, #tpu.memory_space<vmem>>, vector<32x16xf32>
    tpu.vector_store %arg7[%c0_31, %c163], %29 {strides = array<i32>} : memref<32x342xf32, #tpu.memory_space<vmem>>, vector<32x16xf32>,
    %c0_32 = arith.constant 0 : index
    %c0_33 = arith.constant 0 : index
    %c144 = arith.constant 144 : index
    %31 = vector.load %arg1[%c0_32, %c0_33, %c144] : memref<1x32x256xf32, #tpu.memory_space<vmem>>, vector<1x32x16xf32>
    %32 = vector.shape_cast %31 : vector<1x32x16xf32> to vector<32x16xf32>
    %c0_34 = arith.constant 0 : index
    %c181 = arith.constant 181 : index
    %33 = vector.load %arg7[%c0_34, %c181] : memref<32x342xf32, #tpu.memory_space<vmem>>, vector<32x16xf32>
    tpu.vector_store %arg7[%c0_34, %c181], %32 {strides = array<i32>} : memref<32x342xf32, #tpu.memory_space<vmem>>, vector<32x16xf32>,
    %c0_35 = arith.constant 0 : index
    %c0_36 = arith.constant 0 : index
    %c160 = arith.constant 160 : index
    %34 = vector.load %arg1[%c0_35, %c0_36, %c160] : memref<1x32x256xf32, #tpu.memory_space<vmem>>, vector<1x32x16xf32>
    %35 = vector.shape_cast %34 : vector<1x32x16xf32> to vector<32x16xf32>
    %c0_37 = arith.constant 0 : index
    %c199 = arith.constant 199 : index
    %36 = vector.load %arg7[%c0_37, %c199] : memref<32x342xf32, #tpu.memory_space<vmem>>, vector<32x16xf32>
    tpu.vector_store %arg7[%c0_37, %c199], %35 {strides = array<i32>} : memref<32x342xf32, #tpu.memory_space<vmem>>, vector<32x16xf32>,
    %c0_38 = arith.constant 0 : index
    %c0_39 = arith.constant 0 : index
    %c176 = arith.constant 176 : index
    %37 = vector.load %arg1[%c0_38, %c0_39, %c176] : memref<1x32x256xf32, #tpu.memory_space<vmem>>, vector<1x32x16xf32>
    %38 = vector.shape_cast %37 : vector<1x32x16xf32> to vector<32x16xf32>
    %c0_40 = arith.constant 0 : index
    %c217 = arith.constant 217 : index
    %39 = vector.load %arg7[%c0_40, %c217] : memref<32x342xf32, #tpu.memory_space<vmem>>, vector<32x16xf32>
    tpu.vector_store %arg7[%c0_40, %c217], %38 {strides = array<i32>} : memref<32x342xf32, #tpu.memory_space<vmem>>, vector<32x16xf32>,
    %c0_41 = arith.constant 0 : index
    %c0_42 = arith.constant 0 : index
    %c192 = arith.constant 192 : index
    %40 = vector.load %arg1[%c0_41, %c0_42, %c192] : memref<1x32x256xf32, #tpu.memory_space<vmem>>, vector<1x32x16xf32>
    %41 = vector.shape_cast %40 : vector<1x32x16xf32> to vector<32x16xf32>
    %c0_43 = arith.constant 0 : index
    %c235 = arith.constant 235 : index
    %42 = vector.load %arg7[%c0_43, %c235] : memref<32x342xf32, #tpu.memory_space<vmem>>, vector<32x16xf32>
    tpu.vector_store %arg7[%c0_43, %c235], %41 {strides = array<i32>} : memref<32x342xf32, #tpu.memory_space<vmem>>, vector<32x16xf32>,
    %c0_44 = arith.constant 0 : index
    %c0_45 = arith.constant 0 : index
    %c208 = arith.constant 208 : index
    %43 = vector.load %arg1[%c0_44, %c0_45, %c208] : memref<1x32x256xf32, #tpu.memory_space<vmem>>, vector<1x32x16xf32>
    %44 = vector.shape_cast %43 : vector<1x32x16xf32> to vector<32x16xf32>
    %c0_46 = arith.constant 0 : index
    %c253 = arith.constant 253 : index
    %45 = vector.load %arg7[%c0_46, %c253] : memref<32x342xf32, #tpu.memory_space<vmem>>, vector<32x16xf32>
    tpu.vector_store %arg7[%c0_46, %c253], %44 {strides = array<i32>} : memref<32x342xf32, #tpu.memory_space<vmem>>, vector<32x16xf32>,
    %c0_47 = arith.constant 0 : index
    %c0_48 = arith.constant 0 : index
    %c224 = arith.constant 224 : index
    %46 = vector.load %arg1[%c0_47, %c0_48, %c224] : memref<1x32x256xf32, #tpu.memory_space<vmem>>, vector<1x32x16xf32>
    %47 = vector.shape_cast %46 : vector<1x32x16xf32> to vector<32x16xf32>
    %c0_49 = arith.constant 0 : index
    %c271 = arith.constant 271 : index
    %48 = vector.load %arg7[%c0_49, %c271] : memref<32x342xf32, #tpu.memory_space<vmem>>, vector<32x16xf32>
    tpu.vector_store %arg7[%c0_49, %c271], %47 {strides = array<i32>} : memref<32x342xf32, #tpu.memory_space<vmem>>, vector<32x16xf32>,
    %c0_50 = arith.constant 0 : index
    %c0_51 = arith.constant 0 : index
    %c240 = arith.constant 240 : index
    %49 = vector.load %arg1[%c0_50, %c0_51, %c240] : memref<1x32x256xf32, #tpu.memory_space<vmem>>, vector<1x32x16xf32>
    %50 = vector.shape_cast %49 : vector<1x32x16xf32> to vector<32x16xf32>
    %c0_52 = arith.constant 0 : index
    %c289 = arith.constant 289 : index
    %51 = vector.load %arg7[%c0_52, %c289] : memref<32x342xf32, #tpu.memory_space<vmem>>, vector<32x16xf32>
    tpu.vector_store %arg7[%c0_52, %c289], %50 {strides = array<i32>} : memref<32x342xf32, #tpu.memory_space<vmem>>, vector<32x16xf32>,
    %c0_53 = arith.constant 0 : index
    %c0_54 = arith.constant 0 : index
    %52 = vector.load %arg2[%c0_53, %c0_54] : memref<32x288xbf16, #tpu.memory_space<vmem>>, vector<32x288xbf16>
    %c0_55 = arith.constant 0 : index
    %c0_56 = arith.constant 0 : index
    %53 = vector.load %arg7[%c0_55, %c0_56] : memref<32x342xf32, #tpu.memory_space<vmem>>, vector<32x288xf32>
    %54 = arith.truncf %53 : vector<32x288xf32> to vector<32x288xbf16>
    %c0_57 = arith.constant 0 : index
    %c0_58 = arith.constant 0 : index
    %55 = vector.load %arg9[%c0_57, %c0_58] : memref<288x288xbf16, #tpu.memory_space<vmem>>, vector<32x288xbf16>
    tpu.vector_store %arg9[%c0_57, %c0_58], %54 {strides = array<i32>} : memref<288x288xbf16, #tpu.memory_space<vmem>>, vector<32x288xbf16>,
    %c0_59 = arith.constant 0 : index
    %c1 = arith.constant 1 : index
    %56 = vector.load %arg7[%c0_59, %c1] : memref<32x342xf32, #tpu.memory_space<vmem>>, vector<32x288xf32>
    %57 = arith.truncf %56 : vector<32x288xf32> to vector<32x288xbf16>
    %c32_60 = arith.constant 32 : index
    %c0_61 = arith.constant 0 : index
    %58 = vector.load %arg9[%c32_60, %c0_61] : memref<288x288xbf16, #tpu.memory_space<vmem>>, vector<32x288xbf16>
    tpu.vector_store %arg9[%c32_60, %c0_61], %57 {strides = array<i32>} : memref<288x288xbf16, #tpu.memory_space<vmem>>, vector<32x288xbf16>,
    %c0_62 = arith.constant 0 : index
    %c2 = arith.constant 2 : index
    %59 = vector.load %arg7[%c0_62, %c2] : memref<32x342xf32, #tpu.memory_space<vmem>>, vector<32x288xf32>
    %60 = arith.truncf %59 : vector<32x288xf32> to vector<32x288xbf16>
    %c64_63 = arith.constant 64 : index
    %c0_64 = arith.constant 0 : index
    %61 = vector.load %arg9[%c64_63, %c0_64] : memref<288x288xbf16, #tpu.memory_space<vmem>>, vector<32x288xbf16>
    tpu.vector_store %arg9[%c64_63, %c0_64], %60 {strides = array<i32>} : memref<288x288xbf16, #tpu.memory_space<vmem>>, vector<32x288xbf16>,
    %c0_65 = arith.constant 0 : index
    %c18 = arith.constant 18 : index
    %62 = vector.load %arg7[%c0_65, %c18] : memref<32x342xf32, #tpu.memory_space<vmem>>, vector<32x288xf32>
    %63 = arith.truncf %62 : vector<32x288xf32> to vector<32x288xbf16>
    %c96_66 = arith.constant 96 : index
    %c0_67 = arith.constant 0 : index
    %64 = vector.load %arg9[%c96_66, %c0_67] : memref<288x288xbf16, #tpu.memory_space<vmem>>, vector<32x288xbf16>
    tpu.vector_store %arg9[%c96_66, %c0_67], %63 {strides = array<i32>} : memref<288x288xbf16, #tpu.memory_space<vmem>>, vector<32x288xbf16>,
    %c0_68 = arith.constant 0 : index
    %c19_69 = arith.constant 19 : index
    %65 = vector.load %arg7[%c0_68, %c19_69] : memref<32x342xf32, #tpu.memory_space<vmem>>, vector<32x288xf32>
    %66 = arith.truncf %65 : vector<32x288xf32> to vector<32x288xbf16>
    %c128_70 = arith.constant 128 : index
    %c0_71 = arith.constant 0 : index
    %67 = vector.load %arg9[%c128_70, %c0_71] : memref<288x288xbf16, #tpu.memory_space<vmem>>, vector<32x288xbf16>
    tpu.vector_store %arg9[%c128_70, %c0_71], %66 {strides = array<i32>} : memref<288x288xbf16, #tpu.memory_space<vmem>>, vector<32x288xbf16>,
    %c0_72 = arith.constant 0 : index
    %c20 = arith.constant 20 : index
    %68 = vector.load %arg7[%c0_72, %c20] : memref<32x342xf32, #tpu.memory_space<vmem>>, vector<32x288xf32>
    %69 = arith.truncf %68 : vector<32x288xf32> to vector<32x288xbf16>
    %c160_73 = arith.constant 160 : index
    %c0_74 = arith.constant 0 : index
    %70 = vector.load %arg9[%c160_73, %c0_74] : memref<288x288xbf16, #tpu.memory_space<vmem>>, vector<32x288xbf16>
    tpu.vector_store %arg9[%c160_73, %c0_74], %69 {strides = array<i32>} : memref<288x288xbf16, #tpu.memory_space<vmem>>, vector<32x288xbf16>,
    %c0_75 = arith.constant 0 : index
    %c36 = arith.constant 36 : index
    %71 = vector.load %arg7[%c0_75, %c36] : memref<32x342xf32, #tpu.memory_space<vmem>>, vector<32x288xf32>
    %72 = arith.truncf %71 : vector<32x288xf32> to vector<32x288xbf16>
    %c192_76 = arith.constant 192 : index
    %c0_77 = arith.constant 0 : index
    %73 = vector.load %arg9[%c192_76, %c0_77] : memref<288x288xbf16, #tpu.memory_space<vmem>>, vector<32x288xbf16>
    tpu.vector_store %arg9[%c192_76, %c0_77], %72 {strides = array<i32>} : memref<288x288xbf16, #tpu.memory_space<vmem>>, vector<32x288xbf16>,
    %c0_78 = arith.constant 0 : index
    %c37_79 = arith.constant 37 : index
    %74 = vector.load %arg7[%c0_78, %c37_79] : memref<32x342xf32, #tpu.memory_space<vmem>>, vector<32x288xf32>
    %75 = arith.truncf %74 : vector<32x288xf32> to vector<32x288xbf16>
    %c224_80 = arith.constant 224 : index
    %c0_81 = arith.constant 0 : index
    %76 = vector.load %arg9[%c224_80, %c0_81] : memref<288x288xbf16, #tpu.memory_space<vmem>>, vector<32x288xbf16>
    tpu.vector_store %arg9[%c224_80, %c0_81], %75 {strides = array<i32>} : memref<288x288xbf16, #tpu.memory_space<vmem>>, vector<32x288xbf16>,
    %c0_82 = arith.constant 0 : index
    %c38 = arith.constant 38 : index
    %77 = vector.load %arg7[%c0_82, %c38] : memref<32x342xf32, #tpu.memory_space<vmem>>, vector<32x288xf32>
    %78 = arith.truncf %77 : vector<32x288xf32> to vector<32x288xbf16>
    %c256 = arith.constant 256 : index
    %c0_83 = arith.constant 0 : index
    %79 = vector.load %arg9[%c256, %c0_83] : memref<288x288xbf16, #tpu.memory_space<vmem>>, vector<32x288xbf16>
    tpu.vector_store %arg9[%c256, %c0_83], %78 {strides = array<i32>} : memref<288x288xbf16, #tpu.memory_space<vmem>>, vector<32x288xbf16>,
    %c0_84 = arith.constant 0 : index
    %c0_85 = arith.constant 0 : index
    %80 = vector.load %arg9[%c0_84, %c0_85] : memref<288x288xbf16, #tpu.memory_space<vmem>>, vector<288x288xbf16>
    %cst_86 = arith.constant dense<0.000000e+00> : vector<32x288xf32>
    %81 = tpu.matmul %52, %80, %cst_86 {dimension_numbers = #tpu.dot_dimension_numbers<[1], [0], [0], [1], [0, 0, 1, 1], [], []>} : vector<32x288xbf16>, vector<288x288xbf16>, vector<32x288xf32> -> vector<32x288xf32>
    %c0_87 = arith.constant 0 : index
    %c0_88 = arith.constant 0 : index
    %82 = vector.load %arg3[%c0_87, %c0_88] : memref<32x1xf32, #tpu.memory_space<vmem>>, vector<32x1xf32>
    %83 = vector.broadcast %82 : vector<32x1xf32> to vector<32x288xf32>
    %84 = arith.addf %81, %83 : vector<32x288xf32>
    %cst_89 = arith.constant 0.000000e+00 : f32
    %85 = vector.broadcast %cst_89 : f32 to vector<32x288xf32>
    %86 = arith.maximumf %84, %85 : vector<32x288xf32>
    %87 = tpu.iota {dimensions = array<i32: 1>} : vector<32x288xi32>
    %c18_i32 = arith.constant 18 : i32
    %c0_i32 = arith.constant 0 : i32
    %88 = arith.cmpi eq, %c18_i32, %c0_i32 : i32
    %c1_i32 = arith.constant 1 : i32
    %89 = arith.select %88, %c1_i32, %c18_i32 : i32
    %90 = vector.broadcast %89 : i32 to vector<32x288xi32>
    %91 = arith.remsi %87, %90 : vector<32x288xi32>
    %c0_i32_90 = arith.constant 0 : i32
    %92 = vector.broadcast %c0_i32_90 : i32 to vector<32x288xi32>
    %93 = arith.cmpi ne, %91, %92 : vector<32x288xi32>
    %c0_i32_91 = arith.constant 0 : i32
    %94 = vector.broadcast %c0_i32_91 : i32 to vector<32x288xi32>
    %95 = arith.cmpi slt, %91, %94 : vector<32x288xi32>
    %c0_i32_92 = arith.constant 0 : i32
    %96 = arith.cmpi slt, %89, %c0_i32_92 : i32
    %97 = vector.broadcast %96 : i1 to vector<32x288xi1>
    %98 = vector.broadcast %97 : vector<32x288xi1> to vector<32x288xi1>
    %99 = arith.xori %95, %98 : vector<32x288xi1>
    %100 = arith.andi %99, %93 : vector<32x288xi1>
    %101 = vector.broadcast %89 : i32 to vector<32x288xi32>
    %102 = arith.addi %91, %101 : vector<32x288xi32>
    %103 = arith.select %100, %102, %91 : vector<32x288xi1>, vector<32x288xi32>
    %c16_i32 = arith.constant 16 : i32
    %104 = vector.broadcast %c16_i32 : i32 to vector<32x288xi32>
    %105 = arith.cmpi slt, %103, %104 : vector<32x288xi32>
    %cst_93 = arith.constant 0.000000e+00 : f32
    %106 = vector.broadcast %cst_93 : f32 to vector<32x288xf32>
    %107 = arith.select %105, %86, %106 : vector<32x288xi1>, vector<32x288xf32>
    %c0_94 = arith.constant 0 : index
    %c19_95 = arith.constant 19 : index
    %108 = vector.load %arg8[%c0_94, %c19_95] : memref<32x342xf32, #tpu.memory_space<vmem>>, vector<32x288xf32>
    tpu.vector_store %arg8[%c0_94, %c19_95], %107 {strides = array<i32>} : memref<32x342xf32, #tpu.memory_space<vmem>>, vector<32x288xf32>,
    %c0_96 = arith.constant 0 : index
    %c0_97 = arith.constant 0 : index
    %109 = vector.load %arg4[%c0_96, %c0_97] : memref<32x288xbf16, #tpu.memory_space<vmem>>, vector<32x288xbf16>
    %c0_98 = arith.constant 0 : index
    %c0_99 = arith.constant 0 : index
    %110 = vector.load %arg8[%c0_98, %c0_99] : memref<32x342xf32, #tpu.memory_space<vmem>>, vector<32x288xf32>
    %111 = arith.truncf %110 : vector<32x288xf32> to vector<32x288xbf16>
    %c0_100 = arith.constant 0 : index
    %c0_101 = arith.constant 0 : index
    %112 = vector.load %arg9[%c0_100, %c0_101] : memref<288x288xbf16, #tpu.memory_space<vmem>>, vector<32x288xbf16>
    tpu.vector_store %arg9[%c0_100, %c0_101], %111 {strides = array<i32>} : memref<288x288xbf16, #tpu.memory_space<vmem>>, vector<32x288xbf16>,
    %c0_102 = arith.constant 0 : index
    %c1_103 = arith.constant 1 : index
    %113 = vector.load %arg8[%c0_102, %c1_103] : memref<32x342xf32, #tpu.memory_space<vmem>>, vector<32x288xf32>
    %114 = arith.truncf %113 : vector<32x288xf32> to vector<32x288xbf16>
    %c32_104 = arith.constant 32 : index
    %c0_105 = arith.constant 0 : index
    %115 = vector.load %arg9[%c32_104, %c0_105] : memref<288x288xbf16, #tpu.memory_space<vmem>>, vector<32x288xbf16>
    tpu.vector_store %arg9[%c32_104, %c0_105], %114 {strides = array<i32>} : memref<288x288xbf16, #tpu.memory_space<vmem>>, vector<32x288xbf16>,
    %c0_106 = arith.constant 0 : index
    %c2_107 = arith.constant 2 : index
    %116 = vector.load %arg8[%c0_106, %c2_107] : memref<32x342xf32, #tpu.memory_space<vmem>>, vector<32x288xf32>
    %117 = arith.truncf %116 : vector<32x288xf32> to vector<32x288xbf16>
    %c64_108 = arith.constant 64 : index
    %c0_109 = arith.constant 0 : index
    %118 = vector.load %arg9[%c64_108, %c0_109] : memref<288x288xbf16, #tpu.memory_space<vmem>>, vector<32x288xbf16>
    tpu.vector_store %arg9[%c64_108, %c0_109], %117 {strides = array<i32>} : memref<288x288xbf16, #tpu.memory_space<vmem>>, vector<32x288xbf16>,
    %c0_110 = arith.constant 0 : index
    %c18_111 = arith.constant 18 : index
    %119 = vector.load %arg8[%c0_110, %c18_111] : memref<32x342xf32, #tpu.memory_space<vmem>>, vector<32x288xf32>
    %120 = arith.truncf %119 : vector<32x288xf32> to vector<32x288xbf16>
    %c96_112 = arith.constant 96 : index
    %c0_113 = arith.constant 0 : index
    %121 = vector.load %arg9[%c96_112, %c0_113] : memref<288x288xbf16, #tpu.memory_space<vmem>>, vector<32x288xbf16>
    tpu.vector_store %arg9[%c96_112, %c0_113], %120 {strides = array<i32>} : memref<288x288xbf16, #tpu.memory_space<vmem>>, vector<32x288xbf16>,
    %c0_114 = arith.constant 0 : index
    %c19_115 = arith.constant 19 : index
    %122 = vector.load %arg8[%c0_114, %c19_115] : memref<32x342xf32, #tpu.memory_space<vmem>>, vector<32x288xf32>
    %123 = arith.truncf %122 : vector<32x288xf32> to vector<32x288xbf16>
    %c128_116 = arith.constant 128 : index
    %c0_117 = arith.constant 0 : index
    %124 = vector.load %arg9[%c128_116, %c0_117] : memref<288x288xbf16, #tpu.memory_space<vmem>>, vector<32x288xbf16>
    tpu.vector_store %arg9[%c128_116, %c0_117], %123 {strides = array<i32>} : memref<288x288xbf16, #tpu.memory_space<vmem>>, vector<32x288xbf16>,
    %c0_118 = arith.constant 0 : index
    %c20_119 = arith.constant 20 : index
    %125 = vector.load %arg8[%c0_118, %c20_119] : memref<32x342xf32, #tpu.memory_space<vmem>>, vector<32x288xf32>
    %126 = arith.truncf %125 : vector<32x288xf32> to vector<32x288xbf16>
    %c160_120 = arith.constant 160 : index
    %c0_121 = arith.constant 0 : index
    %127 = vector.load %arg9[%c160_120, %c0_121] : memref<288x288xbf16, #tpu.memory_space<vmem>>, vector<32x288xbf16>
    tpu.vector_store %arg9[%c160_120, %c0_121], %126 {strides = array<i32>} : memref<288x288xbf16, #tpu.memory_space<vmem>>, vector<32x288xbf16>,
    %c0_122 = arith.constant 0 : index
    %c36_123 = arith.constant 36 : index
    %128 = vector.load %arg8[%c0_122, %c36_123] : memref<32x342xf32, #tpu.memory_space<vmem>>, vector<32x288xf32>
    %129 = arith.truncf %128 : vector<32x288xf32> to vector<32x288xbf16>
    %c192_124 = arith.constant 192 : index
    %c0_125 = arith.constant 0 : index
    %130 = vector.load %arg9[%c192_124, %c0_125] : memref<288x288xbf16, #tpu.memory_space<vmem>>, vector<32x288xbf16>
    tpu.vector_store %arg9[%c192_124, %c0_125], %129 {strides = array<i32>} : memref<288x288xbf16, #tpu.memory_space<vmem>>, vector<32x288xbf16>,
    %c0_126 = arith.constant 0 : index
    %c37_127 = arith.constant 37 : index
    %131 = vector.load %arg8[%c0_126, %c37_127] : memref<32x342xf32, #tpu.memory_space<vmem>>, vector<32x288xf32>
    %132 = arith.truncf %131 : vector<32x288xf32> to vector<32x288xbf16>
    %c224_128 = arith.constant 224 : index
    %c0_129 = arith.constant 0 : index
    %133 = vector.load %arg9[%c224_128, %c0_129] : memref<288x288xbf16, #tpu.memory_space<vmem>>, vector<32x288xbf16>
    tpu.vector_store %arg9[%c224_128, %c0_129], %132 {strides = array<i32>} : memref<288x288xbf16, #tpu.memory_space<vmem>>, vector<32x288xbf16>,
    %c0_130 = arith.constant 0 : index
    %c38_131 = arith.constant 38 : index
    %134 = vector.load %arg8[%c0_130, %c38_131] : memref<32x342xf32, #tpu.memory_space<vmem>>, vector<32x288xf32>
    %135 = arith.truncf %134 : vector<32x288xf32> to vector<32x288xbf16>
    %c256_132 = arith.constant 256 : index
    %c0_133 = arith.constant 0 : index
    %136 = vector.load %arg9[%c256_132, %c0_133] : memref<288x288xbf16, #tpu.memory_space<vmem>>, vector<32x288xbf16>
    tpu.vector_store %arg9[%c256_132, %c0_133], %135 {strides = array<i32>} : memref<288x288xbf16, #tpu.memory_space<vmem>>, vector<32x288xbf16>,
    %c0_134 = arith.constant 0 : index
    %c0_135 = arith.constant 0 : index
    %137 = vector.load %arg9[%c0_134, %c0_135] : memref<288x288xbf16, #tpu.memory_space<vmem>>, vector<288x288xbf16>
    %cst_136 = arith.constant dense<0.000000e+00> : vector<32x288xf32>
    %138 = tpu.matmul %109, %137, %cst_136 {dimension_numbers = #tpu.dot_dimension_numbers<[1], [0], [0], [1], [0, 0, 1, 1], [], []>} : vector<32x288xbf16>, vector<288x288xbf16>, vector<32x288xf32> -> vector<32x288xf32>
    %c0_137 = arith.constant 0 : index
    %c0_138 = arith.constant 0 : index
    %139 = vector.load %arg5[%c0_137, %c0_138] : memref<32x1xf32, #tpu.memory_space<vmem>>, vector<32x1xf32>
    %140 = vector.broadcast %139 : vector<32x1xf32> to vector<32x288xf32>
    %141 = arith.addf %138, %140 : vector<32x288xf32>
    %c0_139 = arith.constant 0 : index
    %c0_140 = arith.constant 0 : index
    %c0_141 = arith.constant 0 : index
    %142 = vector.load %arg1[%c0_139, %c0_140, %c0_141] : memref<1x32x256xf32, #tpu.memory_space<vmem>>, vector<1x32x16xf32>
    %143 = vector.shape_cast %142 : vector<1x32x16xf32> to vector<32x16xf32>
    %144 = vector.extract_strided_slice %141 {offsets = [0, 0], sizes = [32, 16], strides = [1, 1]} : vector<32x288xf32> to vector<32x16xf32>
    %cst_142 = arith.constant 1.000000e+00 : f32
    %145 = vector.broadcast %cst_142 : f32 to vector<32x16xf32>
    %146 = arith.mulf %144, %145 : vector<32x16xf32>
    %147 = arith.addf %143, %146 : vector<32x16xf32>
    %c0_143 = arith.constant 0 : index
    %c0_144 = arith.constant 0 : index
    %c0_145 = arith.constant 0 : index
    %148 = vector.load %arg6[%c0_143, %c0_144, %c0_145] : memref<1x32x256xf32, #tpu.memory_space<vmem>>, vector<1x32x16xf32>
    %149 = vector.shape_cast %148 : vector<1x32x16xf32> to vector<32x16xf32>
    %150 = vector.shape_cast %147 : vector<32x16xf32> to vector<1x32x16xf32>
    tpu.vector_store %arg6[%c0_143, %c0_144, %c0_145], %150 {strides = array<i32>} : memref<1x32x256xf32, #tpu.memory_space<vmem>>, vector<1x32x16xf32>,
    %c0_146 = arith.constant 0 : index
    %c0_147 = arith.constant 0 : index
    %c16_148 = arith.constant 16 : index
    %151 = vector.load %arg1[%c0_146, %c0_147, %c16_148] : memref<1x32x256xf32, #tpu.memory_space<vmem>>, vector<1x32x16xf32>
    %152 = vector.shape_cast %151 : vector<1x32x16xf32> to vector<32x16xf32>
    %153 = vector.extract_strided_slice %141 {offsets = [0, 18], sizes = [32, 16], strides = [1, 1]} : vector<32x288xf32> to vector<32x16xf32>
    %cst_149 = arith.constant 1.000000e+00 : f32
    %154 = vector.broadcast %cst_149 : f32 to vector<32x16xf32>
    %155 = arith.mulf %153, %154 : vector<32x16xf32>
    %156 = arith.addf %152, %155 : vector<32x16xf32>
    %c0_150 = arith.constant 0 : index
    %c0_151 = arith.constant 0 : index
    %c16_152 = arith.constant 16 : index
    %157 = vector.load %arg6[%c0_150, %c0_151, %c16_152] : memref<1x32x256xf32, #tpu.memory_space<vmem>>, vector<1x32x16xf32>
    %158 = vector.shape_cast %157 : vector<1x32x16xf32> to vector<32x16xf32>
    %159 = vector.shape_cast %156 : vector<32x16xf32> to vector<1x32x16xf32>
    tpu.vector_store %arg6[%c0_150, %c0_151, %c16_152], %159 {strides = array<i32>} : memref<1x32x256xf32, #tpu.memory_space<vmem>>, vector<1x32x16xf32>,
    %c0_153 = arith.constant 0 : index
    %c0_154 = arith.constant 0 : index
    %c32_155 = arith.constant 32 : index
    %160 = vector.load %arg1[%c0_153, %c0_154, %c32_155] : memref<1x32x256xf32, #tpu.memory_space<vmem>>, vector<1x32x16xf32>
    %161 = vector.shape_cast %160 : vector<1x32x16xf32> to vector<32x16xf32>
    %162 = vector.extract_strided_slice %141 {offsets = [0, 36], sizes = [32, 16], strides = [1, 1]} : vector<32x288xf32> to vector<32x16xf32>
    %cst_156 = arith.constant 1.000000e+00 : f32
    %163 = vector.broadcast %cst_156 : f32 to vector<32x16xf32>
    %164 = arith.mulf %162, %163 : vector<32x16xf32>
    %165 = arith.addf %161, %164 : vector<32x16xf32>
    %c0_157 = arith.constant 0 : index
    %c0_158 = arith.constant 0 : index
    %c32_159 = arith.constant 32 : index
    %166 = vector.load %arg6[%c0_157, %c0_158, %c32_159] : memref<1x32x256xf32, #tpu.memory_space<vmem>>, vector<1x32x16xf32>
    %167 = vector.shape_cast %166 : vector<1x32x16xf32> to vector<32x16xf32>
    %168 = vector.shape_cast %165 : vector<32x16xf32> to vector<1x32x16xf32>
    tpu.vector_store %arg6[%c0_157, %c0_158, %c32_159], %168 {strides = array<i32>} : memref<1x32x256xf32, #tpu.memory_space<vmem>>, vector<1x32x16xf32>,
    %c0_160 = arith.constant 0 : index
    %c0_161 = arith.constant 0 : index
    %c48_162 = arith.constant 48 : index
    %169 = vector.load %arg1[%c0_160, %c0_161, %c48_162] : memref<1x32x256xf32, #tpu.memory_space<vmem>>, vector<1x32x16xf32>
    %170 = vector.shape_cast %169 : vector<1x32x16xf32> to vector<32x16xf32>
    %171 = vector.extract_strided_slice %141 {offsets = [0, 54], sizes = [32, 16], strides = [1, 1]} : vector<32x288xf32> to vector<32x16xf32>
    %cst_163 = arith.constant 1.000000e+00 : f32
    %172 = vector.broadcast %cst_163 : f32 to vector<32x16xf32>
    %173 = arith.mulf %171, %172 : vector<32x16xf32>
    %174 = arith.addf %170, %173 : vector<32x16xf32>
    %c0_164 = arith.constant 0 : index
    %c0_165 = arith.constant 0 : index
    %c48_166 = arith.constant 48 : index
    %175 = vector.load %arg6[%c0_164, %c0_165, %c48_166] : memref<1x32x256xf32, #tpu.memory_space<vmem>>, vector<1x32x16xf32>
    %176 = vector.shape_cast %175 : vector<1x32x16xf32> to vector<32x16xf32>
    %177 = vector.shape_cast %174 : vector<32x16xf32> to vector<1x32x16xf32>
    tpu.vector_store %arg6[%c0_164, %c0_165, %c48_166], %177 {strides = array<i32>} : memref<1x32x256xf32, #tpu.memory_space<vmem>>, vector<1x32x16xf32>,
    %c0_167 = arith.constant 0 : index
    %c0_168 = arith.constant 0 : index
    %c64_169 = arith.constant 64 : index
    %178 = vector.load %arg1[%c0_167, %c0_168, %c64_169] : memref<1x32x256xf32, #tpu.memory_space<vmem>>, vector<1x32x16xf32>
    %179 = vector.shape_cast %178 : vector<1x32x16xf32> to vector<32x16xf32>
    %180 = vector.extract_strided_slice %141 {offsets = [0, 72], sizes = [32, 16], strides = [1, 1]} : vector<32x288xf32> to vector<32x16xf32>
    %cst_170 = arith.constant 1.000000e+00 : f32
    %181 = vector.broadcast %cst_170 : f32 to vector<32x16xf32>
    %182 = arith.mulf %180, %181 : vector<32x16xf32>
    %183 = arith.addf %179, %182 : vector<32x16xf32>
    %c0_171 = arith.constant 0 : index
    %c0_172 = arith.constant 0 : index
    %c64_173 = arith.constant 64 : index
    %184 = vector.load %arg6[%c0_171, %c0_172, %c64_173] : memref<1x32x256xf32, #tpu.memory_space<vmem>>, vector<1x32x16xf32>
    %185 = vector.shape_cast %184 : vector<1x32x16xf32> to vector<32x16xf32>
    %186 = vector.shape_cast %183 : vector<32x16xf32> to vector<1x32x16xf32>
    tpu.vector_store %arg6[%c0_171, %c0_172, %c64_173], %186 {strides = array<i32>} : memref<1x32x256xf32, #tpu.memory_space<vmem>>, vector<1x32x16xf32>,
    %c0_174 = arith.constant 0 : index
    %c0_175 = arith.constant 0 : index
    %c80_176 = arith.constant 80 : index
    %187 = vector.load %arg1[%c0_174, %c0_175, %c80_176] : memref<1x32x256xf32, #tpu.memory_space<vmem>>, vector<1x32x16xf32>
    %188 = vector.shape_cast %187 : vector<1x32x16xf32> to vector<32x16xf32>
    %189 = vector.extract_strided_slice %141 {offsets = [0, 90], sizes = [32, 16], strides = [1, 1]} : vector<32x288xf32> to vector<32x16xf32>
    %cst_177 = arith.constant 1.000000e+00 : f32
    %190 = vector.broadcast %cst_177 : f32 to vector<32x16xf32>
    %191 = arith.mulf %189, %190 : vector<32x16xf32>
    %192 = arith.addf %188, %191 : vector<32x16xf32>
    %c0_178 = arith.constant 0 : index
    %c0_179 = arith.constant 0 : index
    %c80_180 = arith.constant 80 : index
    %193 = vector.load %arg6[%c0_178, %c0_179, %c80_180] : memref<1x32x256xf32, #tpu.memory_space<vmem>>, vector<1x32x16xf32>
    %194 = vector.shape_cast %193 : vector<1x32x16xf32> to vector<32x16xf32>
    %195 = vector.shape_cast %192 : vector<32x16xf32> to vector<1x32x16xf32>
    tpu.vector_store %arg6[%c0_178, %c0_179, %c80_180], %195 {strides = array<i32>} : memref<1x32x256xf32, #tpu.memory_space<vmem>>, vector<1x32x16xf32>,
    %c0_181 = arith.constant 0 : index
    %c0_182 = arith.constant 0 : index
    %c96_183 = arith.constant 96 : index
    %196 = vector.load %arg1[%c0_181, %c0_182, %c96_183] : memref<1x32x256xf32, #tpu.memory_space<vmem>>, vector<1x32x16xf32>
    %197 = vector.shape_cast %196 : vector<1x32x16xf32> to vector<32x16xf32>
    %198 = vector.extract_strided_slice %141 {offsets = [0, 108], sizes = [32, 16], strides = [1, 1]} : vector<32x288xf32> to vector<32x16xf32>
    %cst_184 = arith.constant 1.000000e+00 : f32
    %199 = vector.broadcast %cst_184 : f32 to vector<32x16xf32>
    %200 = arith.mulf %198, %199 : vector<32x16xf32>
    %201 = arith.addf %197, %200 : vector<32x16xf32>
    %c0_185 = arith.constant 0 : index
    %c0_186 = arith.constant 0 : index
    %c96_187 = arith.constant 96 : index
    %202 = vector.load %arg6[%c0_185, %c0_186, %c96_187] : memref<1x32x256xf32, #tpu.memory_space<vmem>>, vector<1x32x16xf32>
    %203 = vector.shape_cast %202 : vector<1x32x16xf32> to vector<32x16xf32>
    %204 = vector.shape_cast %201 : vector<32x16xf32> to vector<1x32x16xf32>
    tpu.vector_store %arg6[%c0_185, %c0_186, %c96_187], %204 {strides = array<i32>} : memref<1x32x256xf32, #tpu.memory_space<vmem>>, vector<1x32x16xf32>,
    %c0_188 = arith.constant 0 : index
    %c0_189 = arith.constant 0 : index
    %c112_190 = arith.constant 112 : index
    %205 = vector.load %arg1[%c0_188, %c0_189, %c112_190] : memref<1x32x256xf32, #tpu.memory_space<vmem>>, vector<1x32x16xf32>
    %206 = vector.shape_cast %205 : vector<1x32x16xf32> to vector<32x16xf32>
    %207 = vector.extract_strided_slice %141 {offsets = [0, 126], sizes = [32, 16], strides = [1, 1]} : vector<32x288xf32> to vector<32x16xf32>
    %cst_191 = arith.constant 1.000000e+00 : f32
    %208 = vector.broadcast %cst_191 : f32 to vector<32x16xf32>
    %209 = arith.mulf %207, %208 : vector<32x16xf32>
    %210 = arith.addf %206, %209 : vector<32x16xf32>
    %c0_192 = arith.constant 0 : index
    %c0_193 = arith.constant 0 : index
    %c112_194 = arith.constant 112 : index
    %211 = vector.load %arg6[%c0_192, %c0_193, %c112_194] : memref<1x32x256xf32, #tpu.memory_space<vmem>>, vector<1x32x16xf32>
    %212 = vector.shape_cast %211 : vector<1x32x16xf32> to vector<32x16xf32>
    %213 = vector.shape_cast %210 : vector<32x16xf32> to vector<1x32x16xf32>
    tpu.vector_store %arg6[%c0_192, %c0_193, %c112_194], %213 {strides = array<i32>} : memref<1x32x256xf32, #tpu.memory_space<vmem>>, vector<1x32x16xf32>,
    %c0_195 = arith.constant 0 : index
    %c0_196 = arith.constant 0 : index
    %c128_197 = arith.constant 128 : index
    %214 = vector.load %arg1[%c0_195, %c0_196, %c128_197] : memref<1x32x256xf32, #tpu.memory_space<vmem>>, vector<1x32x16xf32>
    %215 = vector.shape_cast %214 : vector<1x32x16xf32> to vector<32x16xf32>
    %216 = vector.extract_strided_slice %141 {offsets = [0, 144], sizes = [32, 16], strides = [1, 1]} : vector<32x288xf32> to vector<32x16xf32>
    %cst_198 = arith.constant 1.000000e+00 : f32
    %217 = vector.broadcast %cst_198 : f32 to vector<32x16xf32>
    %218 = arith.mulf %216, %217 : vector<32x16xf32>
    %219 = arith.addf %215, %218 : vector<32x16xf32>
    %c0_199 = arith.constant 0 : index
    %c0_200 = arith.constant 0 : index
    %c128_201 = arith.constant 128 : index
    %220 = vector.load %arg6[%c0_199, %c0_200, %c128_201] : memref<1x32x256xf32, #tpu.memory_space<vmem>>, vector<1x32x16xf32>
    %221 = vector.shape_cast %220 : vector<1x32x16xf32> to vector<32x16xf32>
    %222 = vector.shape_cast %219 : vector<32x16xf32> to vector<1x32x16xf32>
    tpu.vector_store %arg6[%c0_199, %c0_200, %c128_201], %222 {strides = array<i32>} : memref<1x32x256xf32, #tpu.memory_space<vmem>>, vector<1x32x16xf32>,
    %c0_202 = arith.constant 0 : index
    %c0_203 = arith.constant 0 : index
    %c144_204 = arith.constant 144 : index
    %223 = vector.load %arg1[%c0_202, %c0_203, %c144_204] : memref<1x32x256xf32, #tpu.memory_space<vmem>>, vector<1x32x16xf32>
    %224 = vector.shape_cast %223 : vector<1x32x16xf32> to vector<32x16xf32>
    %225 = vector.extract_strided_slice %141 {offsets = [0, 162], sizes = [32, 16], strides = [1, 1]} : vector<32x288xf32> to vector<32x16xf32>
    %cst_205 = arith.constant 1.000000e+00 : f32
    %226 = vector.broadcast %cst_205 : f32 to vector<32x16xf32>
    %227 = arith.mulf %225, %226 : vector<32x16xf32>
    %228 = arith.addf %224, %227 : vector<32x16xf32>
    %c0_206 = arith.constant 0 : index
    %c0_207 = arith.constant 0 : index
    %c144_208 = arith.constant 144 : index
    %229 = vector.load %arg6[%c0_206, %c0_207, %c144_208] : memref<1x32x256xf32, #tpu.memory_space<vmem>>, vector<1x32x16xf32>
    %230 = vector.shape_cast %229 : vector<1x32x16xf32> to vector<32x16xf32>
    %231 = vector.shape_cast %228 : vector<32x16xf32> to vector<1x32x16xf32>
    tpu.vector_store %arg6[%c0_206, %c0_207, %c144_208], %231 {strides = array<i32>} : memref<1x32x256xf32, #tpu.memory_space<vmem>>, vector<1x32x16xf32>,
    %c0_209 = arith.constant 0 : index
    %c0_210 = arith.constant 0 : index
    %c160_211 = arith.constant 160 : index
    %232 = vector.load %arg1[%c0_209, %c0_210, %c160_211] : memref<1x32x256xf32, #tpu.memory_space<vmem>>, vector<1x32x16xf32>
    %233 = vector.shape_cast %232 : vector<1x32x16xf32> to vector<32x16xf32>
    %234 = vector.extract_strided_slice %141 {offsets = [0, 180], sizes = [32, 16], strides = [1, 1]} : vector<32x288xf32> to vector<32x16xf32>
    %cst_212 = arith.constant 1.000000e+00 : f32
    %235 = vector.broadcast %cst_212 : f32 to vector<32x16xf32>
    %236 = arith.mulf %234, %235 : vector<32x16xf32>
    %237 = arith.addf %233, %236 : vector<32x16xf32>
    %c0_213 = arith.constant 0 : index
    %c0_214 = arith.constant 0 : index
    %c160_215 = arith.constant 160 : index
    %238 = vector.load %arg6[%c0_213, %c0_214, %c160_215] : memref<1x32x256xf32, #tpu.memory_space<vmem>>, vector<1x32x16xf32>
    %239 = vector.shape_cast %238 : vector<1x32x16xf32> to vector<32x16xf32>
    %240 = vector.shape_cast %237 : vector<32x16xf32> to vector<1x32x16xf32>
    tpu.vector_store %arg6[%c0_213, %c0_214, %c160_215], %240 {strides = array<i32>} : memref<1x32x256xf32, #tpu.memory_space<vmem>>, vector<1x32x16xf32>,
    %c0_216 = arith.constant 0 : index
    %c0_217 = arith.constant 0 : index
    %c176_218 = arith.constant 176 : index
    %241 = vector.load %arg1[%c0_216, %c0_217, %c176_218] : memref<1x32x256xf32, #tpu.memory_space<vmem>>, vector<1x32x16xf32>
    %242 = vector.shape_cast %241 : vector<1x32x16xf32> to vector<32x16xf32>
    %243 = vector.extract_strided_slice %141 {offsets = [0, 198], sizes = [32, 16], strides = [1, 1]} : vector<32x288xf32> to vector<32x16xf32>
    %cst_219 = arith.constant 1.000000e+00 : f32
    %244 = vector.broadcast %cst_219 : f32 to vector<32x16xf32>
    %245 = arith.mulf %243, %244 : vector<32x16xf32>
    %246 = arith.addf %242, %245 : vector<32x16xf32>
    %c0_220 = arith.constant 0 : index
    %c0_221 = arith.constant 0 : index
    %c176_222 = arith.constant 176 : index
    %247 = vector.load %arg6[%c0_220, %c0_221, %c176_222] : memref<1x32x256xf32, #tpu.memory_space<vmem>>, vector<1x32x16xf32>
    %248 = vector.shape_cast %247 : vector<1x32x16xf32> to vector<32x16xf32>
    %249 = vector.shape_cast %246 : vector<32x16xf32> to vector<1x32x16xf32>
    tpu.vector_store %arg6[%c0_220, %c0_221, %c176_222], %249 {strides = array<i32>} : memref<1x32x256xf32, #tpu.memory_space<vmem>>, vector<1x32x16xf32>,
    %c0_223 = arith.constant 0 : index
    %c0_224 = arith.constant 0 : index
    %c192_225 = arith.constant 192 : index
    %250 = vector.load %arg1[%c0_223, %c0_224, %c192_225] : memref<1x32x256xf32, #tpu.memory_space<vmem>>, vector<1x32x16xf32>
    %251 = vector.shape_cast %250 : vector<1x32x16xf32> to vector<32x16xf32>
    %252 = vector.extract_strided_slice %141 {offsets = [0, 216], sizes = [32, 16], strides = [1, 1]} : vector<32x288xf32> to vector<32x16xf32>
    %cst_226 = arith.constant 1.000000e+00 : f32
    %253 = vector.broadcast %cst_226 : f32 to vector<32x16xf32>
    %254 = arith.mulf %252, %253 : vector<32x16xf32>
    %255 = arith.addf %251, %254 : vector<32x16xf32>
    %c0_227 = arith.constant 0 : index
    %c0_228 = arith.constant 0 : index
    %c192_229 = arith.constant 192 : index
    %256 = vector.load %arg6[%c0_227, %c0_228, %c192_229] : memref<1x32x256xf32, #tpu.memory_space<vmem>>, vector<1x32x16xf32>
    %257 = vector.shape_cast %256 : vector<1x32x16xf32> to vector<32x16xf32>
    %258 = vector.shape_cast %255 : vector<32x16xf32> to vector<1x32x16xf32>
    tpu.vector_store %arg6[%c0_227, %c0_228, %c192_229], %258 {strides = array<i32>} : memref<1x32x256xf32, #tpu.memory_space<vmem>>, vector<1x32x16xf32>,
    %c0_230 = arith.constant 0 : index
    %c0_231 = arith.constant 0 : index
    %c208_232 = arith.constant 208 : index
    %259 = vector.load %arg1[%c0_230, %c0_231, %c208_232] : memref<1x32x256xf32, #tpu.memory_space<vmem>>, vector<1x32x16xf32>
    %260 = vector.shape_cast %259 : vector<1x32x16xf32> to vector<32x16xf32>
    %261 = vector.extract_strided_slice %141 {offsets = [0, 234], sizes = [32, 16], strides = [1, 1]} : vector<32x288xf32> to vector<32x16xf32>
    %cst_233 = arith.constant 1.000000e+00 : f32
    %262 = vector.broadcast %cst_233 : f32 to vector<32x16xf32>
    %263 = arith.mulf %261, %262 : vector<32x16xf32>
    %264 = arith.addf %260, %263 : vector<32x16xf32>
    %c0_234 = arith.constant 0 : index
    %c0_235 = arith.constant 0 : index
    %c208_236 = arith.constant 208 : index
    %265 = vector.load %arg6[%c0_234, %c0_235, %c208_236] : memref<1x32x256xf32, #tpu.memory_space<vmem>>, vector<1x32x16xf32>
    %266 = vector.shape_cast %265 : vector<1x32x16xf32> to vector<32x16xf32>
    %267 = vector.shape_cast %264 : vector<32x16xf32> to vector<1x32x16xf32>
    tpu.vector_store %arg6[%c0_234, %c0_235, %c208_236], %267 {strides = array<i32>} : memref<1x32x256xf32, #tpu.memory_space<vmem>>, vector<1x32x16xf32>,
    %c0_237 = arith.constant 0 : index
    %c0_238 = arith.constant 0 : index
    %c224_239 = arith.constant 224 : index
    %268 = vector.load %arg1[%c0_237, %c0_238, %c224_239] : memref<1x32x256xf32, #tpu.memory_space<vmem>>, vector<1x32x16xf32>
    %269 = vector.shape_cast %268 : vector<1x32x16xf32> to vector<32x16xf32>
    %270 = vector.extract_strided_slice %141 {offsets = [0, 252], sizes = [32, 16], strides = [1, 1]} : vector<32x288xf32> to vector<32x16xf32>
    %cst_240 = arith.constant 1.000000e+00 : f32
    %271 = vector.broadcast %cst_240 : f32 to vector<32x16xf32>
    %272 = arith.mulf %270, %271 : vector<32x16xf32>
    %273 = arith.addf %269, %272 : vector<32x16xf32>
    %c0_241 = arith.constant 0 : index
    %c0_242 = arith.constant 0 : index
    %c224_243 = arith.constant 224 : index
    %274 = vector.load %arg6[%c0_241, %c0_242, %c224_243] : memref<1x32x256xf32, #tpu.memory_space<vmem>>, vector<1x32x16xf32>
    %275 = vector.shape_cast %274 : vector<1x32x16xf32> to vector<32x16xf32>
    %276 = vector.shape_cast %273 : vector<32x16xf32> to vector<1x32x16xf32>
    tpu.vector_store %arg6[%c0_241, %c0_242, %c224_243], %276 {strides = array<i32>} : memref<1x32x256xf32, #tpu.memory_space<vmem>>, vector<1x32x16xf32>,
    %c0_244 = arith.constant 0 : index
    %c0_245 = arith.constant 0 : index
    %c240_246 = arith.constant 240 : index
    %277 = vector.load %arg1[%c0_244, %c0_245, %c240_246] : memref<1x32x256xf32, #tpu.memory_space<vmem>>, vector<1x32x16xf32>
    %278 = vector.shape_cast %277 : vector<1x32x16xf32> to vector<32x16xf32>
    %279 = vector.extract_strided_slice %141 {offsets = [0, 270], sizes = [32, 16], strides = [1, 1]} : vector<32x288xf32> to vector<32x16xf32>
    %cst_247 = arith.constant 1.000000e+00 : f32
    %280 = vector.broadcast %cst_247 : f32 to vector<32x16xf32>
    %281 = arith.mulf %279, %280 : vector<32x16xf32>
    %282 = arith.addf %278, %281 : vector<32x16xf32>
    %c0_248 = arith.constant 0 : index
    %c0_249 = arith.constant 0 : index
    %c240_250 = arith.constant 240 : index
    %283 = vector.load %arg6[%c0_248, %c0_249, %c240_250] : memref<1x32x256xf32, #tpu.memory_space<vmem>>, vector<1x32x16xf32>
    %284 = vector.shape_cast %283 : vector<1x32x16xf32> to vector<32x16xf32>
    %285 = vector.shape_cast %282 : vector<32x16xf32> to vector<1x32x16xf32>
    tpu.vector_store %arg6[%c0_248, %c0_249, %c240_250], %285 {strides = array<i32>} : memref<1x32x256xf32, #tpu.memory_space<vmem>>, vector<1x32x16xf32>,
    return
  }
  func.func @transform_0(%arg0: i32) -> (i32, i32, i32) {
    %c0_i32 = arith.constant 0 : i32
    %c0_i32_0 = arith.constant 0 : i32
    %c0_i32_1 = arith.constant 0 : i32
    return %arg0, %c0_i32, %c0_i32_0 : i32, i32, i32
  }
  func.func @transform_1(%arg0: i32) -> (i32, i32) {
    %c0_i32 = arith.constant 0 : i32
    %c0_i32_0 = arith.constant 0 : i32
    %c0_i32_1 = arith.constant 0 : i32
    return %c0_i32, %c0_i32_0 : i32, i32
  }
  func.func @transform_2(%arg0: i32) -> (i32, i32) {
    %c0_i32 = arith.constant 0 : i32
    %c0_i32_0 = arith.constant 0 : i32
    %c0_i32_1 = arith.constant 0 : i32
    return %c0_i32, %c0_i32_0 : i32, i32
  }
  func.func @transform_3(%arg0: i32) -> (i32, i32) {
    %c0_i32 = arith.constant 0 : i32
    %c0_i32_0 = arith.constant 0 : i32
    %c0_i32_1 = arith.constant 0 : i32
    return %c0_i32, %c0_i32_0 : i32, i32
  }
  func.func @transform_4(%arg0: i32) -> (i32, i32) {
    %c0_i32 = arith.constant 0 : i32
    %c0_i32_0 = arith.constant 0 : i32
    %c0_i32_1 = arith.constant 0 : i32
    return %c0_i32, %c0_i32_0 : i32, i32
  }
  func.func @transform_5(%arg0: i32) -> (i32, i32, i32) {
    %c0_i32 = arith.constant 0 : i32
    %c0_i32_0 = arith.constant 0 : i32
    %c0_i32_1 = arith.constant 0 : i32
    return %arg0, %c0_i32, %c0_i32_0 : i32, i32, i32
  }
}

</mosaic_0001>

<bundles_post_ra>
// kernel: tpu_custom_call.1
= control target key start
LH: loop header
LB: loop body
LE: loop exit
PB: predicated region body
PF: predicated region fallthrough
CT: control target
= control target key end

     0   :  { %10 = vsyncpa [#allocation6], 0  ;;  %s4568_s0 = inlined_call_operand.hbm [shape: f32[2,32,256], index: 0, kind: input, shape index: {}]   ;;  %s4569_s1 = inlined_call_operand.vmem [shape: bf16[32,288], index: 1, kind: input, shape index: {}]   ;;  %s4570_s2 = inlined_call_operand.vmem [shape: f32[32,1], index: 2, kind: input, shape index: {}]   ;;  %s4571_s3 = inlined_call_operand.hbm [shape: bf16[32,288], index: 3, kind: input, shape index: {}]   ;;  %s4572_s4 = inlined_call_operand.vmem [shape: f32[32,1], index: 4, kind: input, shape index: {}]   ;;  %s4573_s5 = inlined_call_operand.hbm [shape: f32[2,32,256], index: 5, kind: output, shape index: {}]  }
   0x1   :  { %12 = vsyncpa [#allocation6 + $0x1], 0 }
   0x2   :  { %13 = vsyncpa [#allocation9], 0 }
   0x3   :  { %14 = vsyncpa [#allocation7], 0 }
   0x4   :  { %16 = vsyncpa [#allocation7 + $0x1], 0  ;;  %s3382_s18 = smov 0   ;;  %s3384_s19 = smov 0  }
   0x5   :  { %s3386_s20 = smov 0   ;;  %s3388_s21 = smov 0  }
   0x6 LB: > { %s3403_s22 = sadd.s32 4294967295, %s3303_s21   ;;  %s2900_s23 = sadd.s32 4294967294, %s3303_s21   ;;  %s3303_s21 = sphi %s3388_s21, %s4625_s21   ;;  %s3299_s20 = sphi %s3386_s20, %s4624_s20   ;;  %s3295_s19 = sphi %s3384_s19, %s4623_s19   ;;  %s3291_s18 = sphi %s3382_s18, %s4622_s18  }
   0x7   : > { %p42_p0 = scmp.ne.s32.totalorder %s3295_s19, %s3291_s18  ;;  %p4574_p1 = scmp.eq.s32.totalorder %s3403_s22, 0 }
   0x8   : > { %p156_p3 = scmp.eq.s32.totalorder %s2900_s23, 1  ;;  %p2901_p5 = scmp.ge.s32.totalorder %s3303_s21, 1 }
   0x9   : > { %p3412_p4 = por %p4574_p1, %p42_p0  ;;  %p163_p7 = scmp.lt.s32.totalorder %s3303_s21, 3 }
   0xa   : > { %p3417_p6 = por %p156_p3, %p42_p0  ;;  %s3305_s27 = smov [#allocation8]  }
   0xb   : > { %s4590_s24 = scalar_select %p3412_p4, 1, 0 }
   0xc   : > { %s4591_s25 = scalar_select %p3417_p6, 1, 0 }
   0xd   : > { %p3422_p8 = pnand %p2901_p5, %p163_p7  ;;  %s181_s28 = sshll.u32 %s3305_s27, 4  ;;  %s3426_s28 = int_to_ptr.vmem [resolvable:$true] %s181_s28 }
   0xe   : > { %s3438_s30 = sadd.s32 1, %s3303_s21   ;;  %s29_s6 = sadd.s32 1, %s3299_s20 }
   0xf   : > { %s4592_s26 = scalar_select %p3422_p8, 1, 0 }
  0x10   : > { %p3064_p9 = pneg %p3422_p8  ;;  %s26_s7 = ssub.s32 %s3303_s21, %s3438_s30 }
  0x11   : > { %s3175_s10 = scalar_lea.hbm %s4571_s3, 768 }
  0x12   : > { %p3433_p11 = pnand %p3064_p9, %p4574_p1  ;;  %p3176_p12 = scmp.ne.s32.totalorder %s4571_s3, %s3175_s10 }
  0x13   : > { %p3182_p5 = scmp.lt.u32.totalorder %s3175_s10, %s4571_s3 }
  0x14   : > { %p3177_p13 = pneg %p3433_p11 }
  0x16   : > { %p3178_p0 = pnand %p3177_p13, %p3176_p12 }
  0x18   : > { %p3179_p3 = pneg %p3178_p0 }
  0x1a   : > { %p3184_p7 = pnand %p3182_p5, %p3179_p3 }
  0x1c   : > { %3187 = shalt.err (!%p3184_p7)
}
  0x1d   : > { %s3188_s15 = scalar_lea.vmem %s3426_s28, 768  ;;  %p3196_p2 = scmp.lt.s32.totalorder %s3426_s28, %s3426_s28 }
  0x1e   : > { %p3189_p9 = scmp.ne.s32.totalorder %s3426_s28, %s3188_s15  ;;  %p3197_p6 = scmp.lt.s32.totalorder %s3188_s15, %s3188_s15 }
  0x20   : > { %p3191_p10 = pnand %p3189_p9, %p3177_p13  ;;  %p3198_p4 = por %p3197_p6, %p3196_p2 }
  0x22   : > { %p3192_p1 = pneg %p3191_p10 }
  0x24   : > { %p3199_p8 = pnand %p3198_p4, %p3192_p1 }
  0x26   : > { %3202 = shalt.err (!%p3199_p8)
}
  0x27   : > { %s3306_s16 = smov 192   ;;  %s3307_s17 = smov 12  }
  0x28   : > { %3067 = dma.hbm_to_vmem [thread:$0]  (!%p3433_p11), %s4571_s3, 768, %s3426_s28, [#allocation9], %s3306_s16, %s3306_s16, %s3307_s17  }
  0x29   : > { %p27_p2 = scmp.eq.s32.totalorder %s26_s7, 0  ;;  %p36_p1 = scmp.ne.s32.totalorder %s3299_s20, %s3295_s19 }
  0x2a   : > { %p37_p4 = scmp.eq.s32.totalorder %s3303_s21, 0  ;;  %p3077_p6 = scmp.lt.s32.totalorder %s3303_s21, 2 }
  0x2b   : > { %s3469_s8 = scalar_select %p27_p2, %s3299_s20, %s29_s6  }
  0x2c   : > { %p38_p8 = por %p37_p4, %p36_p1  ;;  %p4594_p10 = scmp.eq.s32.totalorder %s3403_s22, 1 }
  0x2d   : > { %s198_s10 = sand.u32 1, %s3299_s20   ;;  %s2936_s11 = sshll.u32 %s3303_s21, 10 }
  0x2e   : > { %p3473_p12 = por %p4594_p10, %p36_p1  ;;  %s2904_s12 = sshll.u32 %s198_s10, 6 }
  0x2f   : > { %s3482_s14 = scalar_lea.hbm %s4568_s0, %s2936_s11  ;;  %s202_s28 = scalar_lea.vmem [#allocation5], %s2904_s12 }
  0x30   : > { %s209_s6 = sshll.u32 %s202_s28, 4  ;;  %p3484_p11 = pnand %p3077_p6, %p38_p8  ;;  %s3488_s6 = int_to_ptr.vmem [resolvable:$true] %s209_s6 }
  0x31   : > { %s3490_s15 = scalar_lea.sflag [#allocation6], %s198_s10  ;;  %s3203_s16 = scalar_lea.hbm %s3482_s14, 1024 }
  0x32   : > { %p3204_p13 = scmp.ne.s32.totalorder %s3482_s14, %s3203_s16  ;;  %p3205_p0 = pneg %p3484_p11 }
  0x33   : > { %s3208_s27 = scalar_lea.hbm %s4568_s0, 2048  ;;  %p3209_p7 = scmp.lt.u32.totalorder %s3482_s14, %s4568_s0 }
  0x34   : > { %p3206_p3 = pnand %p3205_p0, %p3204_p13  ;;  %p3210_p9 = scmp.lt.u32.totalorder %s3208_s27, %s3203_s16 }
  0x35   : > { %p3212_p1 = scmp.lt.u32.totalorder %s3203_s16, %s3482_s14 }
  0x36   : > { %p3207_p5 = pneg %p3206_p3  ;;  %p3211_p2 = por %p3210_p9, %p3209_p7 }
  0x38   : > { %p3213_p4 = por %p3212_p1, %p3211_p2 }
  0x3a   : > { %p3214_p6 = pnand %p3213_p4, %p3207_p5 }
  0x3c   : > { %3217 = shalt.err (!%p3214_p6)
}
  0x3d   : > { %s3218_s10 = scalar_lea.vmem %s3488_s6, 1024  ;;  %s3308_s29 = smov [#allocation5]  }
  0x3e   : > { %p3219_p8 = scmp.ne.s32.totalorder %s3488_s6, %s3218_s10  ;;  %s3223_s13 = sshll.u32 %s3308_s29, 4  ;;  %s3224_s13 = int_to_ptr.vmem [resolvable:$false] %s3223_s13 }
  0x3f   : > { %s3225_s28 = scalar_lea.vmem %s3224_s13, 2048  ;;  %p3226_p3 = scmp.lt.s32.totalorder %s3488_s6, %s3224_s13 }
  0x40   : > { %p3221_p10 = pnand %p3219_p8, %p3205_p0  ;;  %p3227_p7 = scmp.lt.s32.totalorder %s3225_s28, %s3218_s10 }
  0x42   : > { %p3222_p13 = pneg %p3221_p10  ;;  %p3228_p9 = por %p3227_p7, %p3226_p3 }
  0x44   : > { %p3229_p2 = pnand %p3228_p9, %p3222_p13 }
  0x46   : > { %3232 = shalt.err (!%p3229_p2)
}
  0x47   : > { %s3309_s16 = smov 256   ;;  %s3310_s17 = smov 16  }
  0x48   : > { %3071 = dma.hbm_to_vmem [thread:$0]  (!%p3484_p11), %s3482_s14, 1024, %s3488_s6, %s3490_s15, %s3309_s16, %s3309_s16, %s3310_s17  }
  0x49   : > { %p4597_p0 = scmp.ne.s32.totalorder %s4592_s26, 0 }
  0x4a   : > { %s3521_s23 = sand.u32 (!%p4597_p0), 1, %s3295_s19   ;;  %p4598_p5 = scmp.ne.s32.totalorder (!%p4597_p0), %s4590_s24, 0 }
  0x4b   : > { %221 = sbr.rel (%p4597_p0) target bundleno = 1614 (0x64e), region = 40  ;;  %s4577_s27 = sshll.u32 (!%p4597_p0), %s3521_s23, 6 }
  0x4c   : > { %s224_s11 = scalar_lea.sflag (!%p4597_p0), [#allocation6], %s3521_s23  ;;  %s3527_s12 = scalar_lea.vmem (!%p4597_p0), [#allocation5], %s4577_s27 }
  0x52   : > { %3278 = dma.done.wait (%p4598_p5), %s224_s11, 1024  }
  0x53   : > { %3280 = vsyncadd (%p4598_p5), %s224_s11, 4294966272  ;;  %p4599_p11 = scmp.eq.s32.totalorder %s3403_s22, 0 }
  0x55   : > { %3282 = dma.done.wait (%p4599_p11), [#allocation9], 768   ;;  %p4600_p1 = pmov %p4599_p11 }
  0x56   : > { %v3311_v0 = vmov 0.0   ;;  %v3538_v1 = vld [vmem:[%s3527_s12] sm:$0xff]  ;;  %s3312_s24 = smov 33   ;;  %s3313_s26 = smov 31   ;;  %v3544_v2 = vld [vmem:[%s3527_s12 + $0x10] sm:$0xff]  ;;  %v3554_v3 = vld [vmem:[%s3527_s12 + $0x18] sm:$0xff] }
  0x57   : > { %3284 = vsyncadd (%p4600_p1), [#allocation9], 4294966528  ;;  %260 = vst [vmem:[#allocation2 + $0x8] sm:$0xff] %v3311_v0  ;;  %472 = vrot.lane.b32.xlu1 %v3538_v1, %s3312_s24  ;;  %442 = vrot.lane.b32.xlu0 %v3538_v1, %s3313_s26  ;;  %s3314_s14 = smov 19   ;;  %v3557_v4 = vld [vmem:[%s3527_s12 + $0x8] sm:$0xff]  ;;  %s3315_s6 = smov 35  }
  0x58   : > { %259 = vst [vmem:[#allocation2] sm:$0xff] %v3311_v0  ;;  %263 = vst [vmem:[#allocation2 + $0x18] sm:$0xff] %v3311_v0  ;;  %s3316_s7 = smov 21   ;;  %s3317_s15 = smov 37   ;;  %v3576_v5 = vld [vmem:[%s3527_s12 + $0x30] sm:$0xff]  ;;  %v3579_v6 = vld [vmem:[%s3527_s12 + $0x20] sm:$0xff] }
  0x59   : > { %264 = vst [vmem:[#allocation2 + $0x20] sm:$0xff] %v3311_v0  ;;  %266 = vst [vmem:[#allocation2 + $0x30] sm:$0xff] %v3311_v0  ;;  %s3318_s10 = smov 23   ;;  %vm261_vm0 = vcmask 703488   ;;  %s3319_s29 = smov 39   ;;  %v492_v7 = vld [vmem:[%s3527_s12 + $0x38] sm:$0xff] }
  0x5a   : > { %267 = vst [vmem:[#allocation2 + $0x38] sm:$0xff] %v3311_v0  ;;  %269 = vst [vmem:[#allocation2 + $0x48] sm:$0xff] %v3311_v0  ;;  %s3320_s13 = smov 25   ;;  %s3321_s28 = smov 41   ;;  %v491_v8 = vld [vmem:[%s3527_s12 + $0x28] sm:$0xff]  ;;  %vm456_vm1 = vcmask 121856  }
  0x5b   : > { %270 = vst [vmem:[#allocation2 + $0x50] sm:$0xff] %v3311_v0  ;;  %272 = vst [vmem:[#allocation3] sm:$0xff] %v3311_v0  ;;  %474 = vrot.lane.b32.xlu1 %v3544_v2, %s3312_s24  ;;  %444 = vrot.lane.b32.xlu0 %v3544_v2, %s3313_s26  ;;  %s3322_s16 = smov 45   ;;  %s3323_s17 = smov 27   ;;  %vm484_vm2 = vcmask 269448   ;;  %vm304_vm3 = vcmask 285848  }
  0x5c   : > { %275 = vst [vmem:[#allocation3 + $0x18] sm:$0xff] %v3311_v0  ;;  %278 = vst [vmem:[#allocation3 + $0x30] sm:$0xff] %v3311_v0  ;;  %s3324_s11 = smov 43   ;;  %vm509_vm4 = vcmask 417048   ;;  %vm329_vm5 = vcmask 433448   ;;  %vm534_vm6 = vcmask 564648  }
  0x5d   : > { %281 = vst [vmem:[#allocation3 + $0x48] sm:$0xff] %v3311_v0  ;;  %265 = vst.msk [vmem:[#allocation2 + $0x28] sm:$0xff] %vm261_vm0, %v3311_v0  ;;  %vm354_vm7 = vcmask 581048   ;;  %vm559_vm8 = vcmask 712248   ;;  %vm379_vm9 = vcmask 728648   ;;  %vm584_vm10 = vcmask 859848  }
  0x5e   : > { %262 = vst.msk [vmem:[#allocation2 + $0x10] sm:$0xff] %vm261_vm0, %v3311_v0  ;;  %268 = vst.msk [vmem:[#allocation2 + $0x40] sm:$0xff] %vm261_vm0, %v3311_v0  ;;  %vm636_vm11 = vcmask 105472   ;;  %vm404_vm12 = vcmask 876248   ;;  %vm609_vm13 = vcmask 1007448   ;;  %vm634_vm14 = vcmask 1048552  }
  0x5f   : > { %294 = vrot.lane.b32.xlu1 %v3544_v2, %s3314_s14  ;;  %292 = vrot.lane.b32.xlu0 %v3538_v1, %s3314_s14  ;;  %271 = vst.msk [vmem:[#allocation2 + $0x58] sm:$0xff] %vm261_vm0, %v3311_v0  ;;  %274 = vst.msk [vmem:[#allocation3 + $0x10] sm:$0xff] %vm261_vm0, %v3311_v0  ;;  %vm664_vm15 = vcmask 253048   ;;  %s3344_s27 = smov 116  }
  0x60   : > { %277 = vst.msk [vmem:[#allocation3 + $0x28] sm:$0xff] %vm261_vm0, %v3311_v0  ;;  %280 = vst.msk [vmem:[#allocation3 + $0x40] sm:$0xff] %vm261_vm0, %v3311_v0 }
  0x61   : > { %283 = vst.msk [vmem:[#allocation3 + $0x58] sm:$0xff] %vm261_vm0, %v3311_v0  ;;  %vm429_vm0 = vcmask 1023848  }
  0x63   : > { %499 = vrot.lane.b32.xlu1 %v3554_v3, %s3315_s6  ;;  %497 = vrot.lane.b32.xlu0 %v3557_v4, %s3315_s6 }
  0x67   : > { %319 = vrot.lane.b32.xlu1 %v3544_v2, %s3316_s7  ;;  %317 = vrot.lane.b32.xlu0 %v3538_v1, %s3316_s7 }
  0x6b   : > { %524 = vrot.lane.b32.xlu1 %v3554_v3, %s3317_s15  ;;  %522 = vrot.lane.b32.xlu0 %v3557_v4, %s3317_s15 }
  0x6f   : > { %344 = vrot.lane.b32.xlu1 %v3544_v2, %s3318_s10  ;;  %342 = vrot.lane.b32.xlu0 %v3538_v1, %s3318_s10 }
  0x73   : > { %448 = vrot.lane.b32.xlu1 %v3576_v5, %s3313_s26  ;;  %446 = vrot.lane.b32.xlu0 %v3579_v6, %s3313_s26  ;;  %s3326_s26 = smov 29  }
  0x77   : > { %549 = vrot.lane.b32.xlu1 %v3554_v3, %s3319_s29  ;;  %547 = vrot.lane.b32.xlu0 %v3557_v4, %s3319_s29 }
  0x7b   : > { %369 = vrot.lane.b32.xlu1 %v3544_v2, %s3320_s13  ;;  %367 = vrot.lane.b32.xlu0 %v3538_v1, %s3320_s13 }
  0x7f   : > { %478 = vrot.lane.b32.xlu1 %v3576_v5, %s3312_s24  ;;  %476 = vrot.lane.b32.xlu0 %v3579_v6, %s3312_s24  ;;  %s3325_s24 = smov 47  }
  0x83   : > { %574 = vrot.lane.b32.xlu1 %v3554_v3, %s3321_s28  ;;  %572 = vrot.lane.b32.xlu0 %v3557_v4, %s3321_s28 }
  0x87   : > { %624 = vrot.lane.b32.xlu1 %v3554_v3, %s3322_s16  ;;  %622 = vrot.lane.b32.xlu0 %v3557_v4, %s3322_s16 }
  0x8b   : > { %298 = vrot.lane.b32.xlu1 %v3576_v5, %s3314_s14  ;;  %296 = vrot.lane.b32.xlu0 %v3579_v6, %s3314_s14 }
  0x8f   : > { %394 = vrot.lane.b32.xlu1 %v3544_v2, %s3323_s17  ;;  %392 = vrot.lane.b32.xlu0 %v3538_v1, %s3323_s17 }
  0x93   : > { %503 = vrot.lane.b32.xlu1 %v492_v7, %s3315_s6  ;;  %501 = vrot.lane.b32.xlu0 %v491_v8, %s3315_s6  ;;  %s3327_s6 = smov 49  }
  0x97   : > { %599 = vrot.lane.b32.xlu1 %v3554_v3, %s3324_s11  ;;  %597 = vrot.lane.b32.xlu0 %v3557_v4, %s3324_s11 }
  0x9b   : > { %654 = vrot.lane.b32.xlu1 %v3554_v3, %s3325_s24  ;;  %652 = vrot.lane.b32.xlu0 %v3557_v4, %s3325_s24 }
  0x9f   : > { %323 = vrot.lane.b32.xlu1 %v3576_v5, %s3316_s7  ;;  %321 = vrot.lane.b32.xlu0 %v3579_v6, %s3316_s7  ;;  %s3328_s7 = smov 127  }
  0xa3   : > { %419 = vrot.lane.b32.xlu1 %v3544_v2, %s3326_s26  ;;  %417 = vrot.lane.b32.xlu0 %v3538_v1, %s3326_s26 }
  0xa7   : > { %528 = vrot.lane.b32.xlu1 %v492_v7, %s3317_s15  ;;  %526 = vrot.lane.b32.xlu0 %v491_v8, %s3317_s15  ;;  %s3329_s15 = smov 126  }
  0xab   : > { %679 = vrot.lane.b32.xlu1 %v3554_v3, %s3327_s6  ;;  %677 = vrot.lane.b32.xlu0 %v3557_v4, %s3327_s6 }
  0xaf   : > { %348 = vrot.lane.b32.xlu1 %v3576_v5, %s3318_s10  ;;  %346 = vrot.lane.b32.xlu0 %v3579_v6, %s3318_s10  ;;  %s3330_s10 = smov 110  }
  0xb3   : > { %553 = vrot.lane.b32.xlu1 %v492_v7, %s3319_s29  ;;  %551 = vrot.lane.b32.xlu0 %v491_v8, %s3319_s29  ;;  %s3331_s29 = smov 109  }
  0xb7   : > { %373 = vrot.lane.b32.xlu1 %v3576_v5, %s3320_s13  ;;  %371 = vrot.lane.b32.xlu0 %v3579_v6, %s3320_s13  ;;  %s4582_s13 = smov 108  }
  0xbb   : > { %578 = vrot.lane.b32.xlu1 %v492_v7, %s3321_s28  ;;  %576 = vrot.lane.b32.xlu0 %v491_v8, %s3321_s28  ;;  %s4580_s28 = smov 92  }
  0xbf   : > { %628 = vrot.lane.b32.xlu1 %v492_v7, %s3322_s16  ;;  %626 = vrot.lane.b32.xlu0 %v491_v8, %s3322_s16  ;;  %s4578_s16 = smov 91  }
  0xc3   : > { %398 = vrot.lane.b32.xlu1 %v3576_v5, %s3323_s17  ;;  %396 = vrot.lane.b32.xlu0 %v3579_v6, %s3323_s17  ;;  %s3342_s17 = smov 114  }
  0xc7   : > { %603 = vrot.lane.b32.xlu1 %v492_v7, %s3324_s11  ;;  %601 = vrot.lane.b32.xlu0 %v491_v8, %s3324_s11  ;;  %s3343_s11 = smov 118  }
  0xc9   : > { %v473_v9 = vpop.permute.xlu1 %472  ;;  %v3653_v10 = vpop.permute.xlu0 %442 }
  0xca   : > { %457 = vst.msk [vmem:[#allocation2 + $0x8] sm:$0xff] %vm456_vm1, %v3653_v10 }
  0xcb   : > { %658 = vrot.lane.b32.xlu1 %v492_v7, %s3325_s24  ;;  %656 = vrot.lane.b32.xlu0 %v491_v8, %s3325_s24  ;;  %485 = vst.msk [vmem:[#allocation2 + $0x8] sm:$0xff] %vm484_vm2, %v473_v9  ;;  %s3335_s24 = smov 90  }
  0xcd   : > { %v475_v11 = vpop.permute.xlu1 %474  ;;  %v3660_v12 = vpop.permute.xlu0 %444 }
  0xce   : > { %459 = vst.msk [vmem:[#allocation2 + $0x20] sm:$0xff] %vm456_vm1, %v3660_v12 }
  0xcf   : > { %423 = vrot.lane.b32.xlu1 %v3576_v5, %s3326_s26  ;;  %421 = vrot.lane.b32.xlu0 %v3579_v6, %s3326_s26  ;;  %486 = vst.msk [vmem:[#allocation2 + $0x20] sm:$0xff] %vm484_vm2, %v475_v11  ;;  %s3340_s26 = smov 122  }
  0xd1   : > { %v295_v13 = vpop.permute.xlu1 %294  ;;  %v293_v14 = vpop.permute.xlu0 %292 }
  0xd2   : > { %306 = vst.msk [vmem:[#allocation2 + $0x18] sm:$0xff] %vm304_vm3, %v295_v13  ;;  %305 = vst.msk [vmem:[#allocation2] sm:$0xff] %vm304_vm3, %v293_v14 }
  0xd3   : > { %683 = vrot.lane.b32.xlu1 %v492_v7, %s3327_s6  ;;  %681 = vrot.lane.b32.xlu0 %v491_v8, %s3327_s6  ;;  %s4586_s6 = smov 120  }
  0xd5   : > { %v500_v15 = vpop.permute.xlu1 %499  ;;  %v498_v16 = vpop.permute.xlu0 %497 }
  0xd6   : > { %511 = vst.msk [vmem:[#allocation2 + $0x20] sm:$0xff] %vm509_vm4, %v500_v15  ;;  %510 = vst.msk [vmem:[#allocation2 + $0x8] sm:$0xff] %vm509_vm4, %v498_v16 }
  0xd9   : > { %v320_v17 = vpop.permute.xlu1 %319  ;;  %v318_v18 = vpop.permute.xlu0 %317 }
  0xda   : > { %331 = vst.msk [vmem:[#allocation2 + $0x18] sm:$0xff] %vm329_vm5, %v320_v17  ;;  %330 = vst.msk [vmem:[#allocation2] sm:$0xff] %vm329_vm5, %v318_v18 }
  0xdd   : > { %v525_v19 = vpop.permute.xlu1 %524  ;;  %v523_v20 = vpop.permute.xlu0 %522 }
  0xde   : > { %536 = vst.msk [vmem:[#allocation2 + $0x20] sm:$0xff] %vm534_vm6, %v525_v19  ;;  %535 = vst.msk [vmem:[#allocation2 + $0x8] sm:$0xff] %vm534_vm6, %v523_v20 }
  0xe1   : > { %v345_v21 = vpop.permute.xlu1 %344  ;;  %v343_v22 = vpop.permute.xlu0 %342 }
  0xe2   : > { %356 = vst.msk [vmem:[#allocation2 + $0x18] sm:$0xff] %vm354_vm7, %v345_v21  ;;  %355 = vst.msk [vmem:[#allocation2] sm:$0xff] %vm354_vm7, %v343_v22 }
  0xe5   : > { %v3681_v23 = vpop.permute.xlu1 %448  ;;  %v3683_v24 = vpop.permute.xlu0 %446 }
  0xe6   : > { %463 = vst.msk [vmem:[#allocation2 + $0x50] sm:$0xff] %vm456_vm1, %v3681_v23  ;;  %461 = vst.msk [vmem:[#allocation2 + $0x38] sm:$0xff] %vm456_vm1, %v3683_v24  ;;  %vm454_vm1 = vcmask 1048568  }
  0xe9   : > { %v550_v25 = vpop.permute.xlu1 %549  ;;  %v548_v26 = vpop.permute.xlu0 %547 }
  0xea   : > { %561 = vst.msk [vmem:[#allocation2 + $0x20] sm:$0xff] %vm559_vm8, %v550_v25  ;;  %560 = vst.msk [vmem:[#allocation2 + $0x8] sm:$0xff] %vm559_vm8, %v548_v26 }
  0xed   : > { %v370_v27 = vpop.permute.xlu1 %369  ;;  %v368_v28 = vpop.permute.xlu0 %367 }
  0xee   : > { %381 = vst.msk [vmem:[#allocation2 + $0x18] sm:$0xff] %vm379_vm9, %v370_v27  ;;  %380 = vst.msk [vmem:[#allocation2] sm:$0xff] %vm379_vm9, %v368_v28 }
  0xf1   : > { %v479_v29 = vpop.permute.xlu1 %478  ;;  %v477_v30 = vpop.permute.xlu0 %476 }
  0xf2   : > { %488 = vst.msk [vmem:[#allocation2 + $0x50] sm:$0xff] %vm484_vm2, %v479_v29  ;;  %487 = vst.msk [vmem:[#allocation2 + $0x38] sm:$0xff] %vm484_vm2, %v477_v30  ;;  %vm689_vm2 = vcmask 400648   ;;  %v3336_v30 = vmov 0  }
  0xf3   : > { %3158 = vset.pattern.permute.xlu1 %v3336_v30  ;;  %3157 = vset.pattern.permute.xlu0 %v3336_v30 }
  0xf5   : > { %v575_v31 = vpop.permute.xlu1 %574  ;;  %v573_v32 = vpop.permute.xlu0 %572 }
  0xf6   : > { %586 = vst.msk [vmem:[#allocation2 + $0x20] sm:$0xff] %vm584_vm10, %v575_v31  ;;  %585 = vst.msk [vmem:[#allocation2 + $0x8] sm:$0xff] %vm584_vm10, %v573_v32  ;;  %v1205_v31 = vld [vmem:[%s4570_s2] sm:$0xff]  ;;  %v1206_v32 = vld [vmem:[%s4570_s2 + $0x8] sm:$0xff] }
  0xf9   : > { %v625_v33 = vpop.permute.xlu1 %624  ;;  %v623_v34 = vpop.permute.xlu0 %622 }
  0xfa   : > { %639 = vst.msk [vmem:[#allocation2 + $0x28] sm:$0xff] %vm636_vm11, %v625_v33  ;;  %637 = vst.msk [vmem:[#allocation2 + $0x10] sm:$0xff] %vm636_vm11, %v623_v34 }
  0xfd   : > { %v299_v35 = vpop.permute.xlu1 %298  ;;  %v297_v36 = vpop.permute.xlu0 %296 }
  0xfe   : > { %308 = vst.msk [vmem:[#allocation2 + $0x48] sm:$0xff] %vm304_vm3, %v299_v35  ;;  %307 = vst.msk [vmem:[#allocation2 + $0x30] sm:$0xff] %vm304_vm3, %v297_v36  ;;  %vm722_vm3 = vcmask 261120  }
 0x101   : > { %v395_v37 = vpop.permute.xlu1 %394  ;;  %v393_v38 = vpop.permute.xlu0 %392 }
 0x102   : > { %406 = vst.msk [vmem:[#allocation2 + $0x18] sm:$0xff] %vm404_vm12, %v395_v37  ;;  %405 = vst.msk [vmem:[#allocation2] sm:$0xff] %vm404_vm12, %v393_v38 }
 0x105   : > { %v504_v39 = vpop.permute.xlu1 %503  ;;  %v502_v40 = vpop.permute.xlu0 %501 }
 0x106   : > { %513 = vst.msk [vmem:[#allocation2 + $0x50] sm:$0xff] %vm509_vm4, %v504_v39  ;;  %512 = vst.msk [vmem:[#allocation2 + $0x38] sm:$0xff] %vm509_vm4, %v502_v40  ;;  %vm763_vm4 = vcmask 1039360  }
 0x109   : > { %v600_v41 = vpop.permute.xlu1 %599  ;;  %v598_v42 = vpop.permute.xlu0 %597 }
 0x10a   : > { %611 = vst.msk [vmem:[#allocation2 + $0x20] sm:$0xff] %vm609_vm13, %v600_v41  ;;  %610 = vst.msk [vmem:[#allocation2 + $0x8] sm:$0xff] %vm609_vm13, %v598_v42 }
 0x10b   : > { %638 = vst.msk [vmem:[#allocation2 + $0x20] sm:$0xff] %vm634_vm14, %v625_v33  ;;  %635 = vst.msk [vmem:[#allocation2 + $0x8] sm:$0xff] %vm634_vm14, %v623_v34  ;;  %v1207_v33 = vld [vmem:[%s4570_s2 + $0x10] sm:$0xff]  ;;  %v1208_v34 = vld [vmem:[%s4570_s2 + $0x18] sm:$0xff] }
 0x10d   : > { %v655_v43 = vpop.permute.xlu1 %654  ;;  %v653_v44 = vpop.permute.xlu0 %652 }
 0x10e   : > { %666 = vst.msk [vmem:[#allocation2 + $0x28] sm:$0xff] %vm664_vm15, %v655_v43  ;;  %665 = vst.msk [vmem:[#allocation2 + $0x10] sm:$0xff] %vm664_vm15, %v653_v44 }
 0x111   : > { %v324_v45 = vpop.permute.xlu1 %323  ;;  %v322_v46 = vpop.permute.xlu0 %321 }
 0x112   : > { %333 = vst.msk [vmem:[#allocation2 + $0x48] sm:$0xff] %vm329_vm5, %v324_v45  ;;  %332 = vst.msk [vmem:[#allocation2 + $0x30] sm:$0xff] %vm329_vm5, %v322_v46  ;;  %v703_v47 = vld [vmem:[#allocation2 + $0x8] sm:$0xff]  ;;  %v706_v48 = vld [vmem:[#allocation2 + $0x20] sm:$0xff]  ;;  %vm816_vm5 = vcmask 1031168  }
 0x113   : > { %v3713_v49 = vpack.c.bf16 %v706_v48, %v703_v47 }
 0x115   : > { %v420_v50 = vpop.permute.xlu1 %419  ;;  %v418_v51 = vpop.permute.xlu0 %417  ;;  %1265 = vmatprep.subr.bf16.mxu0 %v3713_v49 }
 0x116   : > { %431 = vst.msk [vmem:[#allocation2 + $0x18] sm:$0xff] %vm429_vm0, %v420_v50  ;;  %430 = vst.msk [vmem:[#allocation2] sm:$0xff] %vm429_vm0, %v418_v51 }
 0x117   : > { %458 = vst.msk [vmem:[#allocation2 + $0x18] sm:$0xff] %vm454_vm1, %v3660_v12  ;;  %455 = vst.msk [vmem:[#allocation2] sm:$0xff] %vm454_vm1, %v3653_v10 }
 0x119   : > { %v529_v52 = vpop.permute.xlu1 %528  ;;  %v527_v53 = vpop.permute.xlu0 %526 }
 0x11a   : > { %538 = vst.msk [vmem:[#allocation2 + $0x50] sm:$0xff] %vm534_vm6, %v529_v52  ;;  %537 = vst.msk [vmem:[#allocation2 + $0x38] sm:$0xff] %vm534_vm6, %v527_v53  ;;  %vm869_vm6 = vcmask 900096  }
 0x11d   : > { %v680_v54 = vpop.permute.xlu1 %679  ;;  %v678_v55 = vpop.permute.xlu0 %677 }
 0x11e   : > { %691 = vst.msk [vmem:[#allocation2 + $0x28] sm:$0xff] %vm689_vm2, %v680_v54  ;;  %690 = vst.msk [vmem:[#allocation2 + $0x10] sm:$0xff] %vm689_vm2, %v678_v55  ;;  %v702_v56 = vld [vmem:[#allocation2] sm:$0xff]  ;;  %v705_v57 = vld [vmem:[#allocation2 + $0x18] sm:$0xff] }
 0x11f   : > { %v3726_v58 = vpack.c.bf16 %v705_v57, %v702_v56 }
 0x121   : > { %v349_v59 = vpop.permute.xlu1 %348  ;;  %v347_v60 = vpop.permute.xlu0 %346  ;;  %1266 = vmatpush1.bf16.msra.mxu0 %v3726_v58 }
 0x122   : > { %358 = vst.msk [vmem:[#allocation2 + $0x48] sm:$0xff] %vm354_vm7, %v349_v59  ;;  %357 = vst.msk [vmem:[#allocation2 + $0x30] sm:$0xff] %vm354_vm7, %v347_v60  ;;  %vm922_vm7 = vcmask 891904  }
 0x125   : > { %v707_v61 = vld [vmem:[#allocation2 + $0x28] sm:$0xff]  ;;  %v704_v62 = vld [vmem:[#allocation2 + $0x10] sm:$0xff]  ;;  %v554_v63 = vpop.permute.xlu1 %553  ;;  %v552_v0 = vpop.permute.xlu0 %551 }
 0x126   : > { %v3731_v1 = vpack.c.bf16 %v707_v61, %v704_v62  ;;  %563 = vst.msk [vmem:[#allocation2 + $0x50] sm:$0xff] %vm559_vm8, %v554_v63  ;;  %562 = vst.msk [vmem:[#allocation2 + $0x38] sm:$0xff] %vm559_vm8, %v552_v0  ;;  %vm975_vm8 = vcmask 883712  }
 0x128   : > { %755 = vrot.lane.b32.xlu1 %v3731_v1, %s3328_s7  ;;  %723 = vst.msk [vmem:[#allocation4 + $0x10] sm:$0xff] %vm722_vm3, %v3731_v1 }
 0x129   : > { %v374_v2 = vpop.permute.xlu1 %373  ;;  %v372_v3 = vpop.permute.xlu0 %371 }
 0x12a   : > { %383 = vst.msk [vmem:[#allocation2 + $0x48] sm:$0xff] %vm379_vm9, %v374_v2  ;;  %382 = vst.msk [vmem:[#allocation2 + $0x30] sm:$0xff] %vm379_vm9, %v372_v3  ;;  %vm1028_vm9 = vcmask 752640  }
 0x12c   : > { %808 = vrot.lane.b32.xlu1 %v3731_v1, %s3329_s15 }
 0x12d   : > { %v579_v4 = vpop.permute.xlu1 %578  ;;  %v577_v5 = vpop.permute.xlu0 %576 }
 0x12e   : > { %588 = vst.msk [vmem:[#allocation2 + $0x50] sm:$0xff] %vm584_vm10, %v579_v4  ;;  %587 = vst.msk [vmem:[#allocation2 + $0x38] sm:$0xff] %vm584_vm10, %v577_v5  ;;  %vm1081_vm10 = vcmask 744448  }
 0x12f   : > { %v1153_v3 = vld [vmem:[#allocation4 + $0x10] sm:$0xff] }
 0x131   : > { %v629_v6 = vpop.permute.xlu1 %628  ;;  %v627_v7 = vpop.permute.xlu0 %626 }
 0x132   : > { %643 = vst.msk [vmem:[#allocation2 + $0x58] sm:$0xff] %vm636_vm11, %v629_v6  ;;  %641 = vst.msk [vmem:[#allocation2 + $0x40] sm:$0xff] %vm636_vm11, %v627_v7  ;;  %vm1134_vm11 = vcmask 736256  }
 0x135   : > { %v399_v8 = vpop.permute.xlu1 %398  ;;  %v397_v9 = vpop.permute.xlu0 %396 }
 0x136   : > { %408 = vst.msk [vmem:[#allocation2 + $0x48] sm:$0xff] %vm404_vm12, %v399_v8  ;;  %407 = vst.msk [vmem:[#allocation2 + $0x30] sm:$0xff] %vm404_vm12, %v397_v9 }
 0x139   : > { %v604_v10 = vpop.permute.xlu1 %603  ;;  %v602_v11 = vpop.permute.xlu0 %601 }
 0x13a   : > { %613 = vst.msk [vmem:[#allocation2 + $0x50] sm:$0xff] %vm609_vm13, %v604_v10  ;;  %612 = vst.msk [vmem:[#allocation2 + $0x38] sm:$0xff] %vm609_vm13, %v602_v11 }
 0x13b   : > { %642 = vst.msk [vmem:[#allocation2 + $0x50] sm:$0xff] %vm634_vm14, %v629_v6  ;;  %640 = vst.msk [vmem:[#allocation2 + $0x38] sm:$0xff] %vm634_vm14, %v627_v7 }
 0x13d   : > { %v659_v12 = vpop.permute.xlu1 %658  ;;  %v657_v13 = vpop.permute.xlu0 %656 }
 0x13e   : > { %668 = vst.msk [vmem:[#allocation2 + $0x58] sm:$0xff] %vm664_vm15, %v659_v12  ;;  %667 = vst.msk [vmem:[#allocation2 + $0x40] sm:$0xff] %vm664_vm15, %v657_v13 }
 0x141   : > { %v424_v14 = vpop.permute.xlu1 %423  ;;  %v422_v15 = vpop.permute.xlu0 %421 }
 0x142   : > { %433 = vst.msk [vmem:[#allocation2 + $0x48] sm:$0xff] %vm429_vm0, %v424_v14  ;;  %432 = vst.msk [vmem:[#allocation2 + $0x30] sm:$0xff] %vm429_vm0, %v422_v15  ;;  %v709_v16 = vld [vmem:[#allocation2 + $0x38] sm:$0xff]  ;;  %v712_v17 = vld [vmem:[#allocation2 + $0x50] sm:$0xff] }
 0x143   : > { %462 = vst.msk [vmem:[#allocation2 + $0x48] sm:$0xff] %vm454_vm1, %v3681_v23  ;;  %460 = vst.msk [vmem:[#allocation2 + $0x30] sm:$0xff] %vm454_vm1, %v3683_v24  ;;  %v3761_v18 = vpack.c.bf16 %v712_v17, %v709_v16  ;;  %v3161_v24 = vld [vmem:[%s4569_s1 + $0x4] ss:$12 sps:$4 sm:$0xff]  }
 0x144   : > { %1403 = vmatprep.mubr.bf16.mxu1 %v3161_v24  ;;  %1297 = vmatprep.mubr.bf16.mxu0 %v3161_v24 }
 0x145   : > { %v684_v19 = vpop.permute.xlu1 %683  ;;  %v682_v20 = vpop.permute.xlu0 %681  ;;  %1267 = vmatprep.subr.bf16.mxu0 %v3761_v18 }
 0x146   : > { %693 = vst.msk [vmem:[#allocation2 + $0x58] sm:$0xff] %vm689_vm2, %v684_v19  ;;  %692 = vst.msk [vmem:[#allocation2 + $0x40] sm:$0xff] %vm689_vm2, %v682_v20 }
 0x14a   : > { %v733_v21 = vld [vmem:[#allocation2 + $0x30] sm:$0xff]  ;;  %v736_v22 = vld [vmem:[#allocation2 + $0x48] sm:$0xff] }
 0x14b   : > { %v742_v25 = vpack.c.bf16 %v736_v22, %v733_v21 }
 0x14d   : > { %v713_v26 = vld [vmem:[#allocation2 + $0x58] sm:$0xff]  ;;  %v710_v27 = vld [vmem:[#allocation2 + $0x40] sm:$0xff]  ;;  %757 = vrot.lane.b32.xlu1 %v742_v25, %s3328_s7  ;;  %1268 = vmatpush1.bf16.msra.mxu0 %v742_v25 }
 0x14e   : > { %v719_v23 = vpack.c.bf16 %v713_v26, %v710_v27 }
 0x150   : > { %761 = vrot.lane.b32.xlu0 %v719_v23, %s3328_s7  ;;  %726 = vst.msk [vmem:[#allocation4 + $0x28] sm:$0xff] %vm722_vm3, %v719_v23 }
 0x151   : > { %759 = vrot.lane.b32.xlu1 %v3761_v18, %s3328_s7 }
 0x154   : > { %751 = vrot.lane.b32.xlu0 %v3726_v58, %s3328_s7 }
 0x155   : > { %812 = vrot.lane.b32.xlu1 %v3761_v18, %s3329_s15 }
 0x157   : > { %v1156_v21 = vld [vmem:[#allocation4 + $0x28] sm:$0xff] }
 0x158   : > { %753 = vrot.lane.b32.xlu0 %v3713_v49, %s3328_s7 }
 0x159   : > { %810 = vrot.lane.b32.xlu1 %v742_v25, %s3329_s15 }
 0x15c   : > { %806 = vrot.lane.b32.xlu0 %v3713_v49, %s3329_s15 }
 0x15d   : > { %861 = vrot.lane.b32.xlu1 %v3731_v1, %s3330_s10 }
 0x160   : > { %804 = vrot.lane.b32.xlu0 %v3726_v58, %s3329_s15 }
 0x161   : > { %865 = vrot.lane.b32.xlu1 %v3761_v18, %s3330_s10 }
 0x164   : > { %814 = vrot.lane.b32.xlu0 %v719_v23, %s3329_s15 }
 0x165   : > { %863 = vrot.lane.b32.xlu1 %v742_v25, %s3330_s10 }
 0x168   : > { %859 = vrot.lane.b32.xlu0 %v3713_v49, %s3330_s10 }
 0x169   : > { %914 = vrot.lane.b32.xlu1 %v3731_v1, %s3331_s29 }
 0x16c   : > { %857 = vrot.lane.b32.xlu0 %v3726_v58, %s3330_s10 }
 0x16d   : > { %918 = vrot.lane.b32.xlu1 %v3761_v18, %s3331_s29 }
 0x170   : > { %867 = vrot.lane.b32.xlu0 %v719_v23, %s3330_s10 }
 0x171   : > { %916 = vrot.lane.b32.xlu1 %v742_v25, %s3331_s29 }
 0x174   : > { %912 = vrot.lane.b32.xlu0 %v3713_v49, %s3331_s29 }
 0x175   : > { %967 = vrot.lane.b32.xlu1 %v3731_v1, %s4582_s13 }
 0x178   : > { %910 = vrot.lane.b32.xlu0 %v3726_v58, %s3331_s29 }
 0x179   : > { %971 = vrot.lane.b32.xlu1 %v3761_v18, %s4582_s13 }
 0x17c   : > { %920 = vrot.lane.b32.xlu0 %v719_v23, %s3331_s29 }
 0x17d   : > { %969 = vrot.lane.b32.xlu1 %v742_v25, %s4582_s13 }
 0x180   : > { %965 = vrot.lane.b32.xlu0 %v3713_v49, %s4582_s13 }
 0x181   : > { %1020 = vrot.lane.b32.xlu1 %v3731_v1, %s4580_s28 }
 0x184   : > { %963 = vrot.lane.b32.xlu0 %v3726_v58, %s4582_s13 }
 0x185   : > { %1024 = vrot.lane.b32.xlu1 %v3761_v18, %s4580_s28 }
 0x188   : > { %973 = vrot.lane.b32.xlu0 %v719_v23, %s4582_s13  ;;  %s3345_s13 = smov 112  }
 0x189   : > { %1022 = vrot.lane.b32.xlu1 %v742_v25, %s4580_s28 }
 0x18c   : > { %1018 = vrot.lane.b32.xlu0 %v3713_v49, %s4580_s28 }
 0x18d   : > { %1073 = vrot.lane.b32.xlu1 %v3731_v1, %s4578_s16 }
 0x190   : > { %1016 = vrot.lane.b32.xlu0 %v3726_v58, %s4580_s28 }
 0x191   : > { %1077 = vrot.lane.b32.xlu1 %v3761_v18, %s4578_s16 }
 0x194   : > { %1026 = vrot.lane.b32.xlu0 %v719_v23, %s4580_s28  ;;  %s4615_s28 = smov 91  }
 0x195   : > { %1075 = vrot.lane.b32.xlu1 %v742_v25, %s4578_s16 }
 0x198   : > { %1071 = vrot.lane.b32.xlu0 %v3713_v49, %s4578_s16 }
 0x199   : > { %1126 = vrot.lane.b32.xlu1 %v3731_v1, %s3335_s24 }
 0x19a   : > { %v756_v28 = vpop.permute.xlu1 %755 }
 0x19b   : > { %776 = vst.msk [vmem:[#allocation4 + $0x40] sm:$0xff] %vm722_vm3, %v756_v28 }
 0x19c   : > { %1069 = vrot.lane.b32.xlu0 %v3726_v58, %s4578_s16 }
 0x19d   : > { %1130 = vrot.lane.b32.xlu1 %v3761_v18, %s3335_s24 }
 0x19e   : > { %v809_v29 = vpop.permute.xlu1 %808 }
 0x19f   : > { %829 = vst.msk [vmem:[#allocation4 + $0x70] sm:$0xff] %vm722_vm3, %v809_v29 }
 0x1a0   : > { %1079 = vrot.lane.b32.xlu0 %v719_v23, %s4578_s16  ;;  %s3339_s16 = smov 124  }
 0x1a1   : > { %1128 = vrot.lane.b32.xlu1 %v742_v25, %s3335_s24 }
 0x1a4   : > { %1124 = vrot.lane.b32.xlu0 %v3713_v49, %s3335_s24 }
 0x1a5   : > { %1216 = vperm.xlu1 %3158, %v1206_v32  }
 0x1a8   : > { %1122 = vrot.lane.b32.xlu0 %v3726_v58, %s3335_s24 }
 0x1a9   : > { %1221 = vperm.xlu1 %3158, %v1207_v33  }
 0x1ac   : > { %1132 = vrot.lane.b32.xlu0 %v719_v23, %s3335_s24  ;;  %v1159_v23 = vld [vmem:[#allocation4 + $0x40] sm:$0xff] }
 0x1b0   : > { %1211 = vperm.xlu0 %3157, %v1205_v31  }
 0x1b4   : > { %1226 = vperm.xlu0 %3157, %v1208_v34  }
 0x1bf   : > { %v758_v35 = vpop.permute.xlu1 %757 }
 0x1c2   : > { %v762_v36 = vpop.permute.xlu0 %761 }
 0x1c3   : > { %779 = vst.msk [vmem:[#allocation4 + $0x58] sm:$0xff] %vm722_vm3, %v762_v36  ;;  %v760_v37 = vpop.permute.xlu1 %759 }
 0x1c4   : > { %v767_v44 = vsel %vm763_vm4, %v760_v37, %v762_v36  ;;  %v766_v47 = vsel %vm763_vm4, %v758_v35, %v760_v37 }
 0x1c6   : > { %v752_v38 = vpop.permute.xlu0 %751 }
 0x1c7   : > { %v813_v39 = vpop.permute.xlu1 %812 }
 0x1ca   : > { %v754_v40 = vpop.permute.xlu0 %753  ;;  %v1162_v36 = vld [vmem:[#allocation4 + $0x58] sm:$0xff] }
 0x1cb   : > { %v764_v41 = vsel %vm763_vm4, %v752_v38, %v754_v40  ;;  %v765_v42 = vsel %vm763_vm4, %v754_v40, %v756_v28  ;;  %v811_v43 = vpop.permute.xlu1 %810 }
 0x1cc   : > { %1269 = vmatprep.subr.bf16.mxu0 %v765_v42  ;;  %v819_v55 = vsel %vm816_vm5, %v811_v43, %v813_v39 }
 0x1cd   : > { %1270 = vmatpush1.bf16.msra.mxu0 %v764_v41  ;;  %v1165_v41 = vld [vmem:[#allocation4 + $0x70] sm:$0xff] }
 0x1ce   : > { %v807_v45 = vpop.permute.xlu0 %806  ;;  %1271 = vmatprep.subr.bf16.mxu0 %v767_v44 }
 0x1cf   : > { %v862_v46 = vpop.permute.xlu1 %861  ;;  %v818_v48 = vsel %vm816_vm5, %v807_v45, %v809_v29 }
 0x1d0   : > { %882 = vst.msk [vmem:[#allocation4 + $0xa0] sm:$0xff] %vm722_vm3, %v862_v46 }
 0x1d1   : > { %1272 = vmatpush1.bf16.msra.mxu0 %v766_v47 }
 0x1d2   : > { %v805_v49 = vpop.permute.xlu0 %804  ;;  %1273 = vmatprep.subr.bf16.mxu0 %v818_v48 }
 0x1d3   : > { %v817_v50 = vsel %vm816_vm5, %v805_v49, %v807_v45  ;;  %v866_v51 = vpop.permute.xlu1 %865 }
 0x1d5   : > { %1274 = vmatpush1.bf16.msra.mxu0 %v817_v50 }
 0x1d6   : > { %v815_v52 = vpop.permute.xlu0 %814 }
 0x1d7   : > { %v820_v53 = vsel %vm816_vm5, %v813_v39, %v815_v52  ;;  %832 = vst.msk [vmem:[#allocation4 + $0x88] sm:$0xff] %vm722_vm3, %v815_v52  ;;  %v864_v54 = vpop.permute.xlu1 %863 }
 0x1d8   : > { %1275 = vmatprep.subr.bf16.mxu0 %v820_v53  ;;  %v872_v2 = vsel %vm869_vm6, %v864_v54, %v866_v51  ;;  %v1171_v53 = vld [vmem:[#allocation4 + $0xa0] sm:$0xff] }
 0x1d9   : > { %1276 = vmatpush1.bf16.msra.mxu0 %v819_v55  ;;  %v3159_v55 = vld [vmem:[%s4569_s1] ss:$12 sps:$4 sm:$0xff]  }
 0x1da   : > { %v860_v56 = vpop.permute.xlu0 %859 }
 0x1db   : > { %v871_v57 = vsel %vm869_vm6, %v860_v56, %v862_v46  ;;  %v915_v58 = vpop.permute.xlu1 %914 }
 0x1dc   : > { %935 = vst.msk [vmem:[#allocation4 + $0xd0] sm:$0xff] %vm722_vm3, %v915_v58  ;;  %1277 = vmatprep.subr.bf16.mxu0 %v871_v57 }
 0x1de   : > { %v858_v59 = vpop.permute.xlu0 %857  ;;  %v1168_v49 = vld [vmem:[#allocation4 + $0x88] sm:$0xff] }
 0x1df   : > { %v870_v60 = vsel %vm869_vm6, %v858_v59, %v860_v56  ;;  %v919_v61 = vpop.permute.xlu1 %918  ;;  %v3162_v56 = vld [vmem:[%s4569_s1 + $0x1c] ss:$12 sps:$4 sm:$0xff]  }
 0x1e0   : > { %1278 = vmatpush1.bf16.msra.mxu0 %v870_v60 }
 0x1e2   : > { %v868_v62 = vpop.permute.xlu0 %867 }
 0x1e3   : > { %v873_v63 = vsel %vm869_vm6, %v866_v51, %v868_v62  ;;  %885 = vst.msk [vmem:[#allocation4 + $0xb8] sm:$0xff] %vm722_vm3, %v868_v62  ;;  %v917_v0 = vpop.permute.xlu1 %916  ;;  %v1177_v1 = vld [vmem:[#allocation4 + $0xd0] sm:$0xff] }
 0x1e4   : > { %2938 = vmatprep.subr.bf16.mxu1 %v1177_v1  ;;  %1279 = vmatprep.subr.bf16.mxu0 %v873_v63  ;;  %v925_v13 = vsel %vm922_vm7, %v917_v0, %v919_v61  ;;  %v3164_v1 = vld [vmem:[%s4569_s1 + $0x18] ss:$12 sps:$4 sm:$0xff]  }
 0x1e5   : > { %2939 = vmatpush3.bf16.msra.mxu1 %v1153_v3  ;;  %1280 = vmatpush1.bf16.msra.mxu0 %v872_v2 }
 0x1e6   : > { %v913_v4 = vpop.permute.xlu0 %912 }
 0x1e7   : > { %v924_v5 = vsel %vm922_vm7, %v913_v4, %v915_v58  ;;  %v968_v6 = vpop.permute.xlu1 %967 }
 0x1e8   : > { %988 = vst.msk [vmem:[#allocation4 + $0x100] sm:$0xff] %vm722_vm3, %v968_v6  ;;  %1281 = vmatprep.subr.bf16.mxu0 %v924_v5 }
 0x1ea   : > { %v911_v7 = vpop.permute.xlu0 %910  ;;  %v1174_v63 = vld [vmem:[#allocation4 + $0xb8] sm:$0xff] }
 0x1eb   : > { %v923_v8 = vsel %vm922_vm7, %v911_v7, %v913_v4  ;;  %v972_v9 = vpop.permute.xlu1 %971 }
 0x1ec   : > { %1282 = vmatpush1.bf16.msra.mxu0 %v923_v8  ;;  %v3166_v8 = vld [vmem:[%s4569_s1 + $0x20] ss:$12 sps:$4 sm:$0xff]  }
 0x1ee   : > { %v921_v10 = vpop.permute.xlu0 %920 }
 0x1ef   : > { %v926_v11 = vsel %vm922_vm7, %v919_v61, %v921_v10  ;;  %938 = vst.msk [vmem:[#allocation4 + $0xe8] sm:$0xff] %vm722_vm3, %v921_v10  ;;  %v970_v12 = vpop.permute.xlu1 %969  ;;  %v1183_v22 = vld [vmem:[#allocation4 + $0x100] sm:$0xff] }
 0x1f0   : > { %1283 = vmatprep.subr.bf16.mxu0 %v926_v11  ;;  %v978_v24 = vsel %vm975_vm8, %v970_v12, %v972_v9 }
 0x1f1   : > { %1284 = vmatpush1.bf16.msra.mxu0 %v925_v13 }
 0x1f2   : > { %v966_v14 = vpop.permute.xlu0 %965 }
 0x1f3   : > { %v977_v15 = vsel %vm975_vm8, %v966_v14, %v968_v6  ;;  %v1021_v16 = vpop.permute.xlu1 %1020  ;;  %v3165_v6 = vld [vmem:[%s4569_s1 + $0x8] ss:$12 sps:$4 sm:$0xff]  }
 0x1f4   : > { %1041 = vst.msk [vmem:[#allocation4 + $0x130] sm:$0xff] %vm722_vm3, %v1021_v16  ;;  %1285 = vmatprep.subr.bf16.mxu0 %v977_v15 }
 0x1f6   : > { %v964_v17 = vpop.permute.xlu0 %963  ;;  %v1180_v18 = vld [vmem:[#allocation4 + $0xe8] sm:$0xff] }
 0x1f7   : > { %v976_v19 = vsel %vm975_vm8, %v964_v17, %v966_v14  ;;  %v1025_v20 = vpop.permute.xlu1 %1024  ;;  %2940 = vmatprep.subr.bf16.mxu1 %v1180_v18 }
 0x1f8   : > { %2941 = vmatpush3.bf16.msra.mxu1 %v1156_v21  ;;  %1286 = vmatpush1.bf16.msra.mxu0 %v976_v19 }
 0x1f9   : > { %2942 = vmatprep.subr.bf16.mxu1 %v1183_v22 }
 0x1fa   : > { %v974_v25 = vpop.permute.xlu0 %973 }
 0x1fb   : > { %v979_v26 = vsel %vm975_vm8, %v972_v9, %v974_v25  ;;  %991 = vst.msk [vmem:[#allocation4 + $0x118] sm:$0xff] %vm722_vm3, %v974_v25  ;;  %v1023_v27 = vpop.permute.xlu1 %1022  ;;  %v1189_v37 = vld [vmem:[#allocation4 + $0x130] sm:$0xff]  ;;  %v1481_v9 = vlaneseq }
 0x1fc   : > { %2943 = vmatpush3.bf16.msra.mxu1 %v1159_v23  ;;  %1287 = vmatprep.subr.bf16.mxu0 %v979_v26  ;;  %v1031_v42 = vsel %vm1028_vm9, %v1023_v27, %v1025_v20 }
 0x1fd   : > { %1288 = vmatpush1.bf16.msra.mxu0 %v978_v24  ;;  %v1482_v10 = vand.u32 127, %v1481_v9 }
 0x1fe   : > { %v1019_v28 = vpop.permute.xlu0 %1018 }
 0x1ff   : > { %v1030_v29 = vsel %vm1028_vm9, %v1019_v28, %v1021_v16  ;;  %v1074_v31 = vpop.permute.xlu1 %1073  ;;  %v1484_v11 = vadd.s32 256, %v1482_v10  ;;  %v1483_v14 = vadd.s32 128, %v1482_v10 }
 0x200   : > { %1094 = vst.msk [vmem:[#allocation4 + $0x160] sm:$0xff] %vm722_vm3, %v1074_v31  ;;  %1289 = vmatprep.subr.bf16.mxu0 %v1030_v29  ;;  %v3936_v18 = vmul.u32.u64.low 3817748708, %v1482_v10  ;;  %v3937_v19 = vmul.u32.u64.high 3817748708, %v1482_v10, %v3936_v18 }
 0x201   : > { %v3929_v12 = vmul.u32.u64.low 3817748708, %v1484_v11  ;;  %v3930_v13 = vmul.u32.u64.high 3817748708, %v1484_v11, %v3929_v12  ;;  %v3932_v15 = vmul.u32.u64.low 3817748708, %v1483_v14  ;;  %v3933_v16 = vmul.u32.u64.high 3817748708, %v1483_v14, %v3932_v15 }
 0x202   : > { %v1017_v32 = vpop.permute.xlu0 %1016  ;;  %v1186_v33 = vld [vmem:[#allocation4 + $0x118] sm:$0xff]  ;;  %v1491_v29 = vshrl.u32 %v3937_v19, 4 }
 0x203   : > { %v1029_v34 = vsel %vm1028_vm9, %v1017_v32, %v1019_v28  ;;  %v1078_v35 = vpop.permute.xlu1 %1077  ;;  %2944 = vmatprep.subr.bf16.mxu1 %v1186_v33  ;;  %v1513_v17 = vshrl.u32 %v3930_v13, 4  ;;  %v1502_v24 = vshrl.u32 %v3933_v16, 4 }
 0x204   : > { %2945 = vmatpush3.bf16.msra.mxu1 %v1162_v36  ;;  %1290 = vmatpush1.bf16.msra.mxu0 %v1029_v34  ;;  %v1492_v36 = vmul.u32 18, %v1491_v29 }
 0x205   : > { %2946 = vmatprep.subr.bf16.mxu1 %v1189_v37  ;;  %v1514_v22 = vmul.u32 18, %v1513_v17  ;;  %v1503_v33 = vmul.u32 18, %v1502_v24 }
 0x206   : > { %v1027_v38 = vpop.permute.xlu0 %1026 }
 0x207   : > { %v1032_v39 = vsel %vm1028_vm9, %v1025_v20, %v1027_v38  ;;  %1044 = vst.msk [vmem:[#allocation4 + $0x148] sm:$0xff] %vm722_vm3, %v1027_v38  ;;  %v1076_v40 = vpop.permute.xlu1 %1075  ;;  %v1195_v50 = vld [vmem:[#allocation4 + $0x160] sm:$0xff]  ;;  %v1515_v28 = vsub.s32 %v1484_v11, %v1514_v22 }
 0x208   : > { %2947 = vmatpush3.bf16.msra.mxu1 %v1165_v41  ;;  %1291 = vmatprep.subr.bf16.mxu0 %v1032_v39  ;;  %v1084_v54 = vsel %vm1081_vm10, %v1076_v40, %v1078_v35 }
 0x209   : > { %1292 = vmatpush1.bf16.msra.mxu0 %v1031_v42  ;;  %vm1520_vm12 = vcmp.ne.s32.totalorder %v1515_v28, 0  ;;  %vm1523_vm13 = vcmp.lt.s32.totalorder %v1515_v28, 0  ;;  %v1529_v41 = vadd.s32 18, %v1515_v28 }
 0x20a   : > { %v1072_v43 = vpop.permute.xlu0 %1071  ;;  %vm3943_vm14 = vmand %vm1523_vm13, %vm1520_vm12 }
 0x20b   : > { %v1083_v44 = vsel %vm1081_vm10, %v1072_v43, %v1074_v31  ;;  %v1127_v45 = vpop.permute.xlu1 %1126 }
 0x20c   : > { %1147 = vst.msk [vmem:[#allocation4 + $0x190] sm:$0xff] %vm722_vm3, %v1127_v45  ;;  %1293 = vmatprep.subr.bf16.mxu0 %v1083_v44 }
 0x20e   : > { %v1070_v46 = vpop.permute.xlu0 %1069  ;;  %v1192_v47 = vld [vmem:[#allocation4 + $0x148] sm:$0xff] }
 0x20f   : > { %v1082_v48 = vsel %vm1081_vm10, %v1070_v46, %v1072_v43  ;;  %2948 = vmatprep.subr.bf16.mxu1 %v1192_v47  ;;  %v1131_v59 = vpop.permute.xlu1 %1130  ;;  %v1504_v46 = vsub.s32 %v1483_v14, %v1503_v33 }
 0x210   : > { %2949 = vmatpush3.bf16.msra.mxu1 %v1168_v49  ;;  %1294 = vmatpush1.bf16.msra.mxu0 %v1082_v48  ;;  %v1493_v48 = vsub.s32 %v1482_v10, %v1492_v36 }
 0x211   : > { %2950 = vmatprep.subr.bf16.mxu1 %v1195_v50  ;;  %vm1519_vm15 = vcmp.ne.s32.totalorder %v1504_v46, 0  ;;  %vm1522_vm0 = vcmp.lt.s32.totalorder %v1504_v46, 0 }
 0x212   : > { %v1080_v51 = vpop.permute.xlu0 %1079  ;;  %vm1518_vm1 = vcmp.ne.s32.totalorder %v1493_v48, 0  ;;  %vm1521_vm2 = vcmp.lt.s32.totalorder %v1493_v48, 0  ;;  %vm3955_vm13 = vmand %vm1522_vm0, %vm1519_vm15 }
 0x213   : > { %v1085_v52 = vsel %vm1081_vm10, %v1078_v35, %v1080_v51  ;;  %1097 = vst.msk [vmem:[#allocation4 + $0x178] sm:$0xff] %vm722_vm3, %v1080_v51  ;;  %v1201_v0 = vld [vmem:[#allocation4 + $0x190] sm:$0xff]  ;;  %v1129_v2 = vpop.permute.xlu1 %1128 }
 0x214   : > { %2951 = vmatpush3.bf16.msra.mxu1 %v1171_v53  ;;  %1295 = vmatprep.subr.bf16.mxu0 %v1085_v52  ;;  %v1137_v5 = vsel %vm1134_vm11, %v1129_v2, %v1131_v59  ;;  %v1532_v52 = vsel %vm3943_vm14, %v1529_v41, %v1515_v28  ;;  %vm3961_vm14 = vmand %vm1521_vm2, %vm1518_vm1  ;;  %vm1584_vm1 = vcmask 154624   ;;  %vm1608_vm2 = vcmask 416768  }
 0x215   : > { %1296 = vmatpush1.bf16.msra.mxu0 %v1084_v54  ;;  %vm3949_vm12 = vcmp.lt.s32.totalorder %v1532_v52, 16 }
 0x216   : > { %v1125_v57 = vpop.permute.xlu0 %1124 }
 0x217   : > { %v1136_v58 = vsel %vm1134_vm11, %v1125_v57, %v1127_v45 }
 0x218   : > { %1298 = vmatmul.mubr.bf16.vlgmr.msra.gmra.mrb[0].mxu0 %v3159_v55  ;;  %1318 = vmatprep.subr.bf16.mxu0 %v1136_v58 }
 0x219   : > { %1307 = vmatprep.mubr.bf16.mxu0 %v3162_v56 }
 0x21a   : > { %v1123_v60 = vpop.permute.xlu0 %1122  ;;  %v1198_v61 = vld [vmem:[#allocation4 + $0x178] sm:$0xff] }
 0x21b   : > { %v1135_v62 = vsel %vm1134_vm11, %v1123_v60, %v1125_v57  ;;  %2952 = vmatprep.subr.bf16.mxu1 %v1198_v61  ;;  %v1528_v60 = vadd.s32 18, %v1504_v46 }
 0x21c   : > { %2953 = vmatpush3.bf16.msra.mxu1 %v1174_v63  ;;  %1319 = vmatpush1.bf16.msra.mxu0 %v1135_v62 }
 0x21d   : > { %3002 = vmatprep.subr.bf16.mxu1 %v1201_v0  ;;  %v1531_v14 = vsel %vm3955_vm13, %v1528_v60, %v1504_v46  ;;  %vm1605_vm13 = vcmask 1047704  }
 0x21e   : > { %v1133_v3 = vpop.permute.xlu0 %1132  ;;  %vm3977_vm15 = vcmp.lt.s32.totalorder %v1531_v14, 16 }
 0x21f   : > { %v1138_v4 = vsel %vm1134_vm11, %v1131_v59, %v1133_v3  ;;  %1150 = vst.msk [vmem:[#allocation4 + $0x1a8] sm:$0xff] %vm722_vm3, %v1133_v3  ;;  %1404 = vmatmul.mubr.bf16.vlgmr.msra.gmra.mrb[0].mxu1 %v3159_v55 }
 0x220   : > { %3003 = vmatpush3.bf16.msra.mxu1 %v1201_v0  ;;  %1411 = vmatprep.mubr.bf16.mxu1 %v3162_v56 }
 0x221   : > { %1308 = vmatmul.mubr.bf16.gmra.mrb[4].mxu0 %v3164_v1  ;;  %1320 = vmatprep.subr.bf16.mxu0 %v1138_v4 }
 0x222   : > { %1321 = vmatpush1.bf16.msra.mxu0 %v1137_v5  ;;  %1350 = vmatprep.mubr.bf16.mxu0 %v3336_v30 }
 0x224   : > { %v3941_v31 = vpop.permute.xlu1 %1216 }
 0x226   : > { %v1204_v7 = vld [vmem:[#allocation4 + $0x1a8] sm:$0xff] }
 0x227   : > { %1412 = vmatmul.mubr.bf16.gmra.mrb[4].mxu1 %v3164_v1  ;;  %3004 = vmatprep.subr.bf16.mxu1 %v1204_v7  ;;  %v1527_v1 = vadd.s32 18, %v1493_v48 }
 0x228   : > { %3005 = vmatpush3.bf16.msra.mxu1 %v1204_v7  ;;  %3006 = vmatprep.mubr.msk.bf16.mxu1 %vm722_vm3, %v3165_v6  ;;  %v1222_v43 = vpop.permute.xlu1 %1221 }
 0x229   : > { %2917 = vmatmul.mubr.msk.bf16.vlgmr.msra.gmra.mrb[0].mxu0 %vm722_vm3, %v3165_v6  ;;  %v1530_v16 = vsel %vm3961_vm14, %v1527_v1, %v1493_v48 }
 0x22a   : > { %1360 = vmatprep.mubr.bf16.mxu0 %v3336_v30  ;;  %vm3983_vm0 = vcmp.lt.s32.totalorder %v1530_v16, 16  ;;  %v3169_v16 = vld [vmem:[#allocation8 + $0x4] ss:$12 sps:$4 sm:$0xff]  }
 0x22f   : > { %3007 = vmatmul.mubr.msk.bf16.vlgmr.msra.gmra.mrb[8].mxu1 %vm722_vm3, %v3166_v8  ;;  %v1212_v34 = vpop.permute.xlu0 %1211 }
 0x230   : > { %2213 = vmatprep.mubr.bf16.mxu1 %v3169_v16 }
 0x231   : > { %2918 = vmatmul.mubr.msk.bf16.gmra.mrb[4].mxu0 %vm722_vm3, %v3166_v8 }
 0x232   : > { %2319 = vmatprep.mubr.bf16.mxu0 %v3169_v16 }
 0x233   : > { %v1227_v50 = vpop.permute.xlu0 %1226 }
 0x2f2   : > { %v2954_v20 = vpop.f32.mrb[0].mxu1 }
 0x2f3   : > { %v2955_v21 = vpop.f32.mrb[1].mxu1 }
 0x2f4   : > { %v2956_v25 = vadd.f32 %v2955_v21, %v2954_v20  ;;  %v2957_v26 = vpop.f32.mrb[2].mxu1 }
 0x2f5   : > { %v2958_v27 = vpop.f32.mrb[3].mxu1 }
 0x2f6   : > { %v2959_v23 = vadd.f32 %v2958_v27, %v2957_v26  ;;  %v1406_v54 = vadd.f32 %v2956_v25, %v1212_v34 }
 0x2f8   : > { %v1409_v62 = vadd.f32 %v2959_v23, %v3941_v31 }
 0x2fa   : > { %v2960_v32 = vpop.f32.mrb[4].mxu1 }
 0x2fb   : > { %v2961_v35 = vpop.f32.mrb[5].mxu1 }
 0x2fc   : > { %v2962_v37 = vadd.f32 %v2961_v35, %v2960_v32  ;;  %v2963_v38 = vpop.f32.mrb[6].mxu1  ;;  %v1352_v39 = vpop.f32.mrb[0].mxu0 }
 0x2fd   : > { %v2964_v40 = vpop.f32.mrb[7].mxu1  ;;  %v1354_v42 = vpop.f32.mrb[1].mxu0  ;;  %v3018_v11 = vadd.f32 %v1352_v39, %v1212_v34 }
 0x2fe   : > { %v2965_v44 = vadd.f32 %v2964_v40, %v2963_v38  ;;  %v1356_v47 = vpop.f32.mrb[2].mxu0  ;;  %v1414_v51 = vadd.f32 %v2962_v37, %v1222_v43  ;;  %v3019_v7 = vadd.f32 %v1354_v42, %v1212_v34 }
 0x2ff   : > { %v1358_v49 = vpop.f32.mrb[3].mxu0  ;;  %v3020_v18 = vadd.f32 %v1356_v47, %v3941_v31  ;;  %v1469_v20 = vmax.f32 %v3018_v11, 0.0 }
 0x300   : > { %v1417_v57 = vadd.f32 %v2965_v44, %v1227_v50  ;;  %v1470_v17 = vmax.f32 %v3019_v7, 0.0  ;;  %v3021_v25 = vadd.f32 %v1358_v49, %v3941_v31 }
 0x301   : > { %v1472_v23 = vmax.f32 %v3020_v18, 0.0  ;;  %v1536_v28 = vsel %vm3983_vm0, %v1469_v20, 0.0  ;;  %v2122_v18 = vld [vmem:[%s4572_s4 + $0x8] sm:$0xff]  ;;  %v2124_v20 = vld [vmem:[%s4572_s4 + $0x18] sm:$0xff] }
 0x302   : > { %v3008_v53 = vpop.f32.mrb[8].mxu1  ;;  %v1537_v27 = vsel %vm3977_vm15, %v1470_v17, 0.0  ;;  %v1473_v29 = vmax.f32 %v3021_v25, 0.0  ;;  %v2121_v17 = vld [vmem:[%s4572_s4] sm:$0xff] }
 0x303   : > { %v1463_v55 = vadd.f32 %v3008_v53, %v1414_v51  ;;  %v1454_v56 = vpop.f32.mrb[9].mxu1  ;;  %v1539_v31 = vsel %vm3983_vm0, %v1472_v23, 0.0 }
 0x304   : > { %v1455_v59 = vadd.f32 %v1454_v56, %v1406_v54  ;;  %v3009_v61 = vpop.f32.mrb[10].mxu1  ;;  %v1362_v63 = vpop.f32.mrb[4].mxu0  ;;  %v1540_v35 = vsel %vm3977_vm15, %v1473_v29, 0.0 }
 0x305   : > { %v1477_v0 = vmax.f32 %v1463_v55, 0.0  ;;  %v1466_v3 = vadd.f32 %v3009_v61, %v1417_v57  ;;  %v1457_v4 = vpop.f32.mrb[11].mxu1  ;;  %v1364_v5 = vpop.f32.mrb[5].mxu0  ;;  %v3022_v32 = vadd.f32 %v1362_v63, %v1222_v43 }
 0x306   : > { %v1458_v8 = vadd.f32 %v1457_v4, %v1409_v62  ;;  %v1366_v9 = vpop.f32.mrb[6].mxu0  ;;  %v1471_v12 = vmax.f32 %v1455_v59, 0.0  ;;  %v3023_v24 = vadd.f32 %v1364_v5, %v1222_v43 }
 0x307   : > { %v1544_v10 = vsel %vm3949_vm12, %v1477_v0, 0.0  ;;  %v1368_v13 = vpop.f32.mrb[7].mxu0  ;;  %v3024_v34 = vadd.f32 %v1366_v9, %v1227_v50  ;;  %v1475_v36 = vmax.f32 %v3022_v32, 0.0  ;;  %v1480_v42 = vmax.f32 %v1466_v3, 0.0 }
 0x308   : > { %v1474_v15 = vmax.f32 %v1458_v8, 0.0  ;;  %1576 = vrot.lane.b32.xlu1 %v1544_v10, %s3314_s14  ;;  %v1538_v21 = vsel %vm3949_vm12, %v1471_v12, 0.0  ;;  %v1476_v33 = vmax.f32 %v3023_v24, 0.0  ;;  %v3025_v37 = vadd.f32 %v1368_v13, %v1227_v50 }
 0x309   : > { %v1478_v39 = vmax.f32 %v3024_v34, 0.0  ;;  %v1542_v40 = vsel %vm3983_vm0, %v1475_v36, 0.0  ;;  %v1547_v45 = vsel %vm3949_vm12, %v1480_v42, 0.0 }
 0x30a   : > { %v1541_v19 = vsel %vm3949_vm12, %v1474_v15, 0.0  ;;  %v1543_v38 = vsel %vm3977_vm15, %v1476_v33, 0.0  ;;  %v1479_v41 = vmax.f32 %v3025_v37, 0.0  ;;  %vm2762_vm12 = vcmask 818176  }
 0x30b   : > { %1570 = vrot.lane.b32.xlu0 %v1541_v19, %s3314_s14  ;;  %v1545_v43 = vsel %vm3983_vm0, %v1478_v39, 0.0  ;;  %v2123_v19 = vld [vmem:[%s4572_s4 + $0x10] sm:$0xff] }
 0x30c   : > { %1564 = vrot.lane.b32.xlu1 %v1538_v21, %s3314_s14  ;;  %v1546_v44 = vsel %vm3977_vm15, %v1479_v41, 0.0 }
 0x30f   : > { %1562 = vrot.lane.b32.xlu0 %v1537_v27, %s3314_s14 }
 0x310   : > { %1560 = vrot.lane.b32.xlu1 %v1536_v28, %s3314_s14 }
 0x313   : > { %1566 = vrot.lane.b32.xlu0 %v1539_v31, %s3314_s14 }
 0x314   : > { %1568 = vrot.lane.b32.xlu1 %v1540_v35, %s3314_s14 }
 0x317   : > { %1574 = vrot.lane.b32.xlu0 %v1543_v38, %s3314_s14 }
 0x318   : > { %1572 = vrot.lane.b32.xlu1 %v1542_v40, %s3314_s14 }
 0x31b   : > { %1578 = vrot.lane.b32.xlu0 %v1545_v43, %s3314_s14 }
 0x31c   : > { %1580 = vrot.lane.b32.xlu1 %v1546_v44, %s3314_s14 }
 0x31f   : > { %1582 = vrot.lane.b32.xlu0 %v1547_v45, %s3314_s14  ;;  %s4613_s14 = smov 108  }
 0x37a   : > { %v1577_v46 = vpop.permute.xlu1 %1576 }
 0x37d   : > { %v1571_v47 = vpop.permute.xlu0 %1570 }
 0x37e   : > { %v1565_v48 = vpop.permute.xlu1 %1564 }
 0x381   : > { %v1563_v49 = vpop.permute.xlu0 %1562 }
 0x382   : > { %v1586_v50 = vsel %vm1584_vm1, %v1563_v49, %v1565_v48  ;;  %v1561_v51 = vpop.permute.xlu1 %1560 }
 0x383   : > { %1609 = vst.msk [vmem:[#allocation3 + $0x10] sm:$0xff] %vm1608_vm2, %v1586_v50  ;;  %v1585_v52 = vsel %vm1584_vm1, %v1561_v51, %v1563_v49 }
 0x384   : > { %1606 = vst.msk [vmem:[#allocation3] sm:$0xff] %vm1605_vm13, %v1561_v51 }
 0x385   : > { %v1567_v53 = vpop.permute.xlu0 %1566 }
 0x386   : > { %1610 = vst.msk [vmem:[#allocation3 + $0x18] sm:$0xff] %vm1605_vm13, %v1567_v53  ;;  %v1569_v54 = vpop.permute.xlu1 %1568 }
 0x387   : > { %v1587_v55 = vsel %vm1584_vm1, %v1567_v53, %v1569_v54  ;;  %v1588_v56 = vsel %vm1584_vm1, %v1569_v54, %v1571_v47 }
 0x388   : > { %1612 = vst.msk [vmem:[#allocation3 + $0x28] sm:$0xff] %vm1608_vm2, %v1588_v56  ;;  %v4023_v57 = vpack.c.bf16 %v1587_v55, %v1585_v52 }
 0x389   : > { %v1575_v58 = vpop.permute.xlu0 %1574 }
 0x38a   : > { %v1590_v59 = vsel %vm1584_vm1, %v1575_v58, %v1577_v46  ;;  %v1573_v60 = vpop.permute.xlu1 %1572  ;;  %2181 = vmatprep.subr.bf16.mxu1 %v4023_v57  ;;  %v1629_v3 = vld [vmem:[#allocation3 + $0x10] sm:$0xff] }
 0x38b   : > { %1615 = vst.msk [vmem:[#allocation3 + $0x40] sm:$0xff] %vm1608_vm2, %v1590_v59  ;;  %v1589_v61 = vsel %vm1584_vm1, %v1573_v60, %v1575_v58  ;;  %v1627_v62 = vld [vmem:[#allocation3] sm:$0xff] }
 0x38c   : > { %1613 = vst.msk [vmem:[#allocation3 + $0x30] sm:$0xff] %vm1605_vm13, %v1573_v60 }
 0x38d   : > { %v1630_v63 = vld [vmem:[#allocation3 + $0x18] sm:$0xff]  ;;  %v1579_v0 = vpop.permute.xlu0 %1578 }
 0x38e   : > { %v4030_v1 = vpack.c.bf16 %v1630_v63, %v1627_v62  ;;  %1616 = vst.msk [vmem:[#allocation3 + $0x48] sm:$0xff] %vm1605_vm13, %v1579_v0  ;;  %v1581_v2 = vpop.permute.xlu1 %1580 }
 0x38f   : > { %v1632_v4 = vld [vmem:[#allocation3 + $0x28] sm:$0xff]  ;;  %v1591_v5 = vsel %vm1584_vm1, %v1579_v0, %v1581_v2 }
 0x390   : > { %v1641_v6 = vpack.c.bf16 %v1632_v4, %v1629_v3  ;;  %v1643_v7 = vpack.c.bf16 %v1591_v5, %v1589_v61  ;;  %1675 = vrot.lane.b32.xlu1 %v4030_v1, %s3328_s7  ;;  %2182 = vmatpush1.bf16.msra.mxu1 %v4030_v1 }
 0x391   : > { %v1583_v8 = vpop.permute.xlu0 %1582 }
 0x392   : > { %1647 = vst.msk [vmem:[#allocation4 + $0x10] sm:$0xff] %vm722_vm3, %v1641_v6  ;;  %v1592_v9 = vsel %vm1584_vm1, %v1581_v2, %v1583_v8  ;;  %1679 = vrot.lane.b32.xlu0 %v1641_v6, %s3328_s7  ;;  %2183 = vmatprep.subr.bf16.mxu1 %v1643_v7  ;;  %v1635_v13 = vld [vmem:[#allocation3 + $0x40] sm:$0xff] }
 0x393   : > { %1618 = vst.msk [vmem:[#allocation3 + $0x58] sm:$0xff] %vm1608_vm2, %v1592_v9  ;;  %v1633_v10 = vld [vmem:[#allocation3 + $0x30] sm:$0xff] }
 0x394   : > { %1727 = vrot.lane.b32.xlu1 %v4030_v1, %s3329_s15 }
 0x395   : > { %v1636_v11 = vld [vmem:[#allocation3 + $0x48] sm:$0xff] }
 0x396   : > { %v1642_v12 = vpack.c.bf16 %v1636_v11, %v1633_v10  ;;  %1731 = vrot.lane.b32.xlu0 %v1641_v6, %s3329_s15 }
 0x398   : > { %1779 = vrot.lane.b32.xlu1 %v4030_v1, %s3330_s10  ;;  %2184 = vmatpush1.bf16.msra.mxu1 %v1642_v12 }
 0x399   : > { %v2069_v39 = vld [vmem:[#allocation4 + $0x10] sm:$0xff] }
 0x39a   : > { %v1638_v14 = vld [vmem:[#allocation3 + $0x58] sm:$0xff]  ;;  %1783 = vrot.lane.b32.xlu0 %v1641_v6, %s3330_s10 }
 0x39b   : > { %v1644_v15 = vpack.c.bf16 %v1638_v14, %v1635_v13 }
 0x39c   : > { %1831 = vrot.lane.b32.xlu1 %v4030_v1, %s3331_s29 }
 0x39d   : > { %1650 = vst.msk [vmem:[#allocation4 + $0x28] sm:$0xff] %vm722_vm3, %v1644_v15 }
 0x39e   : > { %1835 = vrot.lane.b32.xlu0 %v1641_v6, %s3331_s29 }
 0x3a0   : > { %1677 = vrot.lane.b32.xlu1 %v4023_v57, %s3328_s7 }
 0x3a2   : > { %1681 = vrot.lane.b32.xlu0 %v1642_v12, %s3328_s7 }
 0x3a4   : > { %1729 = vrot.lane.b32.xlu1 %v4023_v57, %s3329_s15  ;;  %v2072_v16 = vld [vmem:[#allocation4 + $0x28] sm:$0xff] }
 0x3a6   : > { %1733 = vrot.lane.b32.xlu0 %v1642_v12, %s3329_s15 }
 0x3a8   : > { %1781 = vrot.lane.b32.xlu1 %v4023_v57, %s3330_s10 }
 0x3aa   : > { %1785 = vrot.lane.b32.xlu0 %v1642_v12, %s3330_s10 }
 0x3ac   : > { %1833 = vrot.lane.b32.xlu1 %v4023_v57, %s3331_s29 }
 0x3ae   : > { %1683 = vrot.lane.b32.xlu0 %v1643_v7, %s3328_s7 }
 0x3b0   : > { %1685 = vrot.lane.b32.xlu1 %v1644_v15, %s3328_s7  ;;  %s4614_s7 = smov 92  }
 0x3b2   : > { %1837 = vrot.lane.b32.xlu0 %v1642_v12, %s3331_s29 }
 0x3b4   : > { %1885 = vrot.lane.b32.xlu1 %v4023_v57, %s4613_s14 }
 0x3b6   : > { %1735 = vrot.lane.b32.xlu0 %v1643_v7, %s3329_s15 }
 0x3b8   : > { %1737 = vrot.lane.b32.xlu1 %v1644_v15, %s3329_s15 }
 0x3ba   : > { %1887 = vrot.lane.b32.xlu0 %v1641_v6, %s4613_s14 }
 0x3bc   : > { %1883 = vrot.lane.b32.xlu1 %v4030_v1, %s4613_s14 }
 0x3be   : > { %1787 = vrot.lane.b32.xlu0 %v1643_v7, %s3330_s10 }
 0x3c0   : > { %1789 = vrot.lane.b32.xlu1 %v1644_v15, %s3330_s10 }
 0x3c2   : > { %1889 = vrot.lane.b32.xlu0 %v1642_v12, %s4613_s14 }
 0x3c4   : > { %1937 = vrot.lane.b32.xlu1 %v4023_v57, %s4614_s7 }
 0x3c6   : > { %1839 = vrot.lane.b32.xlu0 %v1643_v7, %s3331_s29 }
 0x3c8   : > { %1841 = vrot.lane.b32.xlu1 %v1644_v15, %s3331_s29  ;;  %s4584_s29 = smov 98  }
 0x3ca   : > { %1939 = vrot.lane.b32.xlu0 %v1641_v6, %s4614_s7 }
 0x3cc   : > { %1935 = vrot.lane.b32.xlu1 %v4030_v1, %s4614_s7 }
 0x3ce   : > { %1891 = vrot.lane.b32.xlu0 %v1643_v7, %s4613_s14 }
 0x3d0   : > { %1893 = vrot.lane.b32.xlu1 %v1644_v15, %s4613_s14 }
 0x3d2   : > { %1941 = vrot.lane.b32.xlu0 %v1642_v12, %s4614_s7 }
 0x3d4   : > { %1989 = vrot.lane.b32.xlu1 %v4023_v57, %s4615_s28 }
 0x3d6   : > { %1943 = vrot.lane.b32.xlu0 %v1643_v7, %s4614_s7 }
 0x3d8   : > { %1945 = vrot.lane.b32.xlu1 %v1644_v15, %s4614_s7 }
 0x3da   : > { %1991 = vrot.lane.b32.xlu0 %v1641_v6, %s4615_s28 }
 0x3dc   : > { %1987 = vrot.lane.b32.xlu1 %v4030_v1, %s4615_s28 }
 0x3de   : > { %1995 = vrot.lane.b32.xlu0 %v1643_v7, %s4615_s28 }
 0x3e0   : > { %1997 = vrot.lane.b32.xlu1 %v1644_v15, %s4615_s28 }
 0x3e2   : > { %1993 = vrot.lane.b32.xlu0 %v1642_v12, %s4615_s28  ;;  %s4588_s28 = smov 100  }
 0x3e4   : > { %2041 = vrot.lane.b32.xlu1 %v4023_v57, %s3335_s24 }
 0x3e6   : > { %2043 = vrot.lane.b32.xlu0 %v1641_v6, %s3335_s24 }
 0x3e8   : > { %2039 = vrot.lane.b32.xlu1 %v4030_v1, %s3335_s24 }
 0x3ea   : > { %2047 = vrot.lane.b32.xlu0 %v1643_v7, %s3335_s24 }
 0x3ec   : > { %2049 = vrot.lane.b32.xlu1 %v1644_v15, %s3335_s24 }
 0x3ee   : > { %2045 = vrot.lane.b32.xlu0 %v1642_v12, %s3335_s24  ;;  %s4616_s24 = sshll.u32 %s3521_s23, 6 }
 0x3ef   : > { %s4191_s7 = scalar_lea.vmem [#allocation10], %s4616_s24  ;;  %s3346_s24 = smov 106  }
 0x3f0   : > { %2127 = vperm.xlu1 %3158, %v2121_v17  }
 0x3f2   : > { %2132 = vperm.xlu0 %3157, %v2122_v18  }
 0x3f4   : > { %2137 = vperm.xlu1 %3158, %v2123_v19  }
 0x3f6   : > { %2142 = vperm.xlu0 %3157, %v2124_v20  }
 0x402   : > { %v1676_v21 = vpop.permute.xlu1 %1675 }
 0x404   : > { %v1680_v22 = vpop.permute.xlu0 %1679 }
 0x405   : > { %1699 = vst.msk [vmem:[#allocation4 + $0x40] sm:$0xff] %vm722_vm3, %v1680_v22 }
 0x406   : > { %v1728_v25 = vpop.permute.xlu1 %1727 }
 0x408   : > { %v1732_v26 = vpop.permute.xlu0 %1731 }
 0x409   : > { %1751 = vst.msk [vmem:[#allocation4 + $0x70] sm:$0xff] %vm722_vm3, %v1732_v26 }
 0x40a   : > { %v1780_v27 = vpop.permute.xlu1 %1779 }
 0x40c   : > { %v1784_v23 = vpop.permute.xlu0 %1783  ;;  %v2075_v20 = vld [vmem:[#allocation4 + $0x40] sm:$0xff] }
 0x40d   : > { %1803 = vst.msk [vmem:[#allocation4 + $0xa0] sm:$0xff] %vm722_vm3, %v1784_v23 }
 0x40e   : > { %v1832_v24 = vpop.permute.xlu1 %1831 }
 0x410   : > { %v1836_v28 = vpop.permute.xlu0 %1835 }
 0x411   : > { %1855 = vst.msk [vmem:[#allocation4 + $0xd0] sm:$0xff] %vm722_vm3, %v1836_v28 }
 0x412   : > { %v1678_v29 = vpop.permute.xlu1 %1677 }
 0x413   : > { %v1687_v32 = vsel %vm763_vm4, %v1676_v21, %v1678_v29  ;;  %v1688_v31 = vsel %vm763_vm4, %v1678_v29, %v1680_v22 }
 0x414   : > { %v1682_v33 = vpop.permute.xlu0 %1681  ;;  %2185 = vmatprep.subr.bf16.mxu1 %v1688_v31 }
 0x415   : > { %2186 = vmatpush1.bf16.msra.mxu1 %v1687_v32 }
 0x416   : > { %v1730_v34 = vpop.permute.xlu1 %1729 }
 0x417   : > { %v1739_v35 = vsel %vm816_vm5, %v1728_v25, %v1730_v34  ;;  %v1740_v36 = vsel %vm816_vm5, %v1730_v34, %v1732_v26 }
 0x418   : > { %v1734_v37 = vpop.permute.xlu0 %1733  ;;  %v2093_v38 = vld [vmem:[#allocation4 + $0xd0] sm:$0xff] }
 0x419   : > { %2970 = vmatprep.subr.bf16.mxu0 %v2093_v38 }
 0x41a   : > { %2971 = vmatpush3.bf16.msra.mxu0 %v2069_v39  ;;  %v1782_v40 = vpop.permute.xlu1 %1781 }
 0x41b   : > { %v1791_v41 = vsel %vm869_vm6, %v1780_v27, %v1782_v40  ;;  %v1792_v42 = vsel %vm869_vm6, %v1782_v40, %v1784_v23 }
 0x41c   : > { %v1786_v43 = vpop.permute.xlu0 %1785 }
 0x41e   : > { %v1834_v44 = vpop.permute.xlu1 %1833 }
 0x41f   : > { %v1843_v45 = vsel %vm922_vm7, %v1832_v24, %v1834_v44  ;;  %v1844_v46 = vsel %vm922_vm7, %v1834_v44, %v1836_v28  ;;  %v3170_v44 = vld [vmem:[#allocation8 + $0x1c] ss:$12 sps:$4 sm:$0xff]  }
 0x420   : > { %v1684_v47 = vpop.permute.xlu0 %1683 }
 0x421   : > { %v1689_v48 = vsel %vm763_vm4, %v1682_v33, %v1684_v47  ;;  %v2081_v33 = vld [vmem:[#allocation4 + $0x70] sm:$0xff] }
 0x422   : > { %v1686_v49 = vpop.permute.xlu1 %1685 }
 0x423   : > { %v1690_v50 = vsel %vm763_vm4, %v1684_v47, %v1686_v49  ;;  %1702 = vst.msk [vmem:[#allocation4 + $0x58] sm:$0xff] %vm722_vm3, %v1686_v49  ;;  %vm2422_vm4 = vcmask 261248  }
 0x424   : > { %v1838_v51 = vpop.permute.xlu0 %1837  ;;  %2187 = vmatprep.subr.bf16.mxu1 %v1690_v50 }
 0x425   : > { %2188 = vmatpush1.bf16.msra.mxu1 %v1689_v48 }
 0x426   : > { %v1886_v52 = vpop.permute.xlu1 %1885  ;;  %2189 = vmatprep.subr.bf16.mxu1 %v1740_v36 }
 0x428   : > { %v1736_v53 = vpop.permute.xlu0 %1735 }
 0x429   : > { %v1741_v54 = vsel %vm816_vm5, %v1734_v37, %v1736_v53  ;;  %2190 = vmatpush1.bf16.msra.mxu1 %v1739_v35 }
 0x42a   : > { %v1738_v55 = vpop.permute.xlu1 %1737  ;;  %v2078_v23 = vld [vmem:[#allocation4 + $0x58] sm:$0xff] }
 0x42b   : > { %v1742_v56 = vsel %vm816_vm5, %v1736_v53, %v1738_v55  ;;  %1754 = vst.msk [vmem:[#allocation4 + $0x88] sm:$0xff] %vm722_vm3, %v1738_v55  ;;  %v3172_v53 = vld [vmem:[#allocation8 + $0x18] ss:$12 sps:$4 sm:$0xff]   ;;  %vm2447_vm5 = vcmask 392448  }
 0x42c   : > { %v1888_v57 = vpop.permute.xlu0 %1887  ;;  %2191 = vmatprep.subr.bf16.mxu1 %v1742_v56 }
 0x42d   : > { %v1896_v58 = vsel %vm975_vm8, %v1886_v52, %v1888_v57  ;;  %1907 = vst.msk [vmem:[#allocation4 + $0x100] sm:$0xff] %vm722_vm3, %v1888_v57  ;;  %2192 = vmatpush1.bf16.msra.mxu1 %v1741_v54 }
 0x42e   : > { %v1884_v59 = vpop.permute.xlu1 %1883  ;;  %2193 = vmatprep.subr.bf16.mxu1 %v1792_v42  ;;  %v3167_v42 = vld [vmem:[#allocation8] ss:$12 sps:$4 sm:$0xff]  }
 0x42f   : > { %v1895_v60 = vsel %vm975_vm8, %v1884_v59, %v1886_v52  ;;  %v3173_v59 = vld [vmem:[#allocation8 + $0x8] ss:$12 sps:$4 sm:$0xff]  }
 0x430   : > { %v1788_v61 = vpop.permute.xlu0 %1787 }
 0x431   : > { %v1793_v62 = vsel %vm869_vm6, %v1786_v43, %v1788_v61  ;;  %2194 = vmatpush1.bf16.msra.mxu1 %v1791_v41 }
 0x432   : > { %v1790_v63 = vpop.permute.xlu1 %1789  ;;  %v2084_v38 = vld [vmem:[#allocation4 + $0x88] sm:$0xff] }
 0x433   : > { %v1794_v0 = vsel %vm869_vm6, %v1788_v61, %v1790_v63  ;;  %1806 = vst.msk [vmem:[#allocation4 + $0xb8] sm:$0xff] %vm722_vm3, %v1790_v63  ;;  %v3174_v61 = vld [vmem:[#allocation8 + $0x20] ss:$12 sps:$4 sm:$0xff]   ;;  %vm2472_vm6 = vcmask 523648  }
 0x434   : > { %v1890_v1 = vpop.permute.xlu0 %1889  ;;  %2195 = vmatprep.subr.bf16.mxu1 %v1794_v0  ;;  %v2099_v18 = vld [vmem:[#allocation4 + $0x100] sm:$0xff] }
 0x435   : > { %2196 = vmatpush1.bf16.msra.mxu1 %v1793_v62 }
 0x436   : > { %v1938_v2 = vpop.permute.xlu1 %1937  ;;  %2197 = vmatprep.subr.bf16.mxu1 %v1844_v46 }
 0x438   : > { %v1840_v3 = vpop.permute.xlu0 %1839 }
 0x439   : > { %v1845_v4 = vsel %vm922_vm7, %v1838_v51, %v1840_v3  ;;  %2198 = vmatpush1.bf16.msra.mxu1 %v1843_v45  ;;  %v2087_v45 = vld [vmem:[#allocation4 + $0xa0] sm:$0xff] }
 0x43a   : > { %v1842_v5 = vpop.permute.xlu1 %1841  ;;  %v2090_v51 = vld [vmem:[#allocation4 + $0xb8] sm:$0xff] }
 0x43b   : > { %v1846_v6 = vsel %vm922_vm7, %v1840_v3, %v1842_v5  ;;  %1858 = vst.msk [vmem:[#allocation4 + $0xe8] sm:$0xff] %vm722_vm3, %v1842_v5  ;;  %vm2497_vm7 = vcmask 654848  }
 0x43c   : > { %v1940_v7 = vpop.permute.xlu0 %1939  ;;  %2199 = vmatprep.subr.bf16.mxu1 %v1846_v6 }
 0x43d   : > { %v1948_v8 = vsel %vm1028_vm9, %v1938_v2, %v1940_v7  ;;  %1959 = vst.msk [vmem:[#allocation4 + $0x130] sm:$0xff] %vm722_vm3, %v1940_v7  ;;  %2200 = vmatpush1.bf16.msra.mxu1 %v1845_v4 }
 0x43e   : > { %v1936_v9 = vpop.permute.xlu1 %1935  ;;  %2201 = vmatprep.subr.bf16.mxu1 %v1896_v58 }
 0x43f   : > { %v1947_v10 = vsel %vm1028_vm9, %v1936_v9, %v1938_v2 }
 0x440   : > { %v1892_v11 = vpop.permute.xlu0 %1891 }
 0x441   : > { %v1897_v12 = vsel %vm975_vm8, %v1890_v1, %v1892_v11  ;;  %2202 = vmatpush1.bf16.msra.mxu1 %v1895_v60 }
 0x442   : > { %v1894_v13 = vpop.permute.xlu1 %1893  ;;  %v2096_v14 = vld [vmem:[#allocation4 + $0xe8] sm:$0xff] }
 0x443   : > { %v1898_v15 = vsel %vm975_vm8, %v1892_v11, %v1894_v13  ;;  %1910 = vst.msk [vmem:[#allocation4 + $0x118] sm:$0xff] %vm722_vm3, %v1894_v13  ;;  %2972 = vmatprep.subr.bf16.mxu0 %v2096_v14  ;;  %vm2522_vm8 = vcmask 786048  }
 0x444   : > { %v1942_v17 = vpop.permute.xlu0 %1941  ;;  %2973 = vmatpush3.bf16.msra.mxu0 %v2072_v16  ;;  %2203 = vmatprep.subr.bf16.mxu1 %v1898_v15  ;;  %v2105_v28 = vld [vmem:[#allocation4 + $0x130] sm:$0xff]  ;;  %v4178_v16 = vld [vmem:[%s3527_s12 + $0x10] sm:$0xff] }
 0x445   : > { %2974 = vmatprep.subr.bf16.mxu0 %v2099_v18  ;;  %2204 = vmatpush1.bf16.msra.mxu1 %v1897_v12 }
 0x446   : > { %v1990_v19 = vpop.permute.xlu1 %1989  ;;  %2205 = vmatprep.subr.bf16.mxu1 %v1948_v8 }
 0x448   : > { %v1944_v21 = vpop.permute.xlu0 %1943  ;;  %2975 = vmatpush3.bf16.msra.mxu0 %v2075_v20 }
 0x449   : > { %v1949_v22 = vsel %vm1028_vm9, %v1942_v17, %v1944_v21  ;;  %2206 = vmatpush1.bf16.msra.mxu1 %v1947_v10  ;;  %v4174_v10 = vld [vmem:[%s3527_s12] sm:$0xff] }
 0x44a   : > { %v1946_v25 = vpop.permute.xlu1 %1945  ;;  %v2102_v26 = vld [vmem:[#allocation4 + $0x118] sm:$0xff] }
 0x44b   : > { %v1950_v27 = vsel %vm1028_vm9, %v1944_v21, %v1946_v25  ;;  %1962 = vst.msk [vmem:[#allocation4 + $0x148] sm:$0xff] %vm722_vm3, %v1946_v25  ;;  %2976 = vmatprep.subr.bf16.mxu0 %v2102_v26  ;;  %vm2547_vm9 = vcmask 917248  }
 0x44c   : > { %v1992_v24 = vpop.permute.xlu0 %1991  ;;  %2977 = vmatpush3.bf16.msra.mxu0 %v2078_v23  ;;  %2207 = vmatprep.subr.bf16.mxu1 %v1950_v27 }
 0x44d   : > { %v2000_v29 = vsel %vm1081_vm10, %v1990_v19, %v1992_v24  ;;  %2011 = vst.msk [vmem:[#allocation4 + $0x160] sm:$0xff] %vm722_vm3, %v1992_v24  ;;  %2978 = vmatprep.subr.bf16.mxu0 %v2105_v28  ;;  %2208 = vmatpush1.bf16.msra.mxu1 %v1949_v22 }
 0x44e   : > { %v1988_v32 = vpop.permute.xlu1 %1987  ;;  %2209 = vmatprep.subr.bf16.mxu1 %v2000_v29 }
 0x44f   : > { %v1999_v31 = vsel %vm1081_vm10, %v1988_v32, %v1990_v19 }
 0x450   : > { %v1996_v34 = vpop.permute.xlu0 %1995  ;;  %2979 = vmatpush3.bf16.msra.mxu0 %v2081_v33 }
 0x451   : > { %2210 = vmatpush1.bf16.msra.mxu1 %v1999_v31 }
 0x452   : > { %v1998_v35 = vpop.permute.xlu1 %1997  ;;  %v2108_v36 = vld [vmem:[#allocation4 + $0x148] sm:$0xff] }
 0x453   : > { %v2002_v37 = vsel %vm1081_vm10, %v1996_v34, %v1998_v35  ;;  %2014 = vst.msk [vmem:[#allocation4 + $0x178] sm:$0xff] %vm722_vm3, %v1998_v35  ;;  %2980 = vmatprep.subr.bf16.mxu0 %v2108_v36 }
 0x454   : > { %v1994_v39 = vpop.permute.xlu0 %1993  ;;  %2981 = vmatpush3.bf16.msra.mxu0 %v2084_v38  ;;  %v2111_v40 = vld [vmem:[#allocation4 + $0x160] sm:$0xff]  ;;  %2211 = vmatprep.subr.bf16.mxu1 %v2002_v37 }
 0x455   : > { %v2001_v41 = vsel %vm1081_vm10, %v1994_v39, %v1996_v34  ;;  %2982 = vmatprep.subr.bf16.mxu0 %v2111_v40  ;;  %v4207_v34 = vld [vmem:[%s3527_s12 + $0x20] sm:$0xff]  ;;  %vm2576_vm10 = vcmask 932864  }
 0x456   : > { %v2042_v43 = vpop.permute.xlu1 %2041  ;;  %2212 = vmatpush1.bf16.msra.mxu1 %v2001_v41  ;;  %v4218_v41 = vld [vmem:[%s3527_s12 + $0x30] sm:$0xff] }
 0x458   : > { %v2044_v46 = vpop.permute.xlu0 %2043  ;;  %2983 = vmatpush3.bf16.msra.mxu0 %v2087_v45 }
 0x459   : > { %v2052_v47 = vsel %vm1134_vm11, %v2042_v43, %v2044_v46  ;;  %2063 = vst.msk [vmem:[#allocation4 + $0x190] sm:$0xff] %vm722_vm3, %v2044_v46  ;;  %2214 = vmatmul.mubr.bf16.vlgmr.msra.gmra.mrb[12].mxu1 %v3167_v42 }
 0x45a   : > { %v2040_v48 = vpop.permute.xlu1 %2039  ;;  %v2114_v49 = vld [vmem:[#allocation4 + $0x178] sm:$0xff]  ;;  %2234 = vmatprep.subr.bf16.mxu1 %v2052_v47  ;;  %2223 = vmatprep.mubr.bf16.mxu1 %v3170_v44 }
 0x45b   : > { %v2051_v50 = vsel %vm1134_vm11, %v2040_v48, %v2042_v43  ;;  %2984 = vmatprep.subr.bf16.mxu0 %v2114_v49 }
 0x45c   : > { %v2048_v52 = vpop.permute.xlu0 %2047  ;;  %2985 = vmatpush3.bf16.msra.mxu0 %v2090_v51  ;;  %2235 = vmatpush1.bf16.msra.mxu1 %v2051_v50 }
 0x45e   : > { %v2050_v54 = vpop.permute.xlu1 %2049 }
 0x45f   : > { %v2054_v55 = vsel %vm1134_vm11, %v2048_v52, %v2050_v54  ;;  %2066 = vst.msk [vmem:[#allocation4 + $0x1a8] sm:$0xff] %vm722_vm3, %v2050_v54  ;;  %2320 = vmatmul.mubr.bf16.vlgmr.msra.gmra.mrb[8].mxu0 %v3167_v42 }
 0x460   : > { %v2046_v56 = vpop.permute.xlu0 %2045  ;;  %v2117_v57 = vld [vmem:[#allocation4 + $0x190] sm:$0xff]  ;;  %2327 = vmatprep.mubr.bf16.mxu0 %v3170_v44  ;;  %2236 = vmatprep.subr.bf16.mxu1 %v2054_v55 }
 0x461   : > { %v2053_v58 = vsel %vm1134_vm11, %v2046_v56, %v2048_v52  ;;  %3010 = vmatprep.subr.bf16.mxu0 %v2117_v57  ;;  %2224 = vmatmul.mubr.bf16.gmra.mrb[16].mxu1 %v3172_v53  ;;  %vm2589_vm11 = vcmask 1048448  }
 0x462   : > { %3011 = vmatpush3.bf16.msra.mxu0 %v2117_v57  ;;  %2237 = vmatpush1.bf16.msra.mxu1 %v2053_v58 }
 0x463   : > { %2266 = vmatprep.mubr.bf16.mxu1 %v3336_v30 }
 0x466   : > { %v2120_v60 = vld [vmem:[#allocation4 + $0x1a8] sm:$0xff] }
 0x467   : > { %2328 = vmatmul.mubr.bf16.gmra.mrb[12].mxu0 %v3172_v53  ;;  %3012 = vmatprep.subr.bf16.mxu0 %v2120_v60 }
 0x468   : > { %3013 = vmatpush3.bf16.msra.mxu0 %v2120_v60  ;;  %3014 = vmatprep.mubr.msk.bf16.mxu0 %vm722_vm3, %v3173_v59 }
 0x469   : > { %2927 = vmatmul.mubr.msk.bf16.vlgmr.msra.gmra.mrb[12].mxu1 %vm722_vm3, %v3173_v59 }
 0x46a   : > { %2276 = vmatprep.mubr.bf16.mxu1 %v3336_v30 }
 0x46f   : > { %3015 = vmatmul.mubr.msk.bf16.vlgmr.msra.gmra.mrb[16].mxu0 %vm722_vm3, %v3174_v61  ;;  %v4169_v4 = vpop.permute.xlu1 %2127 }
 0x471   : > { %2928 = vmatmul.mubr.msk.bf16.gmra.mrb[16].mxu1 %vm722_vm3, %v3174_v61  ;;  %v4171_v6 = vpop.permute.xlu0 %2132  ;;  %vm2393_vm3 = vcmask 130048  }
 0x473   : > { %v4186_v20 = vpop.permute.xlu1 %2137 }
 0x475   : > { %v4197_v25 = vpop.permute.xlu0 %2142 }
 0x532   : > { %v2986_v62 = vpop.f32.mrb[8].mxu0 }
 0x533   : > { %v2987_v63 = vpop.f32.mrb[9].mxu0 }
 0x534   : > { %v2988_v0 = vadd.f32 %v2987_v63, %v2986_v62  ;;  %v2989_v1 = vpop.f32.mrb[10].mxu0 }
 0x535   : > { %v2990_v2 = vpop.f32.mrb[11].mxu0 }
 0x536   : > { %v2991_v3 = vadd.f32 %v2990_v2, %v2989_v1  ;;  %v2322_v27 = vadd.f32 %v2988_v0, %v4169_v4 }
 0x538   : > { %v2325_v31 = vadd.f32 %v2991_v3, %v4171_v6 }
 0x53a   : > { %v2992_v5 = vpop.f32.mrb[12].mxu0 }
 0x53b   : > { %v2993_v7 = vpop.f32.mrb[13].mxu0 }
 0x53c   : > { %v2994_v30 = vadd.f32 %v2993_v7, %v2992_v5  ;;  %v2995_v8 = vpop.f32.mrb[14].mxu0  ;;  %v2268_v9 = vpop.f32.mrb[12].mxu1 }
 0x53d   : > { %v2996_v11 = vpop.f32.mrb[15].mxu0  ;;  %v3026_v12 = vadd.f32 %v2268_v9, %v4169_v4  ;;  %v2270_v13 = vpop.f32.mrb[13].mxu1 }
 0x53e   : > { %v2997_v14 = vadd.f32 %v2996_v11, %v2995_v8  ;;  %v2272_v15 = vpop.f32.mrb[14].mxu1  ;;  %v2330_v21 = vadd.f32 %v2994_v30, %v4186_v20  ;;  %v3027_v46 = vadd.f32 %v2270_v13, %v4169_v4  ;;  %v2779_v13 = vld [vmem:[%s3527_s12 + $0x8] sm:$0xff] }
 0x53f   : > { %v4181_v17 = vadd.f32 %v2272_v15, %v4171_v6  ;;  %v4183_v18 = vpop.f32.mrb[15].mxu1  ;;  %v2389_v19 = vadd.f32 %v3026_v12, %v4174_v10 }
 0x540   : > { %v2333_v28 = vadd.f32 %v2997_v14, %v4197_v25  ;;  %v3029_v47 = vadd.f32 %v4183_v18, %v4171_v6 }
 0x541   : > { %2394 = vst.msk [vmem:[%s4191_s7] sm:$0xff] %vm2393_vm3, %v2389_v19  ;;  %v2390_v22 = vadd.f32 %v4181_v17, %v4178_v16 }
 0x542   : > { %v3016_v26 = vpop.f32.mrb[16].mxu0 }
 0x543   : > { %v4200_v23 = vadd.f32 %v3016_v26, %v2330_v21  ;;  %v2370_v24 = vpop.f32.mrb[17].mxu0  ;;  %2395 = vst.msk [vmem:[%s4191_s7 + $0x10] sm:$0xff] %vm2393_vm3, %v2390_v22 }
 0x544   : > { %v2371_v29 = vadd.f32 %v2370_v24, %v2322_v27  ;;  %v3017_v32 = vpop.f32.mrb[18].mxu0  ;;  %v2278_v33 = vpop.f32.mrb[16].mxu1 }
 0x545   : > { %v4209_v35 = vadd.f32 %v3017_v32, %v2333_v28  ;;  %v2373_v36 = vpop.f32.mrb[19].mxu0  ;;  %2756 = vrot.lane.b32.xlu0 %v4200_v23, %s4588_s28  ;;  %v4214_v37 = vadd.f32 %v2278_v33, %v4186_v20  ;;  %v2280_v38 = vpop.f32.mrb[17].mxu1  ;;  %v2780_v33 = vld [vmem:[%s3527_s12 + $0x18] sm:$0xff] }
 0x546   : > { %v2374_v39 = vadd.f32 %v2373_v36, %v2325_v31  ;;  %2783 = vrot.lane.b32.xlu1 %v2371_v29, %s4584_s29  ;;  %v2282_v40 = vpop.f32.mrb[18].mxu1  ;;  %v3031_v48 = vadd.f32 %v2280_v38, %v4186_v20 }
 0x547   : > { %v4221_v42 = vadd.f32 %v2282_v40, %v4197_v25  ;;  %v4223_v43 = vpop.f32.mrb[19].mxu1  ;;  %v2391_v44 = vadd.f32 %v4214_v37, %v4207_v34 }
 0x548   : > { %v3033_v49 = vadd.f32 %v4223_v43, %v4197_v25 }
 0x549   : > { %2748 = vrot.lane.b32.xlu0 %v2371_v29, %s4588_s28  ;;  %2396 = vst.msk [vmem:[%s4191_s7 + $0x20] sm:$0xff] %vm2393_vm3, %v2391_v44  ;;  %v2392_v45 = vadd.f32 %v4221_v42, %v4218_v41 }
 0x54a   : > { %2406 = vrot.lane.b32.xlu1 %v3026_v12, %s3329_s15 }
 0x54b   : > { %2397 = vst.msk [vmem:[%s4191_s7 + $0x30] sm:$0xff] %vm2393_vm3, %v2392_v45 }
 0x54d   : > { %2760 = vrot.lane.b32.xlu0 %v4209_v35, %s4588_s28 }
 0x54e   : > { %2431 = vrot.lane.b32.xlu1 %v3026_v12, %s3339_s16 }
 0x551   : > { %2752 = vrot.lane.b32.xlu0 %v2374_v39, %s4588_s28 }
 0x552   : > { %2456 = vrot.lane.b32.xlu1 %v3026_v12, %s3340_s26 }
 0x555   : > { %2785 = vrot.lane.b32.xlu0 %v2374_v39, %s4584_s29  ;;  %s3347_s29 = smov 104  }
 0x556   : > { %2481 = vrot.lane.b32.xlu1 %v3026_v12, %s4586_s6 }
 0x559   : > { %2562 = vrot.lane.b32.xlu0 %v3027_v46, %s3342_s17 }
 0x55a   : > { %2506 = vrot.lane.b32.xlu1 %v3026_v12, %s3343_s11 }
 0x55d   : > { %2408 = vrot.lane.b32.xlu0 %v4181_v17, %s3329_s15 }
 0x55e   : > { %2531 = vrot.lane.b32.xlu1 %v3026_v12, %s3344_s27 }
 0x561   : > { %2433 = vrot.lane.b32.xlu0 %v4181_v17, %s3339_s16 }
 0x562   : > { %2560 = vrot.lane.b32.xlu1 %v3026_v12, %s3342_s17 }
 0x565   : > { %2458 = vrot.lane.b32.xlu0 %v4181_v17, %s3340_s26 }
 0x566   : > { %2598 = vrot.lane.b32.xlu1 %v3027_v46, %s3345_s13 }
 0x569   : > { %2483 = vrot.lane.b32.xlu0 %v4181_v17, %s4586_s6  ;;  %s3348_s6 = smov 102  }
 0x56a   : > { %2622 = vrot.lane.b32.xlu1 %v3027_v46, %s3330_s10 }
 0x56d   : > { %2508 = vrot.lane.b32.xlu0 %v4181_v17, %s3343_s11 }
 0x56e   : > { %2646 = vrot.lane.b32.xlu1 %v3027_v46, %s4613_s14 }
 0x571   : > { %2533 = vrot.lane.b32.xlu0 %v4181_v17, %s3344_s27 }
 0x572   : > { %2670 = vrot.lane.b32.xlu1 %v3027_v46, %s3346_s24 }
 0x575   : > { %2566 = vrot.lane.b32.xlu0 %v3029_v47, %s3342_s17 }
 0x576   : > { %2694 = vrot.lane.b32.xlu1 %v3027_v46, %s3347_s29 }
 0x579   : > { %2600 = vrot.lane.b32.xlu0 %v3029_v47, %s3345_s13 }
 0x57a   : > { %2718 = vrot.lane.b32.xlu1 %v3027_v46, %s3348_s6 }
 0x57d   : > { %2624 = vrot.lane.b32.xlu0 %v3029_v47, %s3330_s10 }
 0x57e   : > { %2746 = vrot.lane.b32.xlu1 %v3027_v46, %s4588_s28 }
 0x581   : > { %2648 = vrot.lane.b32.xlu0 %v3029_v47, %s4613_s14 }
 0x582   : > { %2564 = vrot.lane.b32.xlu1 %v4181_v17, %s3342_s17 }
 0x585   : > { %2672 = vrot.lane.b32.xlu0 %v3029_v47, %s3346_s24 }
 0x586   : > { %2750 = vrot.lane.b32.xlu1 %v3029_v47, %s4588_s28  ;;  %s4617_s28 = smov 120  }
 0x589   : > { %2696 = vrot.lane.b32.xlu0 %v3029_v47, %s3347_s29 }
 0x58a   : > { %2410 = vrot.lane.b32.xlu1 %v4214_v37, %s3329_s15 }
 0x58d   : > { %2720 = vrot.lane.b32.xlu0 %v3029_v47, %s3348_s6 }
 0x58e   : > { %2435 = vrot.lane.b32.xlu1 %v4214_v37, %s3339_s16 }
 0x591   : > { %2570 = vrot.lane.b32.xlu0 %v3031_v48, %s3342_s17 }
 0x592   : > { %2460 = vrot.lane.b32.xlu1 %v4214_v37, %s3340_s26 }
 0x595   : > { %2412 = vrot.lane.b32.xlu0 %v4221_v42, %s3329_s15  ;;  %s4618_s15 = smov 100  }
 0x596   : > { %2485 = vrot.lane.b32.xlu1 %v4214_v37, %s4617_s28 }
 0x599   : > { %2437 = vrot.lane.b32.xlu0 %v4221_v42, %s3339_s16 }
 0x59a   : > { %2510 = vrot.lane.b32.xlu1 %v4214_v37, %s3343_s11 }
 0x59d   : > { %2462 = vrot.lane.b32.xlu0 %v4221_v42, %s3340_s26 }
 0x59e   : > { %2535 = vrot.lane.b32.xlu1 %v4214_v37, %s3344_s27 }
 0x5a1   : > { %2487 = vrot.lane.b32.xlu0 %v4221_v42, %s4617_s28 }
 0x5a2   : > { %2568 = vrot.lane.b32.xlu1 %v4214_v37, %s3342_s17 }
 0x5a5   : > { %2512 = vrot.lane.b32.xlu0 %v4221_v42, %s3343_s11 }
 0x5a6   : > { %2602 = vrot.lane.b32.xlu1 %v3031_v48, %s3345_s13 }
 0x5a9   : > { %2537 = vrot.lane.b32.xlu0 %v4221_v42, %s3344_s27 }
 0x5aa   : > { %2626 = vrot.lane.b32.xlu1 %v3031_v48, %s3330_s10 }
 0x5ad   : > { %2574 = vrot.lane.b32.xlu0 %v3033_v49, %s3342_s17 }
 0x5ae   : > { %2650 = vrot.lane.b32.xlu1 %v3031_v48, %s4613_s14 }
 0x5b1   : > { %2604 = vrot.lane.b32.xlu0 %v3033_v49, %s3345_s13 }
 0x5b2   : > { %2674 = vrot.lane.b32.xlu1 %v3031_v48, %s3346_s24 }
 0x5b5   : > { %2628 = vrot.lane.b32.xlu0 %v3033_v49, %s3330_s10  ;;  %s4619_s10 = smov 98  }
 0x5b6   : > { %2698 = vrot.lane.b32.xlu1 %v3031_v48, %s3347_s29 }
 0x5b7   : > { %v4316_v50 = vpop.permute.xlu0 %2756 }
 0x5b8   : > { %v4318_v51 = vpop.permute.xlu1 %2783 }
 0x5b9   : > { %2652 = vrot.lane.b32.xlu0 %v3033_v49, %s4613_s14  ;;  %v2795_v45 = vadd.f32 %v4318_v51, %v2779_v13  ;;  %s2817_s14 = sshll.u32 %s4191_s7, 4  ;;  %s4519_s14 = int_to_ptr.vmem [resolvable:$true] %s2817_s14 }
 0x5ba   : > { %2722 = vrot.lane.b32.xlu1 %v3031_v48, %s3348_s6  ;;  %s3233_s26 = scalar_lea.vmem %s4519_s14, 1024 }
 0x5bb   : > { %v4322_v52 = vpop.permute.xlu0 %2748  ;;  %p3234_p4 = scmp.ne.s32.totalorder %s4519_s14, %s3233_s26 }
 0x5bc   : > { %v2407_v53 = vpop.permute.xlu1 %2406 }
 0x5bd   : > { %v2418_v54 = vadd.f32 %v2407_v53, %v4174_v10  ;;  %2676 = vrot.lane.b32.xlu0 %v3033_v49, %s3346_s24  ;;  %p3235_p6 = pnand %p3234_p4, %p3473_p12 }
 0x5be   : > { %2754 = vrot.lane.b32.xlu1 %v3031_v48, %s4618_s15 }
 0x5bf   : > { %2423 = vst.msk [vmem:[%s4191_s7] sm:$0xff] %vm2422_vm4, %v2418_v54  ;;  %v4329_v55 = vpop.permute.xlu0 %2760  ;;  %p3236_p8 = pneg %p3235_p6 }
 0x5c0   : > { %v2432_v56 = vpop.permute.xlu1 %2431 }
 0x5c1   : > { %v2443_v57 = vadd.f32 %v2432_v56, %v4174_v10  ;;  %2700 = vrot.lane.b32.xlu0 %v3033_v49, %s3347_s29 }
 0x5c2   : > { %2572 = vrot.lane.b32.xlu1 %v4221_v42, %s3342_s17 }
 0x5c3   : > { %2448 = vst.msk [vmem:[%s4191_s7] sm:$0xff] %vm2447_vm5, %v2443_v57  ;;  %v4337_v58 = vpop.permute.xlu0 %2752 }
 0x5c4   : > { %v2457_v59 = vpop.permute.xlu1 %2456 }
 0x5c5   : > { %v2468_v60 = vadd.f32 %v2457_v59, %v4174_v10  ;;  %2724 = vrot.lane.b32.xlu0 %v3033_v49, %s3348_s6  ;;  %s3349_s6 = smov [#allocation10]  }
 0x5c6   : > { %2758 = vrot.lane.b32.xlu1 %v3033_v49, %s4618_s15  ;;  %s3237_s17 = sshll.u32 %s3349_s6, 4  ;;  %s3238_s17 = int_to_ptr.vmem [resolvable:$false] %s3237_s17 }
 0x5c7   : > { %2473 = vst.msk [vmem:[%s4191_s7] sm:$0xff] %vm2472_vm6, %v2468_v60  ;;  %v4344_v61 = vpop.permute.xlu0 %2785  ;;  %s3239_s11 = scalar_lea.vmem %s3238_s17, 2048  ;;  %p3240_p10 = scmp.lt.s32.totalorder %s4519_s14, %s3238_s17 }
 0x5c8   : > { %v2482_v62 = vpop.permute.xlu1 %2481  ;;  %p3241_p13 = scmp.lt.s32.totalorder %s3239_s11, %s3233_s26 }
 0x5c9   : > { %v2493_v63 = vadd.f32 %v2482_v62, %v4174_v10  ;;  %2789 = vrot.lane.b32.xlu0 %v4209_v35, %s4619_s10 }
 0x5ca   : > { %2787 = vrot.lane.b32.xlu1 %v4200_v23, %s4619_s10  ;;  %p3242_p3 = por %p3241_p13, %p3240_p10 }
 0x5cb   : > { %2498 = vst.msk [vmem:[%s4191_s7] sm:$0xff] %vm2497_vm7, %v2493_v63  ;;  %v2563_v0 = vpop.permute.xlu0 %2562 }
 0x5cc   : > { %v2507_v1 = vpop.permute.xlu1 %2506  ;;  %p3243_p7 = pnand %p3242_p3, %p3236_p8 }
 0x5cd   : > { %v2518_v2 = vadd.f32 %v2507_v1, %v4174_v10 }
 0x5cf   : > { %2523 = vst.msk [vmem:[%s4191_s7] sm:$0xff] %vm2522_vm8, %v2518_v2  ;;  %v2409_v3 = vpop.permute.xlu0 %2408 }
 0x5d0   : > { %v2419_v4 = vadd.f32 %v2409_v3, %v4178_v16  ;;  %v2532_v5 = vpop.permute.xlu1 %2531  ;;  %v2796_v3 = vadd.f32 %v4344_v61, %v2780_v33 }
 0x5d1   : > { %v2543_v6 = vadd.f32 %v2532_v5, %v4174_v10 }
 0x5d2   : > { %2424 = vst.msk [vmem:[%s4191_s7 + $0x10] sm:$0xff] %vm2422_vm4, %v2419_v4 }
 0x5d3   : > { %2548 = vst.msk [vmem:[%s4191_s7] sm:$0xff] %vm2547_vm9, %v2543_v6  ;;  %v2434_v7 = vpop.permute.xlu0 %2433 }
 0x5d4   : > { %v2444_v30 = vadd.f32 %v2434_v7, %v4178_v16  ;;  %v2561_v8 = vpop.permute.xlu1 %2560 }
 0x5d5   : > { %v2577_v9 = vsel %vm2576_vm10, %v2561_v8, %v2563_v0 }
 0x5d6   : > { %2449 = vst.msk [vmem:[%s4191_s7 + $0x10] sm:$0xff] %vm2447_vm5, %v2444_v30  ;;  %v2585_v11 = vadd.f32 %v2577_v9, %v4174_v10 }
 0x5d7   : > { %v2459_v12 = vpop.permute.xlu0 %2458 }
 0x5d8   : > { %2590 = vst.msk [vmem:[%s4191_s7] sm:$0xff] %vm2589_vm11, %v2585_v11  ;;  %v2469_v14 = vadd.f32 %v2459_v12, %v4178_v16  ;;  %v2599_v15 = vpop.permute.xlu1 %2598 }
 0x5d9   : > { %v2610_v17 = vadd.f32 %v2779_v13, %v2599_v15 }
 0x5da   : > { %2474 = vst.msk [vmem:[%s4191_s7 + $0x10] sm:$0xff] %vm2472_vm6, %v2469_v14 }
 0x5db   : > { %2614 = vst.msk [vmem:[%s4191_s7 + $0x8] sm:$0xff] %vm2393_vm3, %v2610_v17  ;;  %v2484_v18 = vpop.permute.xlu0 %2483 }
 0x5dc   : > { %v2494_v19 = vadd.f32 %v2484_v18, %v4178_v16  ;;  %v2623_v10 = vpop.permute.xlu1 %2622 }
 0x5dd   : > { %v2634_v20 = vadd.f32 %v2779_v13, %v2623_v10 }
 0x5de   : > { %2499 = vst.msk [vmem:[%s4191_s7 + $0x10] sm:$0xff] %vm2497_vm7, %v2494_v19 }
 0x5df   : > { %2638 = vst.msk [vmem:[%s4191_s7 + $0x8] sm:$0xff] %vm2422_vm4, %v2634_v20  ;;  %v2509_v21 = vpop.permute.xlu0 %2508 }
 0x5e0   : > { %v2519_v22 = vadd.f32 %v2509_v21, %v4178_v16  ;;  %v2647_v25 = vpop.permute.xlu1 %2646 }
 0x5e1   : > { %v2658_v26 = vadd.f32 %v2779_v13, %v2647_v25 }
 0x5e2   : > { %2524 = vst.msk [vmem:[%s4191_s7 + $0x10] sm:$0xff] %vm2522_vm8, %v2519_v22  ;;  %v4458_v22 = vld [vmem:[%s3527_s12 + $0x28] sm:$0xff] }
 0x5e3   : > { %2662 = vst.msk [vmem:[%s4191_s7 + $0x8] sm:$0xff] %vm2447_vm5, %v2658_v26  ;;  %v2534_v27 = vpop.permute.xlu0 %2533 }
 0x5e4   : > { %v2544_v23 = vadd.f32 %v2534_v27, %v4178_v16  ;;  %v2671_v24 = vpop.permute.xlu1 %2670 }
 0x5e5   : > { %v2682_v28 = vadd.f32 %v2779_v13, %v2671_v24 }
 0x5e6   : > { %2549 = vst.msk [vmem:[%s4191_s7 + $0x10] sm:$0xff] %vm2547_vm9, %v2544_v23 }
 0x5e7   : > { %2686 = vst.msk [vmem:[%s4191_s7 + $0x8] sm:$0xff] %vm2472_vm6, %v2682_v28  ;;  %v2567_v29 = vpop.permute.xlu0 %2566 }
 0x5e8   : > { %v2695_v32 = vpop.permute.xlu1 %2694 }
 0x5e9   : > { %v2706_v31 = vadd.f32 %v2779_v13, %v2695_v32 }
 0x5eb   : > { %2710 = vst.msk [vmem:[%s4191_s7 + $0x8] sm:$0xff] %vm2497_vm7, %v2706_v31  ;;  %v2601_v35 = vpop.permute.xlu0 %2600 }
 0x5ec   : > { %v2611_v36 = vadd.f32 %v2780_v33, %v2601_v35  ;;  %v2719_v37 = vpop.permute.xlu1 %2718  ;;  %v2597_v35 = vld [vmem:[%s3527_s12 + $0x38] sm:$0xff]  ;;  %s2937_s12 = sshll.u32 %s3403_s22, 10  ;;  %s2804_s22 = scalar_lea.sflag [#allocation7], %s3521_s23 }
 0x5ed   : > { %v2730_v38 = vadd.f32 %v2779_v13, %v2719_v37  ;;  %s4517_s16 = scalar_lea.hbm %s4573_s5, %s2937_s12 }
 0x5ee   : > { %2615 = vst.msk [vmem:[%s4191_s7 + $0x18] sm:$0xff] %vm2393_vm3, %v2611_v36 }
 0x5ef   : > { %2734 = vst.msk [vmem:[%s4191_s7 + $0x8] sm:$0xff] %vm2522_vm8, %v2730_v38  ;;  %v2625_v39 = vpop.permute.xlu0 %2624 }
 0x5f0   : > { %v2635_v40 = vadd.f32 %v2780_v33, %v2625_v39  ;;  %v2747_v42 = vpop.permute.xlu1 %2746 }
 0x5f1   : > { %v2763_v43 = vsel %vm2762_vm12, %v2747_v42, %v4322_v52 }
 0x5f2   : > { %2639 = vst.msk [vmem:[%s4191_s7 + $0x18] sm:$0xff] %vm2422_vm4, %v2635_v40  ;;  %v2771_v44 = vadd.f32 %v2779_v13, %v2763_v43 }
 0x5f3   : > { %v2649_v46 = vpop.permute.xlu0 %2648 }
 0x5f4   : > { %2775 = vst.msk [vmem:[%s4191_s7 + $0x8] sm:$0xff] %vm2547_vm9, %v2771_v44  ;;  %v2659_v47 = vadd.f32 %v2780_v33, %v2649_v46  ;;  %v2565_v48 = vpop.permute.xlu1 %2564 }
 0x5f5   : > { %2799 = vst.msk [vmem:[%s4191_s7 + $0x8] sm:$0xff] %vm2589_vm11, %v2795_v45  ;;  %v2578_v49 = vsel %vm2576_vm10, %v2565_v48, %v2567_v29 }
 0x5f6   : > { %2663 = vst.msk [vmem:[%s4191_s7 + $0x18] sm:$0xff] %vm2447_vm5, %v2659_v47  ;;  %v2586_v52 = vadd.f32 %v2578_v49, %v4178_v16 }
 0x5f7   : > { %v2673_v53 = vpop.permute.xlu0 %2672 }
 0x5f8   : > { %2591 = vst.msk [vmem:[%s4191_s7 + $0x10] sm:$0xff] %vm2589_vm11, %v2586_v52  ;;  %v2683_v54 = vadd.f32 %v2780_v33, %v2673_v53  ;;  %v2751_v51 = vpop.permute.xlu1 %2750 }
 0x5f9   : > { %v2764_v62 = vsel %vm2762_vm12, %v2751_v51, %v4337_v58 }
 0x5fa   : > { %2687 = vst.msk [vmem:[%s4191_s7 + $0x18] sm:$0xff] %vm2472_vm6, %v2683_v54  ;;  %v2772_v1 = vadd.f32 %v2780_v33, %v2764_v62 }
 0x5fb   : > { %v2697_v56 = vpop.permute.xlu0 %2696 }
 0x5fc   : > { %v2707_v57 = vadd.f32 %v2780_v33, %v2697_v56  ;;  %v2411_v59 = vpop.permute.xlu1 %2410 }
 0x5fd   : > { %v2420_v60 = vadd.f32 %v2411_v59, %v4207_v34 }
 0x5fe   : > { %2711 = vst.msk [vmem:[%s4191_s7 + $0x18] sm:$0xff] %vm2497_vm7, %v2707_v57 }
 0x5ff   : > { %2425 = vst.msk [vmem:[%s4191_s7 + $0x20] sm:$0xff] %vm2422_vm4, %v2420_v60  ;;  %v2721_v16 = vpop.permute.xlu0 %2720 }
 0x600   : > { %v2731_v63 = vadd.f32 %v2780_v33, %v2721_v16  ;;  %v2436_v0 = vpop.permute.xlu1 %2435 }
 0x601   : > { %v2445_v2 = vadd.f32 %v2436_v0, %v4207_v34 }
 0x602   : > { %2735 = vst.msk [vmem:[%s4191_s7 + $0x18] sm:$0xff] %vm2522_vm8, %v2731_v63 }
 0x603   : > { %2776 = vst.msk [vmem:[%s4191_s7 + $0x18] sm:$0xff] %vm2547_vm9, %v2772_v1  ;;  %v2571_v58 = vpop.permute.xlu0 %2570 }
 0x604   : > { %2450 = vst.msk [vmem:[%s4191_s7 + $0x20] sm:$0xff] %vm2447_vm5, %v2445_v2  ;;  %v2461_v4 = vpop.permute.xlu1 %2460 }
 0x605   : > { %2800 = vst.msk [vmem:[%s4191_s7 + $0x18] sm:$0xff] %vm2589_vm11, %v2796_v3  ;;  %v2470_v5 = vadd.f32 %v2461_v4, %v4207_v34 }
 0x607   : > { %2475 = vst.msk [vmem:[%s4191_s7 + $0x20] sm:$0xff] %vm2472_vm6, %v2470_v5  ;;  %v2413_v6 = vpop.permute.xlu0 %2412 }
 0x608   : > { %v2421_v61 = vadd.f32 %v2413_v6, %v4218_v41  ;;  %v2486_v7 = vpop.permute.xlu1 %2485 }
 0x609   : > { %v2495_v30 = vadd.f32 %v2486_v7, %v4207_v34 }
 0x60a   : > { %2426 = vst.msk [vmem:[%s4191_s7 + $0x30] sm:$0xff] %vm2422_vm4, %v2421_v61 }
 0x60b   : > { %2500 = vst.msk [vmem:[%s4191_s7 + $0x20] sm:$0xff] %vm2497_vm7, %v2495_v30  ;;  %v2438_v8 = vpop.permute.xlu0 %2437 }
 0x60c   : > { %v2446_v9 = vadd.f32 %v2438_v8, %v4218_v41  ;;  %v2511_v11 = vpop.permute.xlu1 %2510 }
 0x60d   : > { %v2520_v12 = vadd.f32 %v2511_v11, %v4207_v34 }
 0x60e   : > { %2451 = vst.msk [vmem:[%s4191_s7 + $0x30] sm:$0xff] %vm2447_vm5, %v2446_v9 }
 0x60f   : > { %2525 = vst.msk [vmem:[%s4191_s7 + $0x20] sm:$0xff] %vm2522_vm8, %v2520_v12  ;;  %v2463_v13 = vpop.permute.xlu0 %2462 }
 0x610   : > { %v2471_v14 = vadd.f32 %v2463_v13, %v4218_v41  ;;  %v2536_v15 = vpop.permute.xlu1 %2535 }
 0x611   : > { %v2545_v17 = vadd.f32 %v2536_v15, %v4207_v34 }
 0x612   : > { %2476 = vst.msk [vmem:[%s4191_s7 + $0x30] sm:$0xff] %vm2472_vm6, %v2471_v14 }
 0x613   : > { %2550 = vst.msk [vmem:[%s4191_s7 + $0x20] sm:$0xff] %vm2547_vm9, %v2545_v17  ;;  %v2488_v18 = vpop.permute.xlu0 %2487 }
 0x614   : > { %v2496_v19 = vadd.f32 %v2488_v18, %v4218_v41  ;;  %v2569_v10 = vpop.permute.xlu1 %2568 }
 0x615   : > { %v2579_v20 = vsel %vm2576_vm10, %v2569_v10, %v2571_v58 }
 0x616   : > { %2501 = vst.msk [vmem:[%s4191_s7 + $0x30] sm:$0xff] %vm2497_vm7, %v2496_v19  ;;  %v2587_v21 = vadd.f32 %v2579_v20, %v4207_v34 }
 0x617   : > { %v2513_v25 = vpop.permute.xlu0 %2512 }
 0x618   : > { %2592 = vst.msk [vmem:[%s4191_s7 + $0x20] sm:$0xff] %vm2589_vm11, %v2587_v21  ;;  %v2521_v26 = vadd.f32 %v2513_v25, %v4218_v41  ;;  %v2603_v27 = vpop.permute.xlu1 %2602 }
 0x619   : > { %v2612_v23 = vadd.f32 %v2603_v27, %v4458_v22 }
 0x61a   : > { %2526 = vst.msk [vmem:[%s4191_s7 + $0x30] sm:$0xff] %vm2522_vm8, %v2521_v26 }
 0x61b   : > { %2616 = vst.msk [vmem:[%s4191_s7 + $0x28] sm:$0xff] %vm2393_vm3, %v2612_v23  ;;  %v2538_v24 = vpop.permute.xlu0 %2537 }
 0x61c   : > { %v2546_v34 = vadd.f32 %v2538_v24, %v4218_v41  ;;  %v2627_v28 = vpop.permute.xlu1 %2626 }
 0x61d   : > { %v2636_v29 = vadd.f32 %v2627_v28, %v4458_v22 }
 0x61e   : > { %2551 = vst.msk [vmem:[%s4191_s7 + $0x30] sm:$0xff] %vm2547_vm9, %v2546_v34 }
 0x61f   : > { %2640 = vst.msk [vmem:[%s4191_s7 + $0x28] sm:$0xff] %vm2422_vm4, %v2636_v29  ;;  %v2575_v32 = vpop.permute.xlu0 %2574 }
 0x620   : > { %v2651_v31 = vpop.permute.xlu1 %2650 }
 0x621   : > { %v2660_v33 = vadd.f32 %v2651_v31, %v4458_v22 }
 0x623   : > { %2664 = vst.msk [vmem:[%s4191_s7 + $0x28] sm:$0xff] %vm2447_vm5, %v2660_v33  ;;  %v2605_v36 = vpop.permute.xlu0 %2604 }
 0x624   : > { %v2613_v37 = vadd.f32 %v2605_v36, %v2597_v35  ;;  %v2675_v38 = vpop.permute.xlu1 %2674 }
 0x625   : > { %v2684_v39 = vadd.f32 %v2675_v38, %v4458_v22 }
 0x626   : > { %2617 = vst.msk [vmem:[%s4191_s7 + $0x38] sm:$0xff] %vm2393_vm3, %v2613_v37 }
 0x627   : > { %2688 = vst.msk [vmem:[%s4191_s7 + $0x28] sm:$0xff] %vm2472_vm6, %v2684_v39  ;;  %v2629_v40 = vpop.permute.xlu0 %2628 }
 0x628   : > { %v2637_v42 = vadd.f32 %v2629_v40, %v2597_v35  ;;  %v2699_v43 = vpop.permute.xlu1 %2698 }
 0x629   : > { %v2708_v44 = vadd.f32 %v2699_v43, %v4458_v22 }
 0x62a   : > { %2641 = vst.msk [vmem:[%s4191_s7 + $0x38] sm:$0xff] %vm2422_vm4, %v2637_v42 }
 0x62b   : > { %2712 = vst.msk [vmem:[%s4191_s7 + $0x28] sm:$0xff] %vm2497_vm7, %v2708_v44  ;;  %v2653_v45 = vpop.permute.xlu0 %2652 }
 0x62c   : > { %v2661_v46 = vadd.f32 %v2653_v45, %v2597_v35  ;;  %v2723_v47 = vpop.permute.xlu1 %2722 }
 0x62d   : > { %v2732_v48 = vadd.f32 %v2723_v47, %v4458_v22 }
 0x62e   : > { %2665 = vst.msk [vmem:[%s4191_s7 + $0x38] sm:$0xff] %vm2447_vm5, %v2661_v46 }
 0x62f   : > { %2736 = vst.msk [vmem:[%s4191_s7 + $0x28] sm:$0xff] %vm2522_vm8, %v2732_v48  ;;  %v2677_v49 = vpop.permute.xlu0 %2676 }
 0x630   : > { %v2685_v52 = vadd.f32 %v2677_v49, %v2597_v35  ;;  %v2755_v53 = vpop.permute.xlu1 %2754 }
 0x631   : > { %v2765_v54 = vsel %vm2762_vm12, %v2755_v53, %v4316_v50 }
 0x632   : > { %2689 = vst.msk [vmem:[%s4191_s7 + $0x38] sm:$0xff] %vm2472_vm6, %v2685_v52  ;;  %v2773_v51 = vadd.f32 %v2765_v54, %v4458_v22 }
 0x633   : > { %v2701_v56 = vpop.permute.xlu0 %2700 }
 0x634   : > { %2777 = vst.msk [vmem:[%s4191_s7 + $0x28] sm:$0xff] %vm2547_vm9, %v2773_v51  ;;  %v2709_v57 = vadd.f32 %v2701_v56, %v2597_v35  ;;  %v2573_v59 = vpop.permute.xlu1 %2572 }
 0x635   : > { %v2580_v60 = vsel %vm2576_vm10, %v2573_v59, %v2575_v32 }
 0x636   : > { %2713 = vst.msk [vmem:[%s4191_s7 + $0x38] sm:$0xff] %vm2497_vm7, %v2709_v57  ;;  %v2588_v62 = vadd.f32 %v2580_v60, %v4218_v41 }
 0x637   : > { %v2725_v16 = vpop.permute.xlu0 %2724 }
 0x638   : > { %2593 = vst.msk [vmem:[%s4191_s7 + $0x30] sm:$0xff] %vm2589_vm11, %v2588_v62  ;;  %v2733_v50 = vadd.f32 %v2725_v16, %v2597_v35  ;;  %v2759_v63 = vpop.permute.xlu1 %2758 }
 0x639   : > { %v2766_v0 = vsel %vm2762_vm12, %v2759_v63, %v4329_v55 }
 0x63a   : > { %2737 = vst.msk [vmem:[%s4191_s7 + $0x38] sm:$0xff] %vm2522_vm8, %v2733_v50  ;;  %v2774_v1 = vadd.f32 %v2766_v0, %v2597_v35 }
 0x63b   : > { %v2790_v2 = vpop.permute.xlu0 %2789 }
 0x63c   : > { %2778 = vst.msk [vmem:[%s4191_s7 + $0x38] sm:$0xff] %vm2547_vm9, %v2774_v1  ;;  %v2798_v41 = vadd.f32 %v2790_v2, %v2597_v35  ;;  %v2788_v3 = vpop.permute.xlu1 %2787 }
 0x63d   : > { %v2797_v55 = vadd.f32 %v2788_v3, %v4458_v22 }
 0x63e   : > { %2802 = vst.msk [vmem:[%s4191_s7 + $0x38] sm:$0xff] %vm2589_vm11, %v2798_v41 }
 0x63f   : > { %2801 = vst.msk [vmem:[%s4191_s7 + $0x28] sm:$0xff] %vm2589_vm11, %v2797_v55 }
 0x640   : > { %3246 = shalt.err (!%p3243_p7)
}
 0x641   : > { %s3247_s7 = scalar_lea.hbm %s4517_s16, 1024  ;;  %s3251_s24 = scalar_lea.hbm %s4573_s5, 2048 }
 0x642   : > { %p3248_p9 = scmp.ne.s32.totalorder %s4517_s16, %s3247_s7  ;;  %p3252_p5 = scmp.lt.u32.totalorder %s4517_s16, %s4573_s5 }
 0x643   : > { %p3253_p11 = scmp.lt.u32.totalorder %s3251_s24, %s3247_s7  ;;  %p3255_p4 = scmp.lt.u32.totalorder %s3247_s7, %s4517_s16 }
 0x644   : > { %p3249_p2 = pnand %p3248_p9, %p3473_p12 }
 0x645   : > { %p3254_p1 = por %p3253_p11, %p3252_p5 }
 0x646   : > { %p3250_p0 = pneg %p3249_p2 }
 0x647   : > { %p3256_p6 = por %p3255_p4, %p3254_p1 }
 0x649   : > { %p3257_p8 = pnand %p3256_p6, %p3250_p0 }
 0x64b   : > { %3260 = shalt.err (!%p3257_p8)
}
 0x64c   : > { %s3350_s12 = smov 256   ;;  %s3351_s28 = smov 16  }
 0x64d   : > { %3062 = dma.vmem_to_hbm [thread:$0]  (%p3473_p12), %s4519_s14, 1024, %s4517_s16, %s2804_s22, %s3350_s12, %s3350_s12, %s3351_s28  }
 0x64e PF: > { %s2832_s29 = sand.u32 1, %s3291_s18   ;;  %p4620_p10 = scmp.ne.s32.totalorder %s4591_s25, 0 }
 0x64f   : > { %p4621_p13 = scmp.ge.s32.totalorder %s3303_s21, 2  ;;  %s2833_s26 = scalar_lea.sflag [#allocation7], %s2832_s29 }
 0x651   : > { %p3073_p3 = pnand %p4621_p13, %p4620_p10 }
 0x653   : > { %3286 = dma.done.wait (!%p3073_p3), %s2833_s26, 1024  }
 0x654   : > { %3288 = vsyncadd (!%p3073_p3), %s2833_s26, 4294966272  ;;  %p19_p7 = scmp.ge.s32.totalorder %s3438_s30, 4   ;;  %s4622_s18 = smov %s3295_s19 }
 0x655   : > { %s4623_s19 = smov %s3299_s20  ;;  %s4624_s20 = smov %s3469_s8 }
 0x656   : > { %s4625_s21 = smov %s3438_s30  ;;  %21 = sbr.rel (!%p19_p7) target bundleno = 6 (0x6), region = 89 }
 0x65d   :  { %2838 = vsyncpa [#allocation6], 1 }
 0x65e   :  { %2840 = vsyncpa [#allocation6 + $0x1], 1 }
 0x65f   :  { %2841 = vsyncpa [#allocation9], 1 }
 0x660   :  { %2842 = vsyncpa [#allocation7], 1 }
 0x661   :  { %2844 = vsyncpa [#allocation7 + $0x1], 1 }

</bundles_post_ra>
